<compile_context>
chip_gen: v5e
topology: v5e:2x2
jax: 0.10.0
libtpu: 0.0.40
codegen_flags: <defaults>
</compile_context>

<pallas_src>
import functools
import math

import jax
import jax.numpy as jnp
from jax.experimental import pallas as pl
from jax.experimental.pallas import tpu as pltpu

EPS = 1e-5
LANE = 128                        # channel padding target (lane-dense outputs)
MATMUL_DTYPE = jnp.bfloat16       # MXU-native inputs; accumulate in f32
VMEM_LIMIT = 32 * 1024 * 1024     # safe on v5e/v6e/v7x


def _round_up(c, m=LANE):
    return ((c + m - 1) // m) * m


# ---------------------------------------------------------------------------
# Pallas kernels
# ---------------------------------------------------------------------------
def _conv3x3_acc(x_refs, w_ref, stride, ho, wo):
    """3x3 conv formed as 9 accumulating MXU dots over shifted in-VMEM views.

    x_refs: (xpad,) for stride 1, shape (1, ho+2, wo+2, Cin);  or the four
    even/odd spatial phases of the padded input for stride 2, each
    (1, ho+1, wo+1, Cin).  w_ref: (9, Cin, Cout) bf16.  Returns f32 (ho*wo, Cout).
    """
    cin = x_refs[0].shape[-1]
    cout = w_ref.shape[-1]
    acc = jnp.zeros((ho * wo, cout), jnp.float32)
    for kh in range(3):
        for kw in range(3):
            if stride == 1:
                tap = x_refs[0][0, kh:kh + ho, kw:kw + wo, :]
            else:  # stride 2: tap (kh,kw) is a contiguous window of one phase
                ph = x_refs[2 * (kh % 2) + (kw % 2)]
                tap = ph[0, kh // 2:kh // 2 + ho, kw // 2:kw // 2 + wo, :]
            tap = tap.reshape(ho * wo, cin).astype(MATMUL_DTYPE)
            acc += jnp.dot(tap, w_ref[kh * 3 + kw],
                           preferred_element_type=jnp.float32)
    return acc


def _accum_stats(st_ref, vals):
    # single-pass per-channel sum / sum-of-squares (f32), accumulated cross-tile
    st_ref[0:1, :] += jnp.sum(vals, axis=0, keepdims=True)
    st_ref[1:2, :] += jnp.sum(vals * vals, axis=0, keepdims=True)


def _conv1_kernel(*args, stride, with_shortcut, ho, wo):
    """Pass A: conv1 (3x3, stride s) + BN stats (+ fused 1x1 shortcut conv + stats)."""
    nx = 4 if stride == 2 else 1
    x_refs = args[:nx]
    if with_shortcut:
        w1_ref, wsc_ref, y1_ref, sc_ref, st1_ref, stsc_ref = args[nx:]
    else:
        w1_ref, y1_ref, st1_ref = args[nx:]
        wsc_ref = sc_ref = stsc_ref = None

    @pl.when(pl.program_id(0) == 0)
    def _():
        st1_ref[...] = jnp.zeros_like(st1_ref)
        if with_shortcut:
            stsc_ref[...] = jnp.zeros_like(stsc_ref)

    acc = _conv3x3_acc(x_refs, w1_ref, stride, ho, wo)
    y1_ref[0] = acc.reshape(ho, wo, -1)
    _accum_stats(st1_ref, acc)

    if with_shortcut:                       # 1x1 conv; stride folded into the view
        if stride == 2:
            xs = x_refs[3][0, 0:ho, 0:wo, :]          # phase(1,1)[i,j] == x[2i,2j]
        else:
            xs = x_refs[0][0, 1:ho + 1, 1:wo + 1, :]  # centre of the halo tile
        cin = xs.shape[-1]
        sc = jnp.dot(xs.reshape(ho * wo, cin).astype(MATMUL_DTYPE), wsc_ref[...],
                     preferred_element_type=jnp.float32)
        sc_ref[0] = sc.reshape(ho, wo, -1)
        _accum_stats(stsc_ref, sc)


def _conv2_kernel(y1_ref, s1_ref, b1_ref, w2_ref, y2_ref, st2_ref, y1p_scr,
                  *, ho, wo):
    """Pass B: BN1(+ReLU) applied in VMEM, then conv2 (3x3, stride 1) + BN stats."""
    @pl.when(pl.program_id(0) == 0)
    def _():
        st2_ref[...] = jnp.zeros_like(st2_ref)
        y1p_scr[...] = jnp.zeros_like(y1p_scr)   # border stays 0 on later steps

    # BN1 (global batch stats folded into per-channel scale/shift) + ReLU, in f32.
    y1 = jnp.maximum(y1_ref[0] * s1_ref[...] + b1_ref[...], 0.0)
    # Zero-halo copy kept in VMEM for the 3x3 taps of conv2 (padding = 1).
    y1p_scr[0, 1:ho + 1, 1:wo + 1, :] = y1
    acc = _conv3x3_acc((y1p_scr,), w2_ref, 1, ho, wo)
    y2_ref[0] = acc.reshape(ho, wo, -1)
    _accum_stats(st2_ref, acc)


def _finalize_conv_kernel(y2_ref, sc_ref, s2_ref, b2_ref, ssc_ref, bsc_ref,
                          w1n_ref, act_ref, y1n_ref, st1n_ref, pad_scr,
                          *, ho, wo):
    """Fused pass C_i + A_{i+1}: BN2 + BN_sc/identity + add + ReLU, then the
    next block's conv1 (3x3, stride 1) + BN stats, all in one VMEM pass."""
    @pl.when(pl.program_id(0) == 0)
    def _():
        st1n_ref[...] = jnp.zeros_like(st1n_ref)
        pad_scr[...] = jnp.zeros_like(pad_scr)   # border stays 0 on later steps

    act = jnp.maximum(y2_ref[0] * s2_ref[...] + b2_ref[...]
                      + sc_ref[0] * ssc_ref[...] + bsc_ref[...], 0.0)
    act_ref[0] = act                             # residual output (next shortcut)
    pad_scr[0, 1:ho + 1, 1:wo + 1, :] = act
    acc = _conv3x3_acc((pad_scr,), w1n_ref, 1, ho, wo)
    y1n_ref[0] = acc.reshape(ho, wo, -1)
    _accum_stats(st1n_ref, acc)


def _finalize_kernel(y2_ref, sc_ref, s2_ref, b2_ref, ssc_ref, bsc_ref, o_ref):
    """Last pass: BN2 + BN_shortcut (identity: scale=1, shift=0) + add + ReLU."""
    y = y2_ref[0] * s2_ref[...] + b2_ref[...]
    s = sc_ref[0] * ssc_ref[...] + bsc_ref[...]
    o_ref[0] = jnp.maximum(y + s, 0.0)


# ---------------------------------------------------------------------------
# pallas_call wrappers (grid over batch, per-image blocks, accumulator outputs)
# ---------------------------------------------------------------------------
def _act_spec(shape):
    return pl.BlockSpec((1,) + tuple(shape[1:]), lambda n: (n, 0, 0, 0))


def _rep_spec(shape):
    zeros = (0,) * len(shape)
    return pl.BlockSpec(tuple(shape), lambda n: zeros)


def conv1_pass(x, w1mat, stride, wscmat=None):
    n, h, w, cin = x.shape
    cout = w1mat.shape[-1]
    ho = (h + 2 - 3) // stride + 1
    wo = (w + 2 - 3) // stride + 1
    xp = jnp.pad(x, ((0, 0), (1, 1), (1, 1), (0, 0)))
    if stride == 2:
        # 4 even/odd spatial phases -> all in-kernel taps are contiguous slices.
        x_in = [xp[:, r::2, c::2, :] for r in (0, 1) for c in (0, 1)]
    elif stride == 1:
        x_in = [xp]
    else:
        raise NotImplementedError("stride must be 1 or 2")
    with_shortcut = wscmat is not None

    inputs = list(x_in) + [w1mat]
    in_specs = [_act_spec(t.shape) for t in x_in] + [_rep_spec(w1mat.shape)]
    out_shape = [jax.ShapeDtypeStruct((n, ho, wo, cout), jnp.float32),
                 jax.ShapeDtypeStruct((2, cout), jnp.float32)]
    out_specs = [_act_spec((n, ho, wo, cout)), _rep_spec((2, cout))]
    flops = 2 * n * ho * wo * 9 * cin * cout
    if with_shortcut:
        inputs.append(wscmat)
        in_specs.append(_rep_spec(wscmat.shape))
        out_shape = [out_shape[0],
                     jax.ShapeDtypeStruct((n, ho, wo, cout), jnp.float32),
                     out_shape[1],
                     jax.ShapeDtypeStruct((2, cout), jnp.float32)]
        out_specs = [out_specs[0], _act_spec((n, ho, wo, cout)),
                     out_specs[1], _rep_spec((2, cout))]
        flops += 2 * n * ho * wo * cin * cout

    bytes_accessed = (sum(int(t.size) * t.dtype.itemsize for t in inputs)
                      + sum(math.prod(s.shape) * 4 for s in out_shape))
    kern = functools.partial(_conv1_kernel, stride=stride,
                             with_shortcut=with_shortcut, ho=ho, wo=wo)
    return pl.pallas_call(
        kern,
        grid=(n,),
        in_specs=in_specs,
        out_specs=out_specs,
        out_shape=out_shape,
        compiler_params=pltpu.CompilerParams(
            dimension_semantics=("arbitrary",),   # stats block revisited every step
            vmem_limit_bytes=VMEM_LIMIT),
        cost_estimate=pl.CostEstimate(flops=flops, transcendentals=0,
                                      bytes_accessed=bytes_accessed),
    )(*inputs)


def conv2_pass(y1_raw, scale1, shift1, w2mat):
    n, ho, wo, c = y1_raw.shape
    kern = functools.partial(_conv2_kernel, ho=ho, wo=wo)
    flops = 2 * n * ho * wo * 9 * c * c
    bytes_accessed = (2 * n * ho * wo * c + 9 * c * c // 2) * 4
    return pl.pallas_call(
        kern,
        grid=(n,),
        in_specs=[_act_spec(y1_raw.shape), _rep_spec((1, c)), _rep_spec((1, c)),
                  _rep_spec(w2mat.shape)],
        out_specs=[_act_spec((n, ho, wo, c)), _rep_spec((2, c))],
        out_shape=[jax.ShapeDtypeStruct((n, ho, wo, c), jnp.float32),
                   jax.ShapeDtypeStruct((2, c), jnp.float32)],
        scratch_shapes=[pltpu.VMEM((1, ho + 2, wo + 2, c), jnp.float32)],
        compiler_params=pltpu.CompilerParams(
            dimension_semantics=("arbitrary",),
            vmem_limit_bytes=VMEM_LIMIT),
        cost_estimate=pl.CostEstimate(flops=flops, transcendentals=0,
                                      bytes_accessed=bytes_accessed),
    )(y1_raw, scale1, shift1, w2mat)


def finalize_conv_pass(y2_raw, sc_raw, scale2, shift2, scale_sc, shift_sc, w1n):
    """Fused: residual finalize of block i + conv1(+stats) of block i+1."""
    n, ho, wo, c = y2_raw.shape
    cout = w1n.shape[-1]
    kern = functools.partial(_finalize_conv_kernel, ho=ho, wo=wo)
    flops = 2 * n * ho * wo * 9 * c * cout
    bytes_accessed = (3 * n * ho * wo * c + n * ho * wo * cout) * 4 \
        + 9 * c * cout * 2
    return pl.pallas_call(
        kern,
        grid=(n,),
        in_specs=[_act_spec(y2_raw.shape), _act_spec(sc_raw.shape)]
                 + [_rep_spec((1, c))] * 4 + [_rep_spec(w1n.shape)],
        out_specs=[_act_spec((n, ho, wo, c)),           # residual output (act)
                   _act_spec((n, ho, wo, cout)),        # next block conv1 raw
                   _rep_spec((2, cout))],               # next block BN1 stats
        out_shape=[jax.ShapeDtypeStruct((n, ho, wo, c), jnp.float32),
                   jax.ShapeDtypeStruct((n, ho, wo, cout), jnp.float32),
                   jax.ShapeDtypeStruct((2, cout), jnp.float32)],
        scratch_shapes=[pltpu.VMEM((1, ho + 2, wo + 2, c), jnp.float32)],
        compiler_params=pltpu.CompilerParams(
            dimension_semantics=("arbitrary",),
            vmem_limit_bytes=VMEM_LIMIT),
        cost_estimate=pl.CostEstimate(flops=flops, transcendentals=0,
                                      bytes_accessed=bytes_accessed),
    )(y2_raw, sc_raw, scale2, shift2, scale_sc, shift_sc, w1n)


def add_relu_pass(y2_raw, sc_raw, scale2, shift2, scale_sc, shift_sc):
    n, ho, wo, c = y2_raw.shape
    return pl.pallas_call(
        _finalize_kernel,
        grid=(n,),
        in_specs=[_act_spec(y2_raw.shape), _act_spec(sc_raw.shape)]
                 + [_rep_spec((1, c))] * 4,
        out_specs=_act_spec((n, ho, wo, c)),
        out_shape=jax.ShapeDtypeStruct((n, ho, wo, c), jnp.float32),
        compiler_params=pltpu.CompilerParams(
            dimension_semantics=("parallel",),    # no cross-step state -> 2 TCs on v7x
            vmem_limit_bytes=VMEM_LIMIT),
    )(y2_raw, sc_raw, scale2, shift2, scale_sc, shift_sc)


# ---------------------------------------------------------------------------
# JAX glue: BN-stat folding, block wiring, parameter layout
# ---------------------------------------------------------------------------
def _bn_fold(stats, count, gamma_p, beta_p):
    mean = stats[0:1, :] / count
    var = jnp.maximum(stats[1:2, :] / count - mean * mean, 0.0)   # biased var
    scale = gamma_p * jax.lax.rsqrt(var + EPS)
    shift = beta_p - mean * scale
    return scale, shift


def residual_part_forward(x_nchw, kparams, *, stride, out_channel):
    n, cin, h, w = x_nchw.shape
    cin_p = _round_up(cin)
    x = jnp.transpose(x_nchw, (0, 2, 3, 1))                     # NCHW -> NHWC
    x = jnp.pad(x, ((0, 0), (0, 0), (0, 0), (0, cin_p - cin)))  # lane-dense C

    blocks = kparams["blocks"]
    sp = kparams["shortcut"]
    cp = blocks[0]["w1m"].shape[-1]
    ho = (h + 2 - 3) // stride + 1
    wo = (w + 2 - 3) // stride + 1
    count = float(n * ho * wo)

    # ---- block 0: conv1 + fused 1x1 shortcut conv + stats ------------------
    p = blocks[0]
    y1_raw, sc_raw, st1, stsc = conv1_pass(x, p["w1m"], stride, sp["wm"])
    ssc, bsc = _bn_fold(stsc, count, sp["g"], sp["b"])
    s1, b1 = _bn_fold(st1, count, p["g1"], p["b1"])
    y2_raw, st2 = conv2_pass(y1_raw, s1, b1, p["w2m"])
    s2, b2 = _bn_fold(st2, count, p["g2"], p["b2"])

    # ---- inner blocks: finalize(i-1) fused with conv1(i) -------------------
    for p in blocks[1:]:
        act, y1_raw, st1 = finalize_conv_pass(y2_raw, sc_raw, s2, b2, ssc, bsc,
                                              p["w1m"])
        sc_raw = act                                   # identity shortcut
        ssc = jnp.ones((1, cp), jnp.float32)
        bsc = jnp.zeros((1, cp), jnp.float32)
        s1, b1 = _bn_fold(st1, count, p["g1"], p["b1"])
        y2_raw, st2 = conv2_pass(y1_raw, s1, b1, p["w2m"])
        s2, b2 = _bn_fold(st2, count, p["g2"], p["b2"])

    out = add_relu_pass(y2_raw, sc_raw, s2, b2, ssc, bsc)
    out = out[:, :, :, :out_channel]
    return jnp.transpose(out, (0, 3, 1, 2))                     # NHWC -> NCHW


def _w3x3_mat(w, cin_p, cout_p):                 # torch OIHW -> (9, Cin_p, Cout_p) bf16
    cout, cin = w.shape[0], w.shape[1]
    m = jnp.transpose(w, (2, 3, 1, 0))           # (3, 3, Cin, Cout)
    m = jnp.pad(m, ((0, 0), (0, 0), (0, cin_p - cin), (0, cout_p - cout)))
    return m.reshape(9, cin_p, cout_p).astype(MATMUL_DTYPE)


def _w1x1_mat(w, cin_p, cout_p):                 # torch OIHW -> (Cin_p, Cout_p) bf16
    cout, cin = w.shape[0], w.shape[1]
    m = jnp.transpose(w[:, :, 0, 0], (1, 0))
    m = jnp.pad(m, ((0, cin_p - cin), (0, cout_p - cout)))
    return m.astype(MATMUL_DTYPE)


def _bn_pad(g, b, c_p):
    c = g.shape[0]
    gp = jnp.pad(g, (0, c_p - c), constant_values=1.0).reshape(1, c_p)
    bp = jnp.pad(b, (0, c_p - c)).reshape(1, c_p)
    return gp.astype(jnp.float32), bp.astype(jnp.float32)


def prepare_params(params, in_channel, out_channel):
    cin_p = _round_up(in_channel)
    cout_p = _round_up(out_channel)
    blocks = []
    cinp = cin_p
    for bp in params["blocks"]:
        g1, b1 = _bn_pad(bp["g1"], bp["b1"], cout_p)
        g2, b2 = _bn_pad(bp["g2"], bp["b2"], cout_p)
        blocks.append(dict(w1m=_w3x3_mat(bp["w1"], cinp, cout_p),
                           w2m=_w3x3_mat(bp["w2"], cout_p, cout_p),
                           g1=g1, b1=b1, g2=g2, b2=b2))
        cinp = cout_p
    gs, bs = _bn_pad(params["shortcut"]["g"], params["shortcut"]["b"], cout_p)
    shortcut = dict(wm=_w1x1_mat(params["shortcut"]["w"], cin_p, cout_p),
                    g=gs, b=bs)
    return dict(blocks=blocks, shortcut=shortcut)


# ---------------------------------------------------------------------------
# deterministic parameter init (synthetic; matches the module's shapes)
# ---------------------------------------------------------------------------
def init_params(key, in_channel, out_channel, num_block):
    keys = iter(jax.random.split(key, 64))

    def conv_w(cout, cin, k):
        return 0.1 * jax.random.normal(next(keys), (cout, cin, k, k), jnp.float32)

    def bn(c):
        g = 1.0 + 0.1 * jax.random.normal(next(keys), (c,), jnp.float32)
        b = 0.1 * jax.random.normal(next(keys), (c,), jnp.float32)
        return g, b

    blocks = []
    cin = in_channel
    for _ in range(num_block):
        g1, b1 = bn(out_channel)
        g2, b2 = bn(out_channel)
        blocks.append(dict(w1=conv_w(out_channel, cin, 3), g1=g1, b1=b1,
                           w2=conv_w(out_channel, out_channel, 3), g2=g2, b2=b2))
        cin = out_channel
    gs, bs = bn(out_channel)
    shortcut = dict(w=conv_w(out_channel, in_channel, 1), g=gs, b=bs)
    return dict(blocks=blocks, shortcut=shortcut)


# ---------------------------------------------------------------------------
# pure-JAX reference (mirrors the PyTorch module, training-mode BN)
# ---------------------------------------------------------------------------
def _ref_conv(x, w, stride, pad):
    return jax.lax.conv_general_dilated(
        x, w, (stride, stride), ((pad, pad), (pad, pad)),
        dimension_numbers=("NCHW", "OIHW", "NCHW"),
        precision=jax.lax.Precision.HIGHEST)


def _ref_bn(x, g, b):
    mean = jnp.mean(x, axis=(0, 2, 3), keepdims=True)
    var = jnp.mean(jnp.square(x - mean), axis=(0, 2, 3), keepdims=True)
    return ((x - mean) / jnp.sqrt(var + EPS) * g.reshape(1, -1, 1, 1)
            + b.reshape(1, -1, 1, 1))


def _ref_block(x, p, stride, sp):
    y = jnp.maximum(_ref_bn(_ref_conv(x, p["w1"], stride, 1), p["g1"], p["b1"]), 0.0)
    y = _ref_bn(_ref_conv(y, p["w2"], 1, 1), p["g2"], p["b2"])
    sc = (_ref_bn(_ref_conv(x, sp["w"], stride, 0), sp["g"], sp["b"])
          if sp is not None else x)
    return jnp.maximum(y + sc, 0.0)


def ref_forward(x, params, stride):
    x = _ref_block(x, params["blocks"][0], stride, params["shortcut"])
    for p in params["blocks"][1:]:
        x = _ref_block(x, p, 1, None)
    return x


# ---------------------------------------------------------------------------
if __name__ == "__main__":
    key = jax.random.PRNGKey(0)
    N, Cin, H, W = 2, 4, 16, 16
    Cout, num_block, stride = 8, 3, 2

    params = init_params(key, Cin, Cout, num_block)
    kparams = prepare_params(params, Cin, Cout)
    x = jax.random.normal(jax.random.fold_in(key, 999), (N, Cin, H, W), jnp.float32)

    fwd = jax.jit(functools.partial(residual_part_forward,
                                    stride=stride, out_channel=Cout))
    y = fwd(x, kparams)
    y = jax.block_until_ready(y)

    y_ref = ref_forward(x, params, stride)
    err = float(jnp.max(jnp.abs(y - y_ref)))
    assert y.shape == y_ref.shape, (y.shape, y_ref.shape)
    # bf16 MXU inputs (f32 accumulation / f32 BN) vs. f32-HIGHEST reference.
    assert err < 5e-2, f"max abs err {err}"

    print("KERNEL_OK")
</pallas_src>

<mosaic_0001>
module attributes {stable_mosaic.version = 11 : i64} {
  func.func @_conv1_kernel(%arg0: i32, %arg1: memref<1x9x9x128xf32, #tpu.memory_space<vmem>>, %arg2: memref<1x9x9x128xf32, #tpu.memory_space<vmem>>, %arg3: memref<1x9x9x128xf32, #tpu.memory_space<vmem>>, %arg4: memref<1x9x9x128xf32, #tpu.memory_space<vmem>>, %arg5: memref<9x128x128xbf16, #tpu.memory_space<vmem>>, %arg6: memref<128x128xbf16, #tpu.memory_space<vmem>>, %arg7: memref<1x8x8x128xf32, #tpu.memory_space<vmem>>, %arg8: memref<1x8x8x128xf32, #tpu.memory_space<vmem>>, %arg9: memref<2x128xf32, #tpu.memory_space<vmem>>, %arg10: memref<2x128xf32, #tpu.memory_space<vmem>>) attributes {dimension_semantics = [#tpu.dimension_semantics<arbitrary>], iteration_bounds = array<i64: 2>, scalar_prefetch = 0 : i64, scratch_operands = 0 : i64, tpu.core_type = #tpu.core_type<tc>, window_params = [{transform_indices = @transform_0, window_bounds = array<i64: 1, 9, 9, 128>}, {transform_indices = @transform_1, window_bounds = array<i64: 1, 9, 9, 128>}, {transform_indices = @transform_2, window_bounds = array<i64: 1, 9, 9, 128>}, {transform_indices = @transform_3, window_bounds = array<i64: 1, 9, 9, 128>}, {pipeline_mode = #tpu.pipeline_mode<synchronous>, transform_indices = @transform_4, window_bounds = array<i64: 9, 128, 128>}, {pipeline_mode = #tpu.pipeline_mode<synchronous>, transform_indices = @transform_5, window_bounds = array<i64: 128, 128>}, {transform_indices = @transform_6, window_bounds = array<i64: 1, 8, 8, 128>}, {transform_indices = @transform_7, window_bounds = array<i64: 1, 8, 8, 128>}, {pipeline_mode = #tpu.pipeline_mode<synchronous>, transform_indices = @transform_8, window_bounds = array<i64: 2, 128>}, {pipeline_mode = #tpu.pipeline_mode<synchronous>, transform_indices = @transform_9, window_bounds = array<i64: 2, 128>}]} {
    %c0_i32 = arith.constant 0 : i32
    %0 = arith.cmpi eq, %arg0, %c0_i32 : i32
    %1 = arith.extui %0 : i1 to i32
    %c0_i32_0 = arith.constant 0 : i32
    %2 = arith.cmpi ne, %1, %c0_i32_0 : i32
    scf.if %2 {
      %cst_99 = arith.constant 0.000000e+00 : f32
      %112 = vector.broadcast %cst_99 : f32 to vector<2x128xf32>
      %c0_100 = arith.constant 0 : index
      %c0_101 = arith.constant 0 : index
      %113 = vector.load %arg9[%c0_100, %c0_101] : memref<2x128xf32, #tpu.memory_space<vmem>>, vector<2x128xf32>
      tpu.vector_store %arg9[%c0_100, %c0_101], %112 {strides = array<i32>} : memref<2x128xf32, #tpu.memory_space<vmem>>, vector<2x128xf32>,
      %cst_102 = arith.constant 0.000000e+00 : f32
      %114 = vector.broadcast %cst_102 : f32 to vector<2x128xf32>
      %c0_103 = arith.constant 0 : index
      %c0_104 = arith.constant 0 : index
      %115 = vector.load %arg10[%c0_103, %c0_104] : memref<2x128xf32, #tpu.memory_space<vmem>>, vector<2x128xf32>
      tpu.vector_store %arg10[%c0_103, %c0_104], %114 {strides = array<i32>} : memref<2x128xf32, #tpu.memory_space<vmem>>, vector<2x128xf32>,
    } else {
    }
    %cst = arith.constant 0.000000e+00 : f32
    %3 = vector.broadcast %cst : f32 to vector<64x128xf32>
    %c0 = arith.constant 0 : index
    %c0_1 = arith.constant 0 : index
    %c0_2 = arith.constant 0 : index
    %c0_3 = arith.constant 0 : index
    %4 = vector.load %arg1[%c0, %c0_1, %c0_2, %c0_3] : memref<1x9x9x128xf32, #tpu.memory_space<vmem>>, vector<1x8x8x128xf32>
    %5 = vector.shape_cast %4 : vector<1x8x8x128xf32> to vector<8x8x128xf32>
    %6 = vector.shape_cast %5 : vector<8x8x128xf32> to vector<64x128xf32>
    %7 = arith.truncf %6 : vector<64x128xf32> to vector<64x128xbf16>
    %c0_4 = arith.constant 0 : index
    %c0_5 = arith.constant 0 : index
    %c0_6 = arith.constant 0 : index
    %8 = vector.load %arg5[%c0_4, %c0_5, %c0_6] : memref<9x128x128xbf16, #tpu.memory_space<vmem>>, vector<1x128x128xbf16>
    %9 = vector.shape_cast %8 : vector<1x128x128xbf16> to vector<128x128xbf16>
    %cst_7 = arith.constant dense<0.000000e+00> : vector<64x128xf32>
    %10 = tpu.matmul %7, %9, %cst_7 {dimension_numbers = #tpu.dot_dimension_numbers<[1], [0], [0], [1], [0, 0, 1, 1], [], []>} : vector<64x128xbf16>, vector<128x128xbf16>, vector<64x128xf32> -> vector<64x128xf32>
    %11 = arith.addf %3, %10 : vector<64x128xf32>
    %c0_8 = arith.constant 0 : index
    %c0_9 = arith.constant 0 : index
    %c0_10 = arith.constant 0 : index
    %c0_11 = arith.constant 0 : index
    %12 = vector.load %arg2[%c0_8, %c0_9, %c0_10, %c0_11] : memref<1x9x9x128xf32, #tpu.memory_space<vmem>>, vector<1x8x8x128xf32>
    %13 = vector.shape_cast %12 : vector<1x8x8x128xf32> to vector<8x8x128xf32>
    %14 = vector.shape_cast %13 : vector<8x8x128xf32> to vector<64x128xf32>
    %15 = arith.truncf %14 : vector<64x128xf32> to vector<64x128xbf16>
    %c1 = arith.constant 1 : index
    %c0_12 = arith.constant 0 : index
    %c0_13 = arith.constant 0 : index
    %16 = vector.load %arg5[%c1, %c0_12, %c0_13] : memref<9x128x128xbf16, #tpu.memory_space<vmem>>, vector<1x128x128xbf16>
    %17 = vector.shape_cast %16 : vector<1x128x128xbf16> to vector<128x128xbf16>
    %cst_14 = arith.constant dense<0.000000e+00> : vector<64x128xf32>
    %18 = tpu.matmul %15, %17, %cst_14 {dimension_numbers = #tpu.dot_dimension_numbers<[1], [0], [0], [1], [0, 0, 1, 1], [], []>} : vector<64x128xbf16>, vector<128x128xbf16>, vector<64x128xf32> -> vector<64x128xf32>
    %19 = arith.addf %11, %18 : vector<64x128xf32>
    %c0_15 = arith.constant 0 : index
    %c0_16 = arith.constant 0 : index
    %c1_17 = arith.constant 1 : index
    %c0_18 = arith.constant 0 : index
    %20 = vector.load %arg1[%c0_15, %c0_16, %c1_17, %c0_18] : memref<1x9x9x128xf32, #tpu.memory_space<vmem>>, vector<1x8x8x128xf32>
    %21 = vector.shape_cast %20 : vector<1x8x8x128xf32> to vector<8x8x128xf32>
    %22 = vector.shape_cast %21 : vector<8x8x128xf32> to vector<64x128xf32>
    %23 = arith.truncf %22 : vector<64x128xf32> to vector<64x128xbf16>
    %c2 = arith.constant 2 : index
    %c0_19 = arith.constant 0 : index
    %c0_20 = arith.constant 0 : index
    %24 = vector.load %arg5[%c2, %c0_19, %c0_20] : memref<9x128x128xbf16, #tpu.memory_space<vmem>>, vector<1x128x128xbf16>
    %25 = vector.shape_cast %24 : vector<1x128x128xbf16> to vector<128x128xbf16>
    %cst_21 = arith.constant dense<0.000000e+00> : vector<64x128xf32>
    %26 = tpu.matmul %23, %25, %cst_21 {dimension_numbers = #tpu.dot_dimension_numbers<[1], [0], [0], [1], [0, 0, 1, 1], [], []>} : vector<64x128xbf16>, vector<128x128xbf16>, vector<64x128xf32> -> vector<64x128xf32>
    %27 = arith.addf %19, %26 : vector<64x128xf32>
    %c0_22 = arith.constant 0 : index
    %c0_23 = arith.constant 0 : index
    %c0_24 = arith.constant 0 : index
    %c0_25 = arith.constant 0 : index
    %28 = vector.load %arg3[%c0_22, %c0_23, %c0_24, %c0_25] : memref<1x9x9x128xf32, #tpu.memory_space<vmem>>, vector<1x8x8x128xf32>
    %29 = vector.shape_cast %28 : vector<1x8x8x128xf32> to vector<8x8x128xf32>
    %30 = vector.shape_cast %29 : vector<8x8x128xf32> to vector<64x128xf32>
    %31 = arith.truncf %30 : vector<64x128xf32> to vector<64x128xbf16>
    %c3 = arith.constant 3 : index
    %c0_26 = arith.constant 0 : index
    %c0_27 = arith.constant 0 : index
    %32 = vector.load %arg5[%c3, %c0_26, %c0_27] : memref<9x128x128xbf16, #tpu.memory_space<vmem>>, vector<1x128x128xbf16>
    %33 = vector.shape_cast %32 : vector<1x128x128xbf16> to vector<128x128xbf16>
    %cst_28 = arith.constant dense<0.000000e+00> : vector<64x128xf32>
    %34 = tpu.matmul %31, %33, %cst_28 {dimension_numbers = #tpu.dot_dimension_numbers<[1], [0], [0], [1], [0, 0, 1, 1], [], []>} : vector<64x128xbf16>, vector<128x128xbf16>, vector<64x128xf32> -> vector<64x128xf32>
    %35 = arith.addf %27, %34 : vector<64x128xf32>
    %c0_29 = arith.constant 0 : index
    %c0_30 = arith.constant 0 : index
    %c0_31 = arith.constant 0 : index
    %c0_32 = arith.constant 0 : index
    %36 = vector.load %arg4[%c0_29, %c0_30, %c0_31, %c0_32] : memref<1x9x9x128xf32, #tpu.memory_space<vmem>>, vector<1x8x8x128xf32>
    %37 = vector.shape_cast %36 : vector<1x8x8x128xf32> to vector<8x8x128xf32>
    %38 = vector.shape_cast %37 : vector<8x8x128xf32> to vector<64x128xf32>
    %39 = arith.truncf %38 : vector<64x128xf32> to vector<64x128xbf16>
    %c4 = arith.constant 4 : index
    %c0_33 = arith.constant 0 : index
    %c0_34 = arith.constant 0 : index
    %40 = vector.load %arg5[%c4, %c0_33, %c0_34] : memref<9x128x128xbf16, #tpu.memory_space<vmem>>, vector<1x128x128xbf16>
    %41 = vector.shape_cast %40 : vector<1x128x128xbf16> to vector<128x128xbf16>
    %cst_35 = arith.constant dense<0.000000e+00> : vector<64x128xf32>
    %42 = tpu.matmul %39, %41, %cst_35 {dimension_numbers = #tpu.dot_dimension_numbers<[1], [0], [0], [1], [0, 0, 1, 1], [], []>} : vector<64x128xbf16>, vector<128x128xbf16>, vector<64x128xf32> -> vector<64x128xf32>
    %43 = arith.addf %35, %42 : vector<64x128xf32>
    %c0_36 = arith.constant 0 : index
    %c0_37 = arith.constant 0 : index
    %c1_38 = arith.constant 1 : index
    %c0_39 = arith.constant 0 : index
    %44 = vector.load %arg3[%c0_36, %c0_37, %c1_38, %c0_39] : memref<1x9x9x128xf32, #tpu.memory_space<vmem>>, vector<1x8x8x128xf32>
    %45 = vector.shape_cast %44 : vector<1x8x8x128xf32> to vector<8x8x128xf32>
    %46 = vector.shape_cast %45 : vector<8x8x128xf32> to vector<64x128xf32>
    %47 = arith.truncf %46 : vector<64x128xf32> to vector<64x128xbf16>
    %c5 = arith.constant 5 : index
    %c0_40 = arith.constant 0 : index
    %c0_41 = arith.constant 0 : index
    %48 = vector.load %arg5[%c5, %c0_40, %c0_41] : memref<9x128x128xbf16, #tpu.memory_space<vmem>>, vector<1x128x128xbf16>
    %49 = vector.shape_cast %48 : vector<1x128x128xbf16> to vector<128x128xbf16>
    %cst_42 = arith.constant dense<0.000000e+00> : vector<64x128xf32>
    %50 = tpu.matmul %47, %49, %cst_42 {dimension_numbers = #tpu.dot_dimension_numbers<[1], [0], [0], [1], [0, 0, 1, 1], [], []>} : vector<64x128xbf16>, vector<128x128xbf16>, vector<64x128xf32> -> vector<64x128xf32>
    %51 = arith.addf %43, %50 : vector<64x128xf32>
    %c0_43 = arith.constant 0 : index
    %c1_44 = arith.constant 1 : index
    %c0_45 = arith.constant 0 : index
    %c0_46 = arith.constant 0 : index
    %52 = vector.load %arg1[%c0_43, %c1_44, %c0_45, %c0_46] : memref<1x9x9x128xf32, #tpu.memory_space<vmem>>, vector<1x8x8x128xf32>
    %53 = vector.shape_cast %52 : vector<1x8x8x128xf32> to vector<8x8x128xf32>
    %54 = vector.shape_cast %53 : vector<8x8x128xf32> to vector<64x128xf32>
    %55 = arith.truncf %54 : vector<64x128xf32> to vector<64x128xbf16>
    %c6 = arith.constant 6 : index
    %c0_47 = arith.constant 0 : index
    %c0_48 = arith.constant 0 : index
    %56 = vector.load %arg5[%c6, %c0_47, %c0_48] : memref<9x128x128xbf16, #tpu.memory_space<vmem>>, vector<1x128x128xbf16>
    %57 = vector.shape_cast %56 : vector<1x128x128xbf16> to vector<128x128xbf16>
    %cst_49 = arith.constant dense<0.000000e+00> : vector<64x128xf32>
    %58 = tpu.matmul %55, %57, %cst_49 {dimension_numbers = #tpu.dot_dimension_numbers<[1], [0], [0], [1], [0, 0, 1, 1], [], []>} : vector<64x128xbf16>, vector<128x128xbf16>, vector<64x128xf32> -> vector<64x128xf32>
    %59 = arith.addf %51, %58 : vector<64x128xf32>
    %c0_50 = arith.constant 0 : index
    %c1_51 = arith.constant 1 : index
    %c0_52 = arith.constant 0 : index
    %c0_53 = arith.constant 0 : index
    %60 = vector.load %arg2[%c0_50, %c1_51, %c0_52, %c0_53] : memref<1x9x9x128xf32, #tpu.memory_space<vmem>>, vector<1x8x8x128xf32>
    %61 = vector.shape_cast %60 : vector<1x8x8x128xf32> to vector<8x8x128xf32>
    %62 = vector.shape_cast %61 : vector<8x8x128xf32> to vector<64x128xf32>
    %63 = arith.truncf %62 : vector<64x128xf32> to vector<64x128xbf16>
    %c7 = arith.constant 7 : index
    %c0_54 = arith.constant 0 : index
    %c0_55 = arith.constant 0 : index
    %64 = vector.load %arg5[%c7, %c0_54, %c0_55] : memref<9x128x128xbf16, #tpu.memory_space<vmem>>, vector<1x128x128xbf16>
    %65 = vector.shape_cast %64 : vector<1x128x128xbf16> to vector<128x128xbf16>
    %cst_56 = arith.constant dense<0.000000e+00> : vector<64x128xf32>
    %66 = tpu.matmul %63, %65, %cst_56 {dimension_numbers = #tpu.dot_dimension_numbers<[1], [0], [0], [1], [0, 0, 1, 1], [], []>} : vector<64x128xbf16>, vector<128x128xbf16>, vector<64x128xf32> -> vector<64x128xf32>
    %67 = arith.addf %59, %66 : vector<64x128xf32>
    %c0_57 = arith.constant 0 : index
    %c1_58 = arith.constant 1 : index
    %c1_59 = arith.constant 1 : index
    %c0_60 = arith.constant 0 : index
    %68 = vector.load %arg1[%c0_57, %c1_58, %c1_59, %c0_60] : memref<1x9x9x128xf32, #tpu.memory_space<vmem>>, vector<1x8x8x128xf32>
    %69 = vector.shape_cast %68 : vector<1x8x8x128xf32> to vector<8x8x128xf32>
    %70 = vector.shape_cast %69 : vector<8x8x128xf32> to vector<64x128xf32>
    %71 = arith.truncf %70 : vector<64x128xf32> to vector<64x128xbf16>
    %c8 = arith.constant 8 : index
    %c0_61 = arith.constant 0 : index
    %c0_62 = arith.constant 0 : index
    %72 = vector.load %arg5[%c8, %c0_61, %c0_62] : memref<9x128x128xbf16, #tpu.memory_space<vmem>>, vector<1x128x128xbf16>
    %73 = vector.shape_cast %72 : vector<1x128x128xbf16> to vector<128x128xbf16>
    %cst_63 = arith.constant dense<0.000000e+00> : vector<64x128xf32>
    %74 = tpu.matmul %71, %73, %cst_63 {dimension_numbers = #tpu.dot_dimension_numbers<[1], [0], [0], [1], [0, 0, 1, 1], [], []>} : vector<64x128xbf16>, vector<128x128xbf16>, vector<64x128xf32> -> vector<64x128xf32>
    %75 = arith.addf %67, %74 : vector<64x128xf32>
    %76 = vector.shape_cast %75 : vector<64x128xf32> to vector<8x8x128xf32>
    %c0_64 = arith.constant 0 : index
    %c0_65 = arith.constant 0 : index
    %c0_66 = arith.constant 0 : index
    %c0_67 = arith.constant 0 : index
    %77 = vector.load %arg7[%c0_64, %c0_65, %c0_66, %c0_67] : memref<1x8x8x128xf32, #tpu.memory_space<vmem>>, vector<1x8x8x128xf32>
    %78 = vector.shape_cast %77 : vector<1x8x8x128xf32> to vector<8x8x128xf32>
    %79 = vector.shape_cast %76 : vector<8x8x128xf32> to vector<1x8x8x128xf32>
    tpu.vector_store %arg7[%c0_64, %c0_65, %c0_66, %c0_67], %79 {strides = array<i32>} : memref<1x8x8x128xf32, #tpu.memory_space<vmem>>, vector<1x8x8x128xf32>,
    %c0_68 = arith.constant 0 : index
    %c0_69 = arith.constant 0 : index
    %80 = vector.load %arg9[%c0_68, %c0_69] : memref<2x128xf32, #tpu.memory_space<vmem>>, vector<1x128xf32>
    %cst_70 = arith.constant dense<0.000000e+00> : vector<128xf32>
    %81 = vector.multi_reduction <add>, %75, %cst_70 [0] : vector<64x128xf32> to vector<128xf32>
    %82 = vector.shape_cast %81 : vector<128xf32> to vector<1x128xf32>
    %83 = arith.addf %80, %82 : vector<1x128xf32>
    %c0_71 = arith.constant 0 : index
    %c0_72 = arith.constant 0 : index
    %84 = vector.load %arg9[%c0_71, %c0_72] : memref<2x128xf32, #tpu.memory_space<vmem>>, vector<1x128xf32>
    tpu.vector_store %arg9[%c0_71, %c0_72], %83 {strides = array<i32>} : memref<2x128xf32, #tpu.memory_space<vmem>>, vector<1x128xf32>,
    %c1_73 = arith.constant 1 : index
    %c0_74 = arith.constant 0 : index
    %85 = vector.load %arg9[%c1_73, %c0_74] : memref<2x128xf32, #tpu.memory_space<vmem>>, vector<1x128xf32>
    %86 = arith.mulf %75, %75 : vector<64x128xf32>
    %cst_75 = arith.constant dense<0.000000e+00> : vector<128xf32>
    %87 = vector.multi_reduction <add>, %86, %cst_75 [0] : vector<64x128xf32> to vector<128xf32>
    %88 = vector.shape_cast %87 : vector<128xf32> to vector<1x128xf32>
    %89 = arith.addf %85, %88 : vector<1x128xf32>
    %c1_76 = arith.constant 1 : index
    %c0_77 = arith.constant 0 : index
    %90 = vector.load %arg9[%c1_76, %c0_77] : memref<2x128xf32, #tpu.memory_space<vmem>>, vector<1x128xf32>
    tpu.vector_store %arg9[%c1_76, %c0_77], %89 {strides = array<i32>} : memref<2x128xf32, #tpu.memory_space<vmem>>, vector<1x128xf32>,
    %c0_78 = arith.constant 0 : index
    %c0_79 = arith.constant 0 : index
    %c0_80 = arith.constant 0 : index
    %c0_81 = arith.constant 0 : index
    %91 = vector.load %arg4[%c0_78, %c0_79, %c0_80, %c0_81] : memref<1x9x9x128xf32, #tpu.memory_space<vmem>>, vector<1x8x8x128xf32>
    %92 = vector.shape_cast %91 : vector<1x8x8x128xf32> to vector<8x8x128xf32>
    %93 = vector.shape_cast %92 : vector<8x8x128xf32> to vector<64x128xf32>
    %94 = arith.truncf %93 : vector<64x128xf32> to vector<64x128xbf16>
    %c0_82 = arith.constant 0 : index
    %c0_83 = arith.constant 0 : index
    %95 = vector.load %arg6[%c0_82, %c0_83] : memref<128x128xbf16, #tpu.memory_space<vmem>>, vector<128x128xbf16>
    %cst_84 = arith.constant dense<0.000000e+00> : vector<64x128xf32>
    %96 = tpu.matmul %94, %95, %cst_84 {dimension_numbers = #tpu.dot_dimension_numbers<[1], [0], [0], [1], [0, 0, 1, 1], [], []>} : vector<64x128xbf16>, vector<128x128xbf16>, vector<64x128xf32> -> vector<64x128xf32>
    %97 = vector.shape_cast %96 : vector<64x128xf32> to vector<8x8x128xf32>
    %c0_85 = arith.constant 0 : index
    %c0_86 = arith.constant 0 : index
    %c0_87 = arith.constant 0 : index
    %c0_88 = arith.constant 0 : index
    %98 = vector.load %arg8[%c0_85, %c0_86, %c0_87, %c0_88] : memref<1x8x8x128xf32, #tpu.memory_space<vmem>>, vector<1x8x8x128xf32>
    %99 = vector.shape_cast %98 : vector<1x8x8x128xf32> to vector<8x8x128xf32>
    %100 = vector.shape_cast %97 : vector<8x8x128xf32> to vector<1x8x8x128xf32>
    tpu.vector_store %arg8[%c0_85, %c0_86, %c0_87, %c0_88], %100 {strides = array<i32>} : memref<1x8x8x128xf32, #tpu.memory_space<vmem>>, vector<1x8x8x128xf32>,
    %c0_89 = arith.constant 0 : index
    %c0_90 = arith.constant 0 : index
    %101 = vector.load %arg10[%c0_89, %c0_90] : memref<2x128xf32, #tpu.memory_space<vmem>>, vector<1x128xf32>
    %cst_91 = arith.constant dense<0.000000e+00> : vector<128xf32>
    %102 = vector.multi_reduction <add>, %96, %cst_91 [0] : vector<64x128xf32> to vector<128xf32>
    %103 = vector.shape_cast %102 : vector<128xf32> to vector<1x128xf32>
    %104 = arith.addf %101, %103 : vector<1x128xf32>
    %c0_92 = arith.constant 0 : index
    %c0_93 = arith.constant 0 : index
    %105 = vector.load %arg10[%c0_92, %c0_93] : memref<2x128xf32, #tpu.memory_space<vmem>>, vector<1x128xf32>
    tpu.vector_store %arg10[%c0_92, %c0_93], %104 {strides = array<i32>} : memref<2x128xf32, #tpu.memory_space<vmem>>, vector<1x128xf32>,
    %c1_94 = arith.constant 1 : index
    %c0_95 = arith.constant 0 : index
    %106 = vector.load %arg10[%c1_94, %c0_95] : memref<2x128xf32, #tpu.memory_space<vmem>>, vector<1x128xf32>
    %107 = arith.mulf %96, %96 : vector<64x128xf32>
    %cst_96 = arith.constant dense<0.000000e+00> : vector<128xf32>
    %108 = vector.multi_reduction <add>, %107, %cst_96 [0] : vector<64x128xf32> to vector<128xf32>
    %109 = vector.shape_cast %108 : vector<128xf32> to vector<1x128xf32>
    %110 = arith.addf %106, %109 : vector<1x128xf32>
    %c1_97 = arith.constant 1 : index
    %c0_98 = arith.constant 0 : index
    %111 = vector.load %arg10[%c1_97, %c0_98] : memref<2x128xf32, #tpu.memory_space<vmem>>, vector<1x128xf32>
    tpu.vector_store %arg10[%c1_97, %c0_98], %110 {strides = array<i32>} : memref<2x128xf32, #tpu.memory_space<vmem>>, vector<1x128xf32>,
    return
  }
  func.func @transform_0(%arg0: i32) -> (i32, i32, i32, i32) {
    %c0_i32 = arith.constant 0 : i32
    %c0_i32_0 = arith.constant 0 : i32
    %c0_i32_1 = arith.constant 0 : i32
    %c0_i32_2 = arith.constant 0 : i32
    return %arg0, %c0_i32, %c0_i32_0, %c0_i32_1 : i32, i32, i32, i32
  }
  func.func @transform_1(%arg0: i32) -> (i32, i32, i32, i32) {
    %c0_i32 = arith.constant 0 : i32
    %c0_i32_0 = arith.constant 0 : i32
    %c0_i32_1 = arith.constant 0 : i32
    %c0_i32_2 = arith.constant 0 : i32
    return %arg0, %c0_i32, %c0_i32_0, %c0_i32_1 : i32, i32, i32, i32
  }
  func.func @transform_2(%arg0: i32) -> (i32, i32, i32, i32) {
    %c0_i32 = arith.constant 0 : i32
    %c0_i32_0 = arith.constant 0 : i32
    %c0_i32_1 = arith.constant 0 : i32
    %c0_i32_2 = arith.constant 0 : i32
    return %arg0, %c0_i32, %c0_i32_0, %c0_i32_1 : i32, i32, i32, i32
  }
  func.func @transform_3(%arg0: i32) -> (i32, i32, i32, i32) {
    %c0_i32 = arith.constant 0 : i32
    %c0_i32_0 = arith.constant 0 : i32
    %c0_i32_1 = arith.constant 0 : i32
    %c0_i32_2 = arith.constant 0 : i32
    return %arg0, %c0_i32, %c0_i32_0, %c0_i32_1 : i32, i32, i32, i32
  }
  func.func @transform_4(%arg0: i32) -> (i32, i32, i32) {
    %c0_i32 = arith.constant 0 : i32
    %c0_i32_0 = arith.constant 0 : i32
    %c0_i32_1 = arith.constant 0 : i32
    %c0_i32_2 = arith.constant 0 : i32
    return %c0_i32, %c0_i32_0, %c0_i32_1 : i32, i32, i32
  }
  func.func @transform_5(%arg0: i32) -> (i32, i32) {
    %c0_i32 = arith.constant 0 : i32
    %c0_i32_0 = arith.constant 0 : i32
    %c0_i32_1 = arith.constant 0 : i32
    return %c0_i32, %c0_i32_0 : i32, i32
  }
  func.func @transform_6(%arg0: i32) -> (i32, i32, i32, i32) {
    %c0_i32 = arith.constant 0 : i32
    %c0_i32_0 = arith.constant 0 : i32
    %c0_i32_1 = arith.constant 0 : i32
    %c0_i32_2 = arith.constant 0 : i32
    return %arg0, %c0_i32, %c0_i32_0, %c0_i32_1 : i32, i32, i32, i32
  }
  func.func @transform_7(%arg0: i32) -> (i32, i32, i32, i32) {
    %c0_i32 = arith.constant 0 : i32
    %c0_i32_0 = arith.constant 0 : i32
    %c0_i32_1 = arith.constant 0 : i32
    %c0_i32_2 = arith.constant 0 : i32
    return %arg0, %c0_i32, %c0_i32_0, %c0_i32_1 : i32, i32, i32, i32
  }
  func.func @transform_8(%arg0: i32) -> (i32, i32) {
    %c0_i32 = arith.constant 0 : i32
    %c0_i32_0 = arith.constant 0 : i32
    %c0_i32_1 = arith.constant 0 : i32
    return %c0_i32, %c0_i32_0 : i32, i32
  }
  func.func @transform_9(%arg0: i32) -> (i32, i32) {
    %c0_i32 = arith.constant 0 : i32
    %c0_i32_0 = arith.constant 0 : i32
    %c0_i32_1 = arith.constant 0 : i32
    return %c0_i32, %c0_i32_0 : i32, i32
  }
}

module attributes {stable_mosaic.version = 11 : i64} {
  func.func @_conv2_kernel(%arg0: i32, %arg1: memref<1x8x8x128xf32, #tpu.memory_space<vmem>>, %arg2: memref<1x128xf32, #tpu.memory_space<vmem>>, %arg3: memref<1x128xf32, #tpu.memory_space<vmem>>, %arg4: memref<9x128x128xbf16, #tpu.memory_space<vmem>>, %arg5: memref<1x8x8x128xf32, #tpu.memory_space<vmem>>, %arg6: memref<2x128xf32, #tpu.memory_space<vmem>>, %arg7: memref<1x10x10x128xf32, #tpu.memory_space<vmem>>) attributes {dimension_semantics = [#tpu.dimension_semantics<arbitrary>], iteration_bounds = array<i64: 2>, scalar_prefetch = 0 : i64, scratch_operands = 1 : i64, tpu.core_type = #tpu.core_type<tc>, window_params = [{transform_indices = @transform_0, window_bounds = array<i64: 1, 8, 8, 128>}, {pipeline_mode = #tpu.pipeline_mode<synchronous>, transform_indices = @transform_1, window_bounds = array<i64: 1, 128>}, {pipeline_mode = #tpu.pipeline_mode<synchronous>, transform_indices = @transform_2, window_bounds = array<i64: 1, 128>}, {pipeline_mode = #tpu.pipeline_mode<synchronous>, transform_indices = @transform_3, window_bounds = array<i64: 9, 128, 128>}, {transform_indices = @transform_4, window_bounds = array<i64: 1, 8, 8, 128>}, {pipeline_mode = #tpu.pipeline_mode<synchronous>, transform_indices = @transform_5, window_bounds = array<i64: 2, 128>}]} {
    %c0_i32 = arith.constant 0 : i32
    %0 = arith.cmpi eq, %arg0, %c0_i32 : i32
    %1 = arith.extui %0 : i1 to i32
    %c0_i32_0 = arith.constant 0 : i32
    %2 = arith.cmpi ne, %1, %c0_i32_0 : i32
    scf.if %2 {
      %cst_91 = arith.constant 0.000000e+00 : f32
      %106 = vector.broadcast %cst_91 : f32 to vector<2x128xf32>
      %c0_92 = arith.constant 0 : index
      %c0_93 = arith.constant 0 : index
      %107 = vector.load %arg6[%c0_92, %c0_93] : memref<2x128xf32, #tpu.memory_space<vmem>>, vector<2x128xf32>
      tpu.vector_store %arg6[%c0_92, %c0_93], %106 {strides = array<i32>} : memref<2x128xf32, #tpu.memory_space<vmem>>, vector<2x128xf32>,
      %cst_94 = arith.constant 0.000000e+00 : f32
      %108 = vector.broadcast %cst_94 : f32 to vector<1x10x10x128xf32>
      %c0_95 = arith.constant 0 : index
      %c0_96 = arith.constant 0 : index
      %c0_97 = arith.constant 0 : index
      %c0_98 = arith.constant 0 : index
      %109 = vector.load %arg7[%c0_95, %c0_96, %c0_97, %c0_98] : memref<1x10x10x128xf32, #tpu.memory_space<vmem>>, vector<1x10x10x128xf32>
      tpu.vector_store %arg7[%c0_95, %c0_96, %c0_97, %c0_98], %108 {strides = array<i32>} : memref<1x10x10x128xf32, #tpu.memory_space<vmem>>, vector<1x10x10x128xf32>,
    } else {
    }
    %c0 = arith.constant 0 : index
    %c0_1 = arith.constant 0 : index
    %c0_2 = arith.constant 0 : index
    %c0_3 = arith.constant 0 : index
    %3 = vector.load %arg1[%c0, %c0_1, %c0_2, %c0_3] : memref<1x8x8x128xf32, #tpu.memory_space<vmem>>, vector<1x8x8x128xf32>
    %4 = vector.shape_cast %3 : vector<1x8x8x128xf32> to vector<8x8x128xf32>
    %c0_4 = arith.constant 0 : index
    %c0_5 = arith.constant 0 : index
    %5 = vector.load %arg2[%c0_4, %c0_5] : memref<1x128xf32, #tpu.memory_space<vmem>>, vector<1x128xf32>
    %6 = vector.shape_cast %5 : vector<1x128xf32> to vector<1x1x128xf32>
    %7 = vector.broadcast %6 : vector<1x1x128xf32> to vector<8x8x128xf32>
    %8 = arith.mulf %4, %7 : vector<8x8x128xf32>
    %c0_6 = arith.constant 0 : index
    %c0_7 = arith.constant 0 : index
    %9 = vector.load %arg3[%c0_6, %c0_7] : memref<1x128xf32, #tpu.memory_space<vmem>>, vector<1x128xf32>
    %10 = vector.shape_cast %9 : vector<1x128xf32> to vector<1x1x128xf32>
    %11 = vector.broadcast %10 : vector<1x1x128xf32> to vector<8x8x128xf32>
    %12 = arith.addf %8, %11 : vector<8x8x128xf32>
    %cst = arith.constant 0.000000e+00 : f32
    %13 = vector.broadcast %cst : f32 to vector<8x8x128xf32>
    %14 = arith.maximumf %12, %13 : vector<8x8x128xf32>
    %c0_8 = arith.constant 0 : index
    %c1 = arith.constant 1 : index
    %c1_9 = arith.constant 1 : index
    %c0_10 = arith.constant 0 : index
    %15 = vector.load %arg7[%c0_8, %c1, %c1_9, %c0_10] : memref<1x10x10x128xf32, #tpu.memory_space<vmem>>, vector<1x8x8x128xf32>
    %16 = vector.shape_cast %15 : vector<1x8x8x128xf32> to vector<8x8x128xf32>
    %17 = vector.shape_cast %14 : vector<8x8x128xf32> to vector<1x8x8x128xf32>
    tpu.vector_store %arg7[%c0_8, %c1, %c1_9, %c0_10], %17 {strides = array<i32>} : memref<1x10x10x128xf32, #tpu.memory_space<vmem>>, vector<1x8x8x128xf32>,
    %cst_11 = arith.constant 0.000000e+00 : f32
    %18 = vector.broadcast %cst_11 : f32 to vector<64x128xf32>
    %c0_12 = arith.constant 0 : index
    %c0_13 = arith.constant 0 : index
    %c0_14 = arith.constant 0 : index
    %c0_15 = arith.constant 0 : index
    %19 = vector.load %arg7[%c0_12, %c0_13, %c0_14, %c0_15] : memref<1x10x10x128xf32, #tpu.memory_space<vmem>>, vector<1x8x8x128xf32>
    %20 = vector.shape_cast %19 : vector<1x8x8x128xf32> to vector<8x8x128xf32>
    %21 = vector.shape_cast %20 : vector<8x8x128xf32> to vector<64x128xf32>
    %22 = arith.truncf %21 : vector<64x128xf32> to vector<64x128xbf16>
    %c0_16 = arith.constant 0 : index
    %c0_17 = arith.constant 0 : index
    %c0_18 = arith.constant 0 : index
    %23 = vector.load %arg4[%c0_16, %c0_17, %c0_18] : memref<9x128x128xbf16, #tpu.memory_space<vmem>>, vector<1x128x128xbf16>
    %24 = vector.shape_cast %23 : vector<1x128x128xbf16> to vector<128x128xbf16>
    %cst_19 = arith.constant dense<0.000000e+00> : vector<64x128xf32>
    %25 = tpu.matmul %22, %24, %cst_19 {dimension_numbers = #tpu.dot_dimension_numbers<[1], [0], [0], [1], [0, 0, 1, 1], [], []>} : vector<64x128xbf16>, vector<128x128xbf16>, vector<64x128xf32> -> vector<64x128xf32>
    %26 = arith.addf %18, %25 : vector<64x128xf32>
    %c0_20 = arith.constant 0 : index
    %c0_21 = arith.constant 0 : index
    %c1_22 = arith.constant 1 : index
    %c0_23 = arith.constant 0 : index
    %27 = vector.load %arg7[%c0_20, %c0_21, %c1_22, %c0_23] : memref<1x10x10x128xf32, #tpu.memory_space<vmem>>, vector<1x8x8x128xf32>
    %28 = vector.shape_cast %27 : vector<1x8x8x128xf32> to vector<8x8x128xf32>
    %29 = vector.shape_cast %28 : vector<8x8x128xf32> to vector<64x128xf32>
    %30 = arith.truncf %29 : vector<64x128xf32> to vector<64x128xbf16>
    %c1_24 = arith.constant 1 : index
    %c0_25 = arith.constant 0 : index
    %c0_26 = arith.constant 0 : index
    %31 = vector.load %arg4[%c1_24, %c0_25, %c0_26] : memref<9x128x128xbf16, #tpu.memory_space<vmem>>, vector<1x128x128xbf16>
    %32 = vector.shape_cast %31 : vector<1x128x128xbf16> to vector<128x128xbf16>
    %cst_27 = arith.constant dense<0.000000e+00> : vector<64x128xf32>
    %33 = tpu.matmul %30, %32, %cst_27 {dimension_numbers = #tpu.dot_dimension_numbers<[1], [0], [0], [1], [0, 0, 1, 1], [], []>} : vector<64x128xbf16>, vector<128x128xbf16>, vector<64x128xf32> -> vector<64x128xf32>
    %34 = arith.addf %26, %33 : vector<64x128xf32>
    %c0_28 = arith.constant 0 : index
    %c0_29 = arith.constant 0 : index
    %c2 = arith.constant 2 : index
    %c0_30 = arith.constant 0 : index
    %35 = vector.load %arg7[%c0_28, %c0_29, %c2, %c0_30] : memref<1x10x10x128xf32, #tpu.memory_space<vmem>>, vector<1x8x8x128xf32>
    %36 = vector.shape_cast %35 : vector<1x8x8x128xf32> to vector<8x8x128xf32>
    %37 = vector.shape_cast %36 : vector<8x8x128xf32> to vector<64x128xf32>
    %38 = arith.truncf %37 : vector<64x128xf32> to vector<64x128xbf16>
    %c2_31 = arith.constant 2 : index
    %c0_32 = arith.constant 0 : index
    %c0_33 = arith.constant 0 : index
    %39 = vector.load %arg4[%c2_31, %c0_32, %c0_33] : memref<9x128x128xbf16, #tpu.memory_space<vmem>>, vector<1x128x128xbf16>
    %40 = vector.shape_cast %39 : vector<1x128x128xbf16> to vector<128x128xbf16>
    %cst_34 = arith.constant dense<0.000000e+00> : vector<64x128xf32>
    %41 = tpu.matmul %38, %40, %cst_34 {dimension_numbers = #tpu.dot_dimension_numbers<[1], [0], [0], [1], [0, 0, 1, 1], [], []>} : vector<64x128xbf16>, vector<128x128xbf16>, vector<64x128xf32> -> vector<64x128xf32>
    %42 = arith.addf %34, %41 : vector<64x128xf32>
    %c0_35 = arith.constant 0 : index
    %c1_36 = arith.constant 1 : index
    %c0_37 = arith.constant 0 : index
    %c0_38 = arith.constant 0 : index
    %43 = vector.load %arg7[%c0_35, %c1_36, %c0_37, %c0_38] : memref<1x10x10x128xf32, #tpu.memory_space<vmem>>, vector<1x8x8x128xf32>
    %44 = vector.shape_cast %43 : vector<1x8x8x128xf32> to vector<8x8x128xf32>
    %45 = vector.shape_cast %44 : vector<8x8x128xf32> to vector<64x128xf32>
    %46 = arith.truncf %45 : vector<64x128xf32> to vector<64x128xbf16>
    %c3 = arith.constant 3 : index
    %c0_39 = arith.constant 0 : index
    %c0_40 = arith.constant 0 : index
    %47 = vector.load %arg4[%c3, %c0_39, %c0_40] : memref<9x128x128xbf16, #tpu.memory_space<vmem>>, vector<1x128x128xbf16>
    %48 = vector.shape_cast %47 : vector<1x128x128xbf16> to vector<128x128xbf16>
    %cst_41 = arith.constant dense<0.000000e+00> : vector<64x128xf32>
    %49 = tpu.matmul %46, %48, %cst_41 {dimension_numbers = #tpu.dot_dimension_numbers<[1], [0], [0], [1], [0, 0, 1, 1], [], []>} : vector<64x128xbf16>, vector<128x128xbf16>, vector<64x128xf32> -> vector<64x128xf32>
    %50 = arith.addf %42, %49 : vector<64x128xf32>
    %c0_42 = arith.constant 0 : index
    %c1_43 = arith.constant 1 : index
    %c1_44 = arith.constant 1 : index
    %c0_45 = arith.constant 0 : index
    %51 = vector.load %arg7[%c0_42, %c1_43, %c1_44, %c0_45] : memref<1x10x10x128xf32, #tpu.memory_space<vmem>>, vector<1x8x8x128xf32>
    %52 = vector.shape_cast %51 : vector<1x8x8x128xf32> to vector<8x8x128xf32>
    %53 = vector.shape_cast %52 : vector<8x8x128xf32> to vector<64x128xf32>
    %54 = arith.truncf %53 : vector<64x128xf32> to vector<64x128xbf16>
    %c4 = arith.constant 4 : index
    %c0_46 = arith.constant 0 : index
    %c0_47 = arith.constant 0 : index
    %55 = vector.load %arg4[%c4, %c0_46, %c0_47] : memref<9x128x128xbf16, #tpu.memory_space<vmem>>, vector<1x128x128xbf16>
    %56 = vector.shape_cast %55 : vector<1x128x128xbf16> to vector<128x128xbf16>
    %cst_48 = arith.constant dense<0.000000e+00> : vector<64x128xf32>
    %57 = tpu.matmul %54, %56, %cst_48 {dimension_numbers = #tpu.dot_dimension_numbers<[1], [0], [0], [1], [0, 0, 1, 1], [], []>} : vector<64x128xbf16>, vector<128x128xbf16>, vector<64x128xf32> -> vector<64x128xf32>
    %58 = arith.addf %50, %57 : vector<64x128xf32>
    %c0_49 = arith.constant 0 : index
    %c1_50 = arith.constant 1 : index
    %c2_51 = arith.constant 2 : index
    %c0_52 = arith.constant 0 : index
    %59 = vector.load %arg7[%c0_49, %c1_50, %c2_51, %c0_52] : memref<1x10x10x128xf32, #tpu.memory_space<vmem>>, vector<1x8x8x128xf32>
    %60 = vector.shape_cast %59 : vector<1x8x8x128xf32> to vector<8x8x128xf32>
    %61 = vector.shape_cast %60 : vector<8x8x128xf32> to vector<64x128xf32>
    %62 = arith.truncf %61 : vector<64x128xf32> to vector<64x128xbf16>
    %c5 = arith.constant 5 : index
    %c0_53 = arith.constant 0 : index
    %c0_54 = arith.constant 0 : index
    %63 = vector.load %arg4[%c5, %c0_53, %c0_54] : memref<9x128x128xbf16, #tpu.memory_space<vmem>>, vector<1x128x128xbf16>
    %64 = vector.shape_cast %63 : vector<1x128x128xbf16> to vector<128x128xbf16>
    %cst_55 = arith.constant dense<0.000000e+00> : vector<64x128xf32>
    %65 = tpu.matmul %62, %64, %cst_55 {dimension_numbers = #tpu.dot_dimension_numbers<[1], [0], [0], [1], [0, 0, 1, 1], [], []>} : vector<64x128xbf16>, vector<128x128xbf16>, vector<64x128xf32> -> vector<64x128xf32>
    %66 = arith.addf %58, %65 : vector<64x128xf32>
    %c0_56 = arith.constant 0 : index
    %c2_57 = arith.constant 2 : index
    %c0_58 = arith.constant 0 : index
    %c0_59 = arith.constant 0 : index
    %67 = vector.load %arg7[%c0_56, %c2_57, %c0_58, %c0_59] : memref<1x10x10x128xf32, #tpu.memory_space<vmem>>, vector<1x8x8x128xf32>
    %68 = vector.shape_cast %67 : vector<1x8x8x128xf32> to vector<8x8x128xf32>
    %69 = vector.shape_cast %68 : vector<8x8x128xf32> to vector<64x128xf32>
    %70 = arith.truncf %69 : vector<64x128xf32> to vector<64x128xbf16>
    %c6 = arith.constant 6 : index
    %c0_60 = arith.constant 0 : index
    %c0_61 = arith.constant 0 : index
    %71 = vector.load %arg4[%c6, %c0_60, %c0_61] : memref<9x128x128xbf16, #tpu.memory_space<vmem>>, vector<1x128x128xbf16>
    %72 = vector.shape_cast %71 : vector<1x128x128xbf16> to vector<128x128xbf16>
    %cst_62 = arith.constant dense<0.000000e+00> : vector<64x128xf32>
    %73 = tpu.matmul %70, %72, %cst_62 {dimension_numbers = #tpu.dot_dimension_numbers<[1], [0], [0], [1], [0, 0, 1, 1], [], []>} : vector<64x128xbf16>, vector<128x128xbf16>, vector<64x128xf32> -> vector<64x128xf32>
    %74 = arith.addf %66, %73 : vector<64x128xf32>
    %c0_63 = arith.constant 0 : index
    %c2_64 = arith.constant 2 : index
    %c1_65 = arith.constant 1 : index
    %c0_66 = arith.constant 0 : index
    %75 = vector.load %arg7[%c0_63, %c2_64, %c1_65, %c0_66] : memref<1x10x10x128xf32, #tpu.memory_space<vmem>>, vector<1x8x8x128xf32>
    %76 = vector.shape_cast %75 : vector<1x8x8x128xf32> to vector<8x8x128xf32>
    %77 = vector.shape_cast %76 : vector<8x8x128xf32> to vector<64x128xf32>
    %78 = arith.truncf %77 : vector<64x128xf32> to vector<64x128xbf16>
    %c7 = arith.constant 7 : index
    %c0_67 = arith.constant 0 : index
    %c0_68 = arith.constant 0 : index
    %79 = vector.load %arg4[%c7, %c0_67, %c0_68] : memref<9x128x128xbf16, #tpu.memory_space<vmem>>, vector<1x128x128xbf16>
    %80 = vector.shape_cast %79 : vector<1x128x128xbf16> to vector<128x128xbf16>
    %cst_69 = arith.constant dense<0.000000e+00> : vector<64x128xf32>
    %81 = tpu.matmul %78, %80, %cst_69 {dimension_numbers = #tpu.dot_dimension_numbers<[1], [0], [0], [1], [0, 0, 1, 1], [], []>} : vector<64x128xbf16>, vector<128x128xbf16>, vector<64x128xf32> -> vector<64x128xf32>
    %82 = arith.addf %74, %81 : vector<64x128xf32>
    %c0_70 = arith.constant 0 : index
    %c2_71 = arith.constant 2 : index
    %c2_72 = arith.constant 2 : index
    %c0_73 = arith.constant 0 : index
    %83 = vector.load %arg7[%c0_70, %c2_71, %c2_72, %c0_73] : memref<1x10x10x128xf32, #tpu.memory_space<vmem>>, vector<1x8x8x128xf32>
    %84 = vector.shape_cast %83 : vector<1x8x8x128xf32> to vector<8x8x128xf32>
    %85 = vector.shape_cast %84 : vector<8x8x128xf32> to vector<64x128xf32>
    %86 = arith.truncf %85 : vector<64x128xf32> to vector<64x128xbf16>
    %c8 = arith.constant 8 : index
    %c0_74 = arith.constant 0 : index
    %c0_75 = arith.constant 0 : index
    %87 = vector.load %arg4[%c8, %c0_74, %c0_75] : memref<9x128x128xbf16, #tpu.memory_space<vmem>>, vector<1x128x128xbf16>
    %88 = vector.shape_cast %87 : vector<1x128x128xbf16> to vector<128x128xbf16>
    %cst_76 = arith.constant dense<0.000000e+00> : vector<64x128xf32>
    %89 = tpu.matmul %86, %88, %cst_76 {dimension_numbers = #tpu.dot_dimension_numbers<[1], [0], [0], [1], [0, 0, 1, 1], [], []>} : vector<64x128xbf16>, vector<128x128xbf16>, vector<64x128xf32> -> vector<64x128xf32>
    %90 = arith.addf %82, %89 : vector<64x128xf32>
    %91 = vector.shape_cast %90 : vector<64x128xf32> to vector<8x8x128xf32>
    %c0_77 = arith.constant 0 : index
    %c0_78 = arith.constant 0 : index
    %c0_79 = arith.constant 0 : index
    %c0_80 = arith.constant 0 : index
    %92 = vector.load %arg5[%c0_77, %c0_78, %c0_79, %c0_80] : memref<1x8x8x128xf32, #tpu.memory_space<vmem>>, vector<1x8x8x128xf32>
    %93 = vector.shape_cast %92 : vector<1x8x8x128xf32> to vector<8x8x128xf32>
    %94 = vector.shape_cast %91 : vector<8x8x128xf32> to vector<1x8x8x128xf32>
    tpu.vector_store %arg5[%c0_77, %c0_78, %c0_79, %c0_80], %94 {strides = array<i32>} : memref<1x8x8x128xf32, #tpu.memory_space<vmem>>, vector<1x8x8x128xf32>,
    %c0_81 = arith.constant 0 : index
    %c0_82 = arith.constant 0 : index
    %95 = vector.load %arg6[%c0_81, %c0_82] : memref<2x128xf32, #tpu.memory_space<vmem>>, vector<1x128xf32>
    %cst_83 = arith.constant dense<0.000000e+00> : vector<128xf32>
    %96 = vector.multi_reduction <add>, %90, %cst_83 [0] : vector<64x128xf32> to vector<128xf32>
    %97 = vector.shape_cast %96 : vector<128xf32> to vector<1x128xf32>
    %98 = arith.addf %95, %97 : vector<1x128xf32>
    %c0_84 = arith.constant 0 : index
    %c0_85 = arith.constant 0 : index
    %99 = vector.load %arg6[%c0_84, %c0_85] : memref<2x128xf32, #tpu.memory_space<vmem>>, vector<1x128xf32>
    tpu.vector_store %arg6[%c0_84, %c0_85], %98 {strides = array<i32>} : memref<2x128xf32, #tpu.memory_space<vmem>>, vector<1x128xf32>,
    %c1_86 = arith.constant 1 : index
    %c0_87 = arith.constant 0 : index
    %100 = vector.load %arg6[%c1_86, %c0_87] : memref<2x128xf32, #tpu.memory_space<vmem>>, vector<1x128xf32>
    %101 = arith.mulf %90, %90 : vector<64x128xf32>
    %cst_88 = arith.constant dense<0.000000e+00> : vector<128xf32>
    %102 = vector.multi_reduction <add>, %101, %cst_88 [0] : vector<64x128xf32> to vector<128xf32>
    %103 = vector.shape_cast %102 : vector<128xf32> to vector<1x128xf32>
    %104 = arith.addf %100, %103 : vector<1x128xf32>
    %c1_89 = arith.constant 1 : index
    %c0_90 = arith.constant 0 : index
    %105 = vector.load %arg6[%c1_89, %c0_90] : memref<2x128xf32, #tpu.memory_space<vmem>>, vector<1x128xf32>
    tpu.vector_store %arg6[%c1_89, %c0_90], %104 {strides = array<i32>} : memref<2x128xf32, #tpu.memory_space<vmem>>, vector<1x128xf32>,
    return
  }
  func.func @transform_0(%arg0: i32) -> (i32, i32, i32, i32) {
    %c0_i32 = arith.constant 0 : i32
    %c0_i32_0 = arith.constant 0 : i32
    %c0_i32_1 = arith.constant 0 : i32
    %c0_i32_2 = arith.constant 0 : i32
    return %arg0, %c0_i32, %c0_i32_0, %c0_i32_1 : i32, i32, i32, i32
  }
  func.func @transform_1(%arg0: i32) -> (i32, i32) {
    %c0_i32 = arith.constant 0 : i32
    %c0_i32_0 = arith.constant 0 : i32
    %c0_i32_1 = arith.constant 0 : i32
    return %c0_i32, %c0_i32_0 : i32, i32
  }
  func.func @transform_2(%arg0: i32) -> (i32, i32) {
    %c0_i32 = arith.constant 0 : i32
    %c0_i32_0 = arith.constant 0 : i32
    %c0_i32_1 = arith.constant 0 : i32
    return %c0_i32, %c0_i32_0 : i32, i32
  }
  func.func @transform_3(%arg0: i32) -> (i32, i32, i32) {
    %c0_i32 = arith.constant 0 : i32
    %c0_i32_0 = arith.constant 0 : i32
    %c0_i32_1 = arith.constant 0 : i32
    %c0_i32_2 = arith.constant 0 : i32
    return %c0_i32, %c0_i32_0, %c0_i32_1 : i32, i32, i32
  }
  func.func @transform_4(%arg0: i32) -> (i32, i32, i32, i32) {
    %c0_i32 = arith.constant 0 : i32
    %c0_i32_0 = arith.constant 0 : i32
    %c0_i32_1 = arith.constant 0 : i32
    %c0_i32_2 = arith.constant 0 : i32
    return %arg0, %c0_i32, %c0_i32_0, %c0_i32_1 : i32, i32, i32, i32
  }
  func.func @transform_5(%arg0: i32) -> (i32, i32) {
    %c0_i32 = arith.constant 0 : i32
    %c0_i32_0 = arith.constant 0 : i32
    %c0_i32_1 = arith.constant 0 : i32
    return %c0_i32, %c0_i32_0 : i32, i32
  }
}

module attributes {stable_mosaic.version = 11 : i64} {
  func.func @_finalize_kernel(%arg0: i32, %arg1: memref<1x8x8x128xf32, #tpu.memory_space<vmem>>, %arg2: memref<1x8x8x128xf32, #tpu.memory_space<vmem>>, %arg3: memref<1x128xf32, #tpu.memory_space<vmem>>, %arg4: memref<1x128xf32, #tpu.memory_space<vmem>>, %arg5: memref<1x128xf32, #tpu.memory_space<vmem>>, %arg6: memref<1x128xf32, #tpu.memory_space<vmem>>, %arg7: memref<1x8x8x128xf32, #tpu.memory_space<vmem>>) attributes {dimension_semantics = [#tpu.dimension_semantics<parallel>], iteration_bounds = array<i64: 2>, scalar_prefetch = 0 : i64, scratch_operands = 0 : i64, tpu.core_type = #tpu.core_type<tc>, window_params = [{transform_indices = @transform_0, window_bounds = array<i64: 1, 8, 8, 128>}, {transform_indices = @transform_1, window_bounds = array<i64: 1, 8, 8, 128>}, {pipeline_mode = #tpu.pipeline_mode<synchronous>, transform_indices = @transform_2, window_bounds = array<i64: 1, 128>}, {pipeline_mode = #tpu.pipeline_mode<synchronous>, transform_indices = @transform_3, window_bounds = array<i64: 1, 128>}, {pipeline_mode = #tpu.pipeline_mode<synchronous>, transform_indices = @transform_4, window_bounds = array<i64: 1, 128>}, {pipeline_mode = #tpu.pipeline_mode<synchronous>, transform_indices = @transform_5, window_bounds = array<i64: 1, 128>}, {transform_indices = @transform_6, window_bounds = array<i64: 1, 8, 8, 128>}]} {
    %c0 = arith.constant 0 : index
    %c0_0 = arith.constant 0 : index
    %c0_1 = arith.constant 0 : index
    %c0_2 = arith.constant 0 : index
    %0 = vector.load %arg1[%c0, %c0_0, %c0_1, %c0_2] : memref<1x8x8x128xf32, #tpu.memory_space<vmem>>, vector<1x8x8x128xf32>
    %1 = vector.shape_cast %0 : vector<1x8x8x128xf32> to vector<8x8x128xf32>
    %c0_3 = arith.constant 0 : index
    %c0_4 = arith.constant 0 : index
    %2 = vector.load %arg3[%c0_3, %c0_4] : memref<1x128xf32, #tpu.memory_space<vmem>>, vector<1x128xf32>
    %3 = vector.shape_cast %2 : vector<1x128xf32> to vector<1x1x128xf32>
    %4 = vector.broadcast %3 : vector<1x1x128xf32> to vector<8x8x128xf32>
    %5 = arith.mulf %1, %4 : vector<8x8x128xf32>
    %c0_5 = arith.constant 0 : index
    %c0_6 = arith.constant 0 : index
    %6 = vector.load %arg4[%c0_5, %c0_6] : memref<1x128xf32, #tpu.memory_space<vmem>>, vector<1x128xf32>
    %7 = vector.shape_cast %6 : vector<1x128xf32> to vector<1x1x128xf32>
    %8 = vector.broadcast %7 : vector<1x1x128xf32> to vector<8x8x128xf32>
    %9 = arith.addf %5, %8 : vector<8x8x128xf32>
    %c0_7 = arith.constant 0 : index
    %c0_8 = arith.constant 0 : index
    %c0_9 = arith.constant 0 : index
    %c0_10 = arith.constant 0 : index
    %10 = vector.load %arg2[%c0_7, %c0_8, %c0_9, %c0_10] : memref<1x8x8x128xf32, #tpu.memory_space<vmem>>, vector<1x8x8x128xf32>
    %11 = vector.shape_cast %10 : vector<1x8x8x128xf32> to vector<8x8x128xf32>
    %c0_11 = arith.constant 0 : index
    %c0_12 = arith.constant 0 : index
    %12 = vector.load %arg5[%c0_11, %c0_12] : memref<1x128xf32, #tpu.memory_space<vmem>>, vector<1x128xf32>
    %13 = vector.shape_cast %12 : vector<1x128xf32> to vector<1x1x128xf32>
    %14 = vector.broadcast %13 : vector<1x1x128xf32> to vector<8x8x128xf32>
    %15 = arith.mulf %11, %14 : vector<8x8x128xf32>
    %c0_13 = arith.constant 0 : index
    %c0_14 = arith.constant 0 : index
    %16 = vector.load %arg6[%c0_13, %c0_14] : memref<1x128xf32, #tpu.memory_space<vmem>>, vector<1x128xf32>
    %17 = vector.shape_cast %16 : vector<1x128xf32> to vector<1x1x128xf32>
    %18 = vector.broadcast %17 : vector<1x1x128xf32> to vector<8x8x128xf32>
    %19 = arith.addf %15, %18 : vector<8x8x128xf32>
    %20 = arith.addf %9, %19 : vector<8x8x128xf32>
    %cst = arith.constant 0.000000e+00 : f32
    %21 = vector.broadcast %cst : f32 to vector<8x8x128xf32>
    %22 = arith.maximumf %20, %21 : vector<8x8x128xf32>
    %c0_15 = arith.constant 0 : index
    %c0_16 = arith.constant 0 : index
    %c0_17 = arith.constant 0 : index
    %c0_18 = arith.constant 0 : index
    %23 = vector.load %arg7[%c0_15, %c0_16, %c0_17, %c0_18] : memref<1x8x8x128xf32, #tpu.memory_space<vmem>>, vector<1x8x8x128xf32>
    %24 = vector.shape_cast %23 : vector<1x8x8x128xf32> to vector<8x8x128xf32>
    %25 = vector.shape_cast %22 : vector<8x8x128xf32> to vector<1x8x8x128xf32>
    tpu.vector_store %arg7[%c0_15, %c0_16, %c0_17, %c0_18], %25 {strides = array<i32>} : memref<1x8x8x128xf32, #tpu.memory_space<vmem>>, vector<1x8x8x128xf32>,
    return
  }
  func.func @transform_0(%arg0: i32) -> (i32, i32, i32, i32) {
    %c0_i32 = arith.constant 0 : i32
    %c0_i32_0 = arith.constant 0 : i32
    %c0_i32_1 = arith.constant 0 : i32
    %c0_i32_2 = arith.constant 0 : i32
    return %arg0, %c0_i32, %c0_i32_0, %c0_i32_1 : i32, i32, i32, i32
  }
  func.func @transform_1(%arg0: i32) -> (i32, i32, i32, i32) {
    %c0_i32 = arith.constant 0 : i32
    %c0_i32_0 = arith.constant 0 : i32
    %c0_i32_1 = arith.constant 0 : i32
    %c0_i32_2 = arith.constant 0 : i32
    return %arg0, %c0_i32, %c0_i32_0, %c0_i32_1 : i32, i32, i32, i32
  }
  func.func @transform_2(%arg0: i32) -> (i32, i32) {
    %c0_i32 = arith.constant 0 : i32
    %c0_i32_0 = arith.constant 0 : i32
    %c0_i32_1 = arith.constant 0 : i32
    return %c0_i32, %c0_i32_0 : i32, i32
  }
  func.func @transform_3(%arg0: i32) -> (i32, i32) {
    %c0_i32 = arith.constant 0 : i32
    %c0_i32_0 = arith.constant 0 : i32
    %c0_i32_1 = arith.constant 0 : i32
    return %c0_i32, %c0_i32_0 : i32, i32
  }
  func.func @transform_4(%arg0: i32) -> (i32, i32) {
    %c0_i32 = arith.constant 0 : i32
    %c0_i32_0 = arith.constant 0 : i32
    %c0_i32_1 = arith.constant 0 : i32
    return %c0_i32, %c0_i32_0 : i32, i32
  }
  func.func @transform_5(%arg0: i32) -> (i32, i32) {
    %c0_i32 = arith.constant 0 : i32
    %c0_i32_0 = arith.constant 0 : i32
    %c0_i32_1 = arith.constant 0 : i32
    return %c0_i32, %c0_i32_0 : i32, i32
  }
  func.func @transform_6(%arg0: i32) -> (i32, i32, i32, i32) {
    %c0_i32 = arith.constant 0 : i32
    %c0_i32_0 = arith.constant 0 : i32
    %c0_i32_1 = arith.constant 0 : i32
    %c0_i32_2 = arith.constant 0 : i32
    return %arg0, %c0_i32, %c0_i32_0, %c0_i32_1 : i32, i32, i32, i32
  }
}

module attributes {stable_mosaic.version = 11 : i64} {
  func.func @_finalize_conv_kernel(%arg0: i32, %arg1: memref<1x8x8x128xf32, #tpu.memory_space<vmem>>, %arg2: memref<1x8x8x128xf32, #tpu.memory_space<vmem>>, %arg3: memref<1x128xf32, #tpu.memory_space<vmem>>, %arg4: memref<1x128xf32, #tpu.memory_space<vmem>>, %arg5: memref<1x128xf32, #tpu.memory_space<vmem>>, %arg6: memref<1x128xf32, #tpu.memory_space<vmem>>, %arg7: memref<9x128x128xbf16, #tpu.memory_space<vmem>>, %arg8: memref<1x8x8x128xf32, #tpu.memory_space<vmem>>, %arg9: memref<1x8x8x128xf32, #tpu.memory_space<vmem>>, %arg10: memref<2x128xf32, #tpu.memory_space<vmem>>, %arg11: memref<1x10x10x128xf32, #tpu.memory_space<vmem>>) attributes {dimension_semantics = [#tpu.dimension_semantics<arbitrary>], iteration_bounds = array<i64: 2>, scalar_prefetch = 0 : i64, scratch_operands = 1 : i64, tpu.core_type = #tpu.core_type<tc>, window_params = [{transform_indices = @transform_0, window_bounds = array<i64: 1, 8, 8, 128>}, {transform_indices = @transform_1, window_bounds = array<i64: 1, 8, 8, 128>}, {pipeline_mode = #tpu.pipeline_mode<synchronous>, transform_indices = @transform_2, window_bounds = array<i64: 1, 128>}, {pipeline_mode = #tpu.pipeline_mode<synchronous>, transform_indices = @transform_3, window_bounds = array<i64: 1, 128>}, {pipeline_mode = #tpu.pipeline_mode<synchronous>, transform_indices = @transform_4, window_bounds = array<i64: 1, 128>}, {pipeline_mode = #tpu.pipeline_mode<synchronous>, transform_indices = @transform_5, window_bounds = array<i64: 1, 128>}, {pipeline_mode = #tpu.pipeline_mode<synchronous>, transform_indices = @transform_6, window_bounds = array<i64: 9, 128, 128>}, {transform_indices = @transform_7, window_bounds = array<i64: 1, 8, 8, 128>}, {transform_indices = @transform_8, window_bounds = array<i64: 1, 8, 8, 128>}, {pipeline_mode = #tpu.pipeline_mode<synchronous>, transform_indices = @transform_9, window_bounds = array<i64: 2, 128>}]} {
    %c0_i32 = arith.constant 0 : i32
    %0 = arith.cmpi eq, %arg0, %c0_i32 : i32
    %1 = arith.extui %0 : i1 to i32
    %c0_i32_0 = arith.constant 0 : i32
    %2 = arith.cmpi ne, %1, %c0_i32_0 : i32
    scf.if %2 {
      %cst_103 = arith.constant 0.000000e+00 : f32
      %120 = vector.broadcast %cst_103 : f32 to vector<2x128xf32>
      %c0_104 = arith.constant 0 : index
      %c0_105 = arith.constant 0 : index
      %121 = vector.load %arg10[%c0_104, %c0_105] : memref<2x128xf32, #tpu.memory_space<vmem>>, vector<2x128xf32>
      tpu.vector_store %arg10[%c0_104, %c0_105], %120 {strides = array<i32>} : memref<2x128xf32, #tpu.memory_space<vmem>>, vector<2x128xf32>,
      %cst_106 = arith.constant 0.000000e+00 : f32
      %122 = vector.broadcast %cst_106 : f32 to vector<1x10x10x128xf32>
      %c0_107 = arith.constant 0 : index
      %c0_108 = arith.constant 0 : index
      %c0_109 = arith.constant 0 : index
      %c0_110 = arith.constant 0 : index
      %123 = vector.load %arg11[%c0_107, %c0_108, %c0_109, %c0_110] : memref<1x10x10x128xf32, #tpu.memory_space<vmem>>, vector<1x10x10x128xf32>
      tpu.vector_store %arg11[%c0_107, %c0_108, %c0_109, %c0_110], %122 {strides = array<i32>} : memref<1x10x10x128xf32, #tpu.memory_space<vmem>>, vector<1x10x10x128xf32>,
    } else {
    }
    %c0 = arith.constant 0 : index
    %c0_1 = arith.constant 0 : index
    %c0_2 = arith.constant 0 : index
    %c0_3 = arith.constant 0 : index
    %3 = vector.load %arg1[%c0, %c0_1, %c0_2, %c0_3] : memref<1x8x8x128xf32, #tpu.memory_space<vmem>>, vector<1x8x8x128xf32>
    %4 = vector.shape_cast %3 : vector<1x8x8x128xf32> to vector<8x8x128xf32>
    %c0_4 = arith.constant 0 : index
    %c0_5 = arith.constant 0 : index
    %5 = vector.load %arg3[%c0_4, %c0_5] : memref<1x128xf32, #tpu.memory_space<vmem>>, vector<1x128xf32>
    %6 = vector.shape_cast %5 : vector<1x128xf32> to vector<1x1x128xf32>
    %7 = vector.broadcast %6 : vector<1x1x128xf32> to vector<8x8x128xf32>
    %8 = arith.mulf %4, %7 : vector<8x8x128xf32>
    %c0_6 = arith.constant 0 : index
    %c0_7 = arith.constant 0 : index
    %9 = vector.load %arg4[%c0_6, %c0_7] : memref<1x128xf32, #tpu.memory_space<vmem>>, vector<1x128xf32>
    %10 = vector.shape_cast %9 : vector<1x128xf32> to vector<1x1x128xf32>
    %11 = vector.broadcast %10 : vector<1x1x128xf32> to vector<8x8x128xf32>
    %12 = arith.addf %8, %11 : vector<8x8x128xf32>
    %c0_8 = arith.constant 0 : index
    %c0_9 = arith.constant 0 : index
    %c0_10 = arith.constant 0 : index
    %c0_11 = arith.constant 0 : index
    %13 = vector.load %arg2[%c0_8, %c0_9, %c0_10, %c0_11] : memref<1x8x8x128xf32, #tpu.memory_space<vmem>>, vector<1x8x8x128xf32>
    %14 = vector.shape_cast %13 : vector<1x8x8x128xf32> to vector<8x8x128xf32>
    %c0_12 = arith.constant 0 : index
    %c0_13 = arith.constant 0 : index
    %15 = vector.load %arg5[%c0_12, %c0_13] : memref<1x128xf32, #tpu.memory_space<vmem>>, vector<1x128xf32>
    %16 = vector.shape_cast %15 : vector<1x128xf32> to vector<1x1x128xf32>
    %17 = vector.broadcast %16 : vector<1x1x128xf32> to vector<8x8x128xf32>
    %18 = arith.mulf %14, %17 : vector<8x8x128xf32>
    %19 = arith.addf %12, %18 : vector<8x8x128xf32>
    %c0_14 = arith.constant 0 : index
    %c0_15 = arith.constant 0 : index
    %20 = vector.load %arg6[%c0_14, %c0_15] : memref<1x128xf32, #tpu.memory_space<vmem>>, vector<1x128xf32>
    %21 = vector.shape_cast %20 : vector<1x128xf32> to vector<1x1x128xf32>
    %22 = vector.broadcast %21 : vector<1x1x128xf32> to vector<8x8x128xf32>
    %23 = arith.addf %19, %22 : vector<8x8x128xf32>
    %cst = arith.constant 0.000000e+00 : f32
    %24 = vector.broadcast %cst : f32 to vector<8x8x128xf32>
    %25 = arith.maximumf %23, %24 : vector<8x8x128xf32>
    %c0_16 = arith.constant 0 : index
    %c0_17 = arith.constant 0 : index
    %c0_18 = arith.constant 0 : index
    %c0_19 = arith.constant 0 : index
    %26 = vector.load %arg8[%c0_16, %c0_17, %c0_18, %c0_19] : memref<1x8x8x128xf32, #tpu.memory_space<vmem>>, vector<1x8x8x128xf32>
    %27 = vector.shape_cast %26 : vector<1x8x8x128xf32> to vector<8x8x128xf32>
    %28 = vector.shape_cast %25 : vector<8x8x128xf32> to vector<1x8x8x128xf32>
    tpu.vector_store %arg8[%c0_16, %c0_17, %c0_18, %c0_19], %28 {strides = array<i32>} : memref<1x8x8x128xf32, #tpu.memory_space<vmem>>, vector<1x8x8x128xf32>,
    %c0_20 = arith.constant 0 : index
    %c1 = arith.constant 1 : index
    %c1_21 = arith.constant 1 : index
    %c0_22 = arith.constant 0 : index
    %29 = vector.load %arg11[%c0_20, %c1, %c1_21, %c0_22] : memref<1x10x10x128xf32, #tpu.memory_space<vmem>>, vector<1x8x8x128xf32>
    %30 = vector.shape_cast %29 : vector<1x8x8x128xf32> to vector<8x8x128xf32>
    %31 = vector.shape_cast %25 : vector<8x8x128xf32> to vector<1x8x8x128xf32>
    tpu.vector_store %arg11[%c0_20, %c1, %c1_21, %c0_22], %31 {strides = array<i32>} : memref<1x10x10x128xf32, #tpu.memory_space<vmem>>, vector<1x8x8x128xf32>,
    %cst_23 = arith.constant 0.000000e+00 : f32
    %32 = vector.broadcast %cst_23 : f32 to vector<64x128xf32>
    %c0_24 = arith.constant 0 : index
    %c0_25 = arith.constant 0 : index
    %c0_26 = arith.constant 0 : index
    %c0_27 = arith.constant 0 : index
    %33 = vector.load %arg11[%c0_24, %c0_25, %c0_26, %c0_27] : memref<1x10x10x128xf32, #tpu.memory_space<vmem>>, vector<1x8x8x128xf32>
    %34 = vector.shape_cast %33 : vector<1x8x8x128xf32> to vector<8x8x128xf32>
    %35 = vector.shape_cast %34 : vector<8x8x128xf32> to vector<64x128xf32>
    %36 = arith.truncf %35 : vector<64x128xf32> to vector<64x128xbf16>
    %c0_28 = arith.constant 0 : index
    %c0_29 = arith.constant 0 : index
    %c0_30 = arith.constant 0 : index
    %37 = vector.load %arg7[%c0_28, %c0_29, %c0_30] : memref<9x128x128xbf16, #tpu.memory_space<vmem>>, vector<1x128x128xbf16>
    %38 = vector.shape_cast %37 : vector<1x128x128xbf16> to vector<128x128xbf16>
    %cst_31 = arith.constant dense<0.000000e+00> : vector<64x128xf32>
    %39 = tpu.matmul %36, %38, %cst_31 {dimension_numbers = #tpu.dot_dimension_numbers<[1], [0], [0], [1], [0, 0, 1, 1], [], []>} : vector<64x128xbf16>, vector<128x128xbf16>, vector<64x128xf32> -> vector<64x128xf32>
    %40 = arith.addf %32, %39 : vector<64x128xf32>
    %c0_32 = arith.constant 0 : index
    %c0_33 = arith.constant 0 : index
    %c1_34 = arith.constant 1 : index
    %c0_35 = arith.constant 0 : index
    %41 = vector.load %arg11[%c0_32, %c0_33, %c1_34, %c0_35] : memref<1x10x10x128xf32, #tpu.memory_space<vmem>>, vector<1x8x8x128xf32>
    %42 = vector.shape_cast %41 : vector<1x8x8x128xf32> to vector<8x8x128xf32>
    %43 = vector.shape_cast %42 : vector<8x8x128xf32> to vector<64x128xf32>
    %44 = arith.truncf %43 : vector<64x128xf32> to vector<64x128xbf16>
    %c1_36 = arith.constant 1 : index
    %c0_37 = arith.constant 0 : index
    %c0_38 = arith.constant 0 : index
    %45 = vector.load %arg7[%c1_36, %c0_37, %c0_38] : memref<9x128x128xbf16, #tpu.memory_space<vmem>>, vector<1x128x128xbf16>
    %46 = vector.shape_cast %45 : vector<1x128x128xbf16> to vector<128x128xbf16>
    %cst_39 = arith.constant dense<0.000000e+00> : vector<64x128xf32>
    %47 = tpu.matmul %44, %46, %cst_39 {dimension_numbers = #tpu.dot_dimension_numbers<[1], [0], [0], [1], [0, 0, 1, 1], [], []>} : vector<64x128xbf16>, vector<128x128xbf16>, vector<64x128xf32> -> vector<64x128xf32>
    %48 = arith.addf %40, %47 : vector<64x128xf32>
    %c0_40 = arith.constant 0 : index
    %c0_41 = arith.constant 0 : index
    %c2 = arith.constant 2 : index
    %c0_42 = arith.constant 0 : index
    %49 = vector.load %arg11[%c0_40, %c0_41, %c2, %c0_42] : memref<1x10x10x128xf32, #tpu.memory_space<vmem>>, vector<1x8x8x128xf32>
    %50 = vector.shape_cast %49 : vector<1x8x8x128xf32> to vector<8x8x128xf32>
    %51 = vector.shape_cast %50 : vector<8x8x128xf32> to vector<64x128xf32>
    %52 = arith.truncf %51 : vector<64x128xf32> to vector<64x128xbf16>
    %c2_43 = arith.constant 2 : index
    %c0_44 = arith.constant 0 : index
    %c0_45 = arith.constant 0 : index
    %53 = vector.load %arg7[%c2_43, %c0_44, %c0_45] : memref<9x128x128xbf16, #tpu.memory_space<vmem>>, vector<1x128x128xbf16>
    %54 = vector.shape_cast %53 : vector<1x128x128xbf16> to vector<128x128xbf16>
    %cst_46 = arith.constant dense<0.000000e+00> : vector<64x128xf32>
    %55 = tpu.matmul %52, %54, %cst_46 {dimension_numbers = #tpu.dot_dimension_numbers<[1], [0], [0], [1], [0, 0, 1, 1], [], []>} : vector<64x128xbf16>, vector<128x128xbf16>, vector<64x128xf32> -> vector<64x128xf32>
    %56 = arith.addf %48, %55 : vector<64x128xf32>
    %c0_47 = arith.constant 0 : index
    %c1_48 = arith.constant 1 : index
    %c0_49 = arith.constant 0 : index
    %c0_50 = arith.constant 0 : index
    %57 = vector.load %arg11[%c0_47, %c1_48, %c0_49, %c0_50] : memref<1x10x10x128xf32, #tpu.memory_space<vmem>>, vector<1x8x8x128xf32>
    %58 = vector.shape_cast %57 : vector<1x8x8x128xf32> to vector<8x8x128xf32>
    %59 = vector.shape_cast %58 : vector<8x8x128xf32> to vector<64x128xf32>
    %60 = arith.truncf %59 : vector<64x128xf32> to vector<64x128xbf16>
    %c3 = arith.constant 3 : index
    %c0_51 = arith.constant 0 : index
    %c0_52 = arith.constant 0 : index
    %61 = vector.load %arg7[%c3, %c0_51, %c0_52] : memref<9x128x128xbf16, #tpu.memory_space<vmem>>, vector<1x128x128xbf16>
    %62 = vector.shape_cast %61 : vector<1x128x128xbf16> to vector<128x128xbf16>
    %cst_53 = arith.constant dense<0.000000e+00> : vector<64x128xf32>
    %63 = tpu.matmul %60, %62, %cst_53 {dimension_numbers = #tpu.dot_dimension_numbers<[1], [0], [0], [1], [0, 0, 1, 1], [], []>} : vector<64x128xbf16>, vector<128x128xbf16>, vector<64x128xf32> -> vector<64x128xf32>
    %64 = arith.addf %56, %63 : vector<64x128xf32>
    %c0_54 = arith.constant 0 : index
    %c1_55 = arith.constant 1 : index
    %c1_56 = arith.constant 1 : index
    %c0_57 = arith.constant 0 : index
    %65 = vector.load %arg11[%c0_54, %c1_55, %c1_56, %c0_57] : memref<1x10x10x128xf32, #tpu.memory_space<vmem>>, vector<1x8x8x128xf32>
    %66 = vector.shape_cast %65 : vector<1x8x8x128xf32> to vector<8x8x128xf32>
    %67 = vector.shape_cast %66 : vector<8x8x128xf32> to vector<64x128xf32>
    %68 = arith.truncf %67 : vector<64x128xf32> to vector<64x128xbf16>
    %c4 = arith.constant 4 : index
    %c0_58 = arith.constant 0 : index
    %c0_59 = arith.constant 0 : index
    %69 = vector.load %arg7[%c4, %c0_58, %c0_59] : memref<9x128x128xbf16, #tpu.memory_space<vmem>>, vector<1x128x128xbf16>
    %70 = vector.shape_cast %69 : vector<1x128x128xbf16> to vector<128x128xbf16>
    %cst_60 = arith.constant dense<0.000000e+00> : vector<64x128xf32>
    %71 = tpu.matmul %68, %70, %cst_60 {dimension_numbers = #tpu.dot_dimension_numbers<[1], [0], [0], [1], [0, 0, 1, 1], [], []>} : vector<64x128xbf16>, vector<128x128xbf16>, vector<64x128xf32> -> vector<64x128xf32>
    %72 = arith.addf %64, %71 : vector<64x128xf32>
    %c0_61 = arith.constant 0 : index
    %c1_62 = arith.constant 1 : index
    %c2_63 = arith.constant 2 : index
    %c0_64 = arith.constant 0 : index
    %73 = vector.load %arg11[%c0_61, %c1_62, %c2_63, %c0_64] : memref<1x10x10x128xf32, #tpu.memory_space<vmem>>, vector<1x8x8x128xf32>
    %74 = vector.shape_cast %73 : vector<1x8x8x128xf32> to vector<8x8x128xf32>
    %75 = vector.shape_cast %74 : vector<8x8x128xf32> to vector<64x128xf32>
    %76 = arith.truncf %75 : vector<64x128xf32> to vector<64x128xbf16>
    %c5 = arith.constant 5 : index
    %c0_65 = arith.constant 0 : index
    %c0_66 = arith.constant 0 : index
    %77 = vector.load %arg7[%c5, %c0_65, %c0_66] : memref<9x128x128xbf16, #tpu.memory_space<vmem>>, vector<1x128x128xbf16>
    %78 = vector.shape_cast %77 : vector<1x128x128xbf16> to vector<128x128xbf16>
    %cst_67 = arith.constant dense<0.000000e+00> : vector<64x128xf32>
    %79 = tpu.matmul %76, %78, %cst_67 {dimension_numbers = #tpu.dot_dimension_numbers<[1], [0], [0], [1], [0, 0, 1, 1], [], []>} : vector<64x128xbf16>, vector<128x128xbf16>, vector<64x128xf32> -> vector<64x128xf32>
    %80 = arith.addf %72, %79 : vector<64x128xf32>
    %c0_68 = arith.constant 0 : index
    %c2_69 = arith.constant 2 : index
    %c0_70 = arith.constant 0 : index
    %c0_71 = arith.constant 0 : index
    %81 = vector.load %arg11[%c0_68, %c2_69, %c0_70, %c0_71] : memref<1x10x10x128xf32, #tpu.memory_space<vmem>>, vector<1x8x8x128xf32>
    %82 = vector.shape_cast %81 : vector<1x8x8x128xf32> to vector<8x8x128xf32>
    %83 = vector.shape_cast %82 : vector<8x8x128xf32> to vector<64x128xf32>
    %84 = arith.truncf %83 : vector<64x128xf32> to vector<64x128xbf16>
    %c6 = arith.constant 6 : index
    %c0_72 = arith.constant 0 : index
    %c0_73 = arith.constant 0 : index
    %85 = vector.load %arg7[%c6, %c0_72, %c0_73] : memref<9x128x128xbf16, #tpu.memory_space<vmem>>, vector<1x128x128xbf16>
    %86 = vector.shape_cast %85 : vector<1x128x128xbf16> to vector<128x128xbf16>
    %cst_74 = arith.constant dense<0.000000e+00> : vector<64x128xf32>
    %87 = tpu.matmul %84, %86, %cst_74 {dimension_numbers = #tpu.dot_dimension_numbers<[1], [0], [0], [1], [0, 0, 1, 1], [], []>} : vector<64x128xbf16>, vector<128x128xbf16>, vector<64x128xf32> -> vector<64x128xf32>
    %88 = arith.addf %80, %87 : vector<64x128xf32>
    %c0_75 = arith.constant 0 : index
    %c2_76 = arith.constant 2 : index
    %c1_77 = arith.constant 1 : index
    %c0_78 = arith.constant 0 : index
    %89 = vector.load %arg11[%c0_75, %c2_76, %c1_77, %c0_78] : memref<1x10x10x128xf32, #tpu.memory_space<vmem>>, vector<1x8x8x128xf32>
    %90 = vector.shape_cast %89 : vector<1x8x8x128xf32> to vector<8x8x128xf32>
    %91 = vector.shape_cast %90 : vector<8x8x128xf32> to vector<64x128xf32>
    %92 = arith.truncf %91 : vector<64x128xf32> to vector<64x128xbf16>
    %c7 = arith.constant 7 : index
    %c0_79 = arith.constant 0 : index
    %c0_80 = arith.constant 0 : index
    %93 = vector.load %arg7[%c7, %c0_79, %c0_80] : memref<9x128x128xbf16, #tpu.memory_space<vmem>>, vector<1x128x128xbf16>
    %94 = vector.shape_cast %93 : vector<1x128x128xbf16> to vector<128x128xbf16>
    %cst_81 = arith.constant dense<0.000000e+00> : vector<64x128xf32>
    %95 = tpu.matmul %92, %94, %cst_81 {dimension_numbers = #tpu.dot_dimension_numbers<[1], [0], [0], [1], [0, 0, 1, 1], [], []>} : vector<64x128xbf16>, vector<128x128xbf16>, vector<64x128xf32> -> vector<64x128xf32>
    %96 = arith.addf %88, %95 : vector<64x128xf32>
    %c0_82 = arith.constant 0 : index
    %c2_83 = arith.constant 2 : index
    %c2_84 = arith.constant 2 : index
    %c0_85 = arith.constant 0 : index
    %97 = vector.load %arg11[%c0_82, %c2_83, %c2_84, %c0_85] : memref<1x10x10x128xf32, #tpu.memory_space<vmem>>, vector<1x8x8x128xf32>
    %98 = vector.shape_cast %97 : vector<1x8x8x128xf32> to vector<8x8x128xf32>
    %99 = vector.shape_cast %98 : vector<8x8x128xf32> to vector<64x128xf32>
    %100 = arith.truncf %99 : vector<64x128xf32> to vector<64x128xbf16>
    %c8 = arith.constant 8 : index
    %c0_86 = arith.constant 0 : index
    %c0_87 = arith.constant 0 : index
    %101 = vector.load %arg7[%c8, %c0_86, %c0_87] : memref<9x128x128xbf16, #tpu.memory_space<vmem>>, vector<1x128x128xbf16>
    %102 = vector.shape_cast %101 : vector<1x128x128xbf16> to vector<128x128xbf16>
    %cst_88 = arith.constant dense<0.000000e+00> : vector<64x128xf32>
    %103 = tpu.matmul %100, %102, %cst_88 {dimension_numbers = #tpu.dot_dimension_numbers<[1], [0], [0], [1], [0, 0, 1, 1], [], []>} : vector<64x128xbf16>, vector<128x128xbf16>, vector<64x128xf32> -> vector<64x128xf32>
    %104 = arith.addf %96, %103 : vector<64x128xf32>
    %105 = vector.shape_cast %104 : vector<64x128xf32> to vector<8x8x128xf32>
    %c0_89 = arith.constant 0 : index
    %c0_90 = arith.constant 0 : index
    %c0_91 = arith.constant 0 : index
    %c0_92 = arith.constant 0 : index
    %106 = vector.load %arg9[%c0_89, %c0_90, %c0_91, %c0_92] : memref<1x8x8x128xf32, #tpu.memory_space<vmem>>, vector<1x8x8x128xf32>
    %107 = vector.shape_cast %106 : vector<1x8x8x128xf32> to vector<8x8x128xf32>
    %108 = vector.shape_cast %105 : vector<8x8x128xf32> to vector<1x8x8x128xf32>
    tpu.vector_store %arg9[%c0_89, %c0_90, %c0_91, %c0_92], %108 {strides = array<i32>} : memref<1x8x8x128xf32, #tpu.memory_space<vmem>>, vector<1x8x8x128xf32>,
    %c0_93 = arith.constant 0 : index
    %c0_94 = arith.constant 0 : index
    %109 = vector.load %arg10[%c0_93, %c0_94] : memref<2x128xf32, #tpu.memory_space<vmem>>, vector<1x128xf32>
    %cst_95 = arith.constant dense<0.000000e+00> : vector<128xf32>
    %110 = vector.multi_reduction <add>, %104, %cst_95 [0] : vector<64x128xf32> to vector<128xf32>
    %111 = vector.shape_cast %110 : vector<128xf32> to vector<1x128xf32>
    %112 = arith.addf %109, %111 : vector<1x128xf32>
    %c0_96 = arith.constant 0 : index
    %c0_97 = arith.constant 0 : index
    %113 = vector.load %arg10[%c0_96, %c0_97] : memref<2x128xf32, #tpu.memory_space<vmem>>, vector<1x128xf32>
    tpu.vector_store %arg10[%c0_96, %c0_97], %112 {strides = array<i32>} : memref<2x128xf32, #tpu.memory_space<vmem>>, vector<1x128xf32>,
    %c1_98 = arith.constant 1 : index
    %c0_99 = arith.constant 0 : index
    %114 = vector.load %arg10[%c1_98, %c0_99] : memref<2x128xf32, #tpu.memory_space<vmem>>, vector<1x128xf32>
    %115 = arith.mulf %104, %104 : vector<64x128xf32>
    %cst_100 = arith.constant dense<0.000000e+00> : vector<128xf32>
    %116 = vector.multi_reduction <add>, %115, %cst_100 [0] : vector<64x128xf32> to vector<128xf32>
    %117 = vector.shape_cast %116 : vector<128xf32> to vector<1x128xf32>
    %118 = arith.addf %114, %117 : vector<1x128xf32>
    %c1_101 = arith.constant 1 : index
    %c0_102 = arith.constant 0 : index
    %119 = vector.load %arg10[%c1_101, %c0_102] : memref<2x128xf32, #tpu.memory_space<vmem>>, vector<1x128xf32>
    tpu.vector_store %arg10[%c1_101, %c0_102], %118 {strides = array<i32>} : memref<2x128xf32, #tpu.memory_space<vmem>>, vector<1x128xf32>,
    return
  }
  func.func @transform_0(%arg0: i32) -> (i32, i32, i32, i32) {
    %c0_i32 = arith.constant 0 : i32
    %c0_i32_0 = arith.constant 0 : i32
    %c0_i32_1 = arith.constant 0 : i32
    %c0_i32_2 = arith.constant 0 : i32
    return %arg0, %c0_i32, %c0_i32_0, %c0_i32_1 : i32, i32, i32, i32
  }
  func.func @transform_1(%arg0: i32) -> (i32, i32, i32, i32) {
    %c0_i32 = arith.constant 0 : i32
    %c0_i32_0 = arith.constant 0 : i32
    %c0_i32_1 = arith.constant 0 : i32
    %c0_i32_2 = arith.constant 0 : i32
    return %arg0, %c0_i32, %c0_i32_0, %c0_i32_1 : i32, i32, i32, i32
  }
  func.func @transform_2(%arg0: i32) -> (i32, i32) {
    %c0_i32 = arith.constant 0 : i32
    %c0_i32_0 = arith.constant 0 : i32
    %c0_i32_1 = arith.constant 0 : i32
    return %c0_i32, %c0_i32_0 : i32, i32
  }
  func.func @transform_3(%arg0: i32) -> (i32, i32) {
    %c0_i32 = arith.constant 0 : i32
    %c0_i32_0 = arith.constant 0 : i32
    %c0_i32_1 = arith.constant 0 : i32
    return %c0_i32, %c0_i32_0 : i32, i32
  }
  func.func @transform_4(%arg0: i32) -> (i32, i32) {
    %c0_i32 = arith.constant 0 : i32
    %c0_i32_0 = arith.constant 0 : i32
    %c0_i32_1 = arith.constant 0 : i32
    return %c0_i32, %c0_i32_0 : i32, i32
  }
  func.func @transform_5(%arg0: i32) -> (i32, i32) {
    %c0_i32 = arith.constant 0 : i32
    %c0_i32_0 = arith.constant 0 : i32
    %c0_i32_1 = arith.constant 0 : i32
    return %c0_i32, %c0_i32_0 : i32, i32
  }
  func.func @transform_6(%arg0: i32) -> (i32, i32, i32) {
    %c0_i32 = arith.constant 0 : i32
    %c0_i32_0 = arith.constant 0 : i32
    %c0_i32_1 = arith.constant 0 : i32
    %c0_i32_2 = arith.constant 0 : i32
    return %c0_i32, %c0_i32_0, %c0_i32_1 : i32, i32, i32
  }
  func.func @transform_7(%arg0: i32) -> (i32, i32, i32, i32) {
    %c0_i32 = arith.constant 0 : i32
    %c0_i32_0 = arith.constant 0 : i32
    %c0_i32_1 = arith.constant 0 : i32
    %c0_i32_2 = arith.constant 0 : i32
    return %arg0, %c0_i32, %c0_i32_0, %c0_i32_1 : i32, i32, i32, i32
  }
  func.func @transform_8(%arg0: i32) -> (i32, i32, i32, i32) {
    %c0_i32 = arith.constant 0 : i32
    %c0_i32_0 = arith.constant 0 : i32
    %c0_i32_1 = arith.constant 0 : i32
    %c0_i32_2 = arith.constant 0 : i32
    return %arg0, %c0_i32, %c0_i32_0, %c0_i32_1 : i32, i32, i32, i32
  }
  func.func @transform_9(%arg0: i32) -> (i32, i32) {
    %c0_i32 = arith.constant 0 : i32
    %c0_i32_0 = arith.constant 0 : i32
    %c0_i32_1 = arith.constant 0 : i32
    return %c0_i32, %c0_i32_0 : i32, i32
  }
}

</mosaic_0001>

<bundles_post_ra>
// kernel: residual_part_forward.13
= control target key start
LH: loop header
LB: loop body
LE: loop exit
PB: predicated region body
PF: predicated region fallthrough
CT: control target
= control target key end

     0   :  { %s498_s21 = smov 0   ;;  %s585_s0 = inlined_call_operand.vmem [shape: f32[2,8,8,128], index: 0, kind: input, shape index: {}]   ;;  %s586_s1 = inlined_call_operand.vmem [shape: f32[2,8,8,128], index: 1, kind: input, shape index: {}]   ;;  %s587_s2 = inlined_call_operand.vmem [shape: f32[1,128], index: 2, kind: input, shape index: {}]   ;;  %s588_s3 = inlined_call_operand.vmem [shape: f32[1,128], index: 3, kind: input, shape index: {}]   ;;  %s589_s4 = inlined_call_operand.vmem [shape: f32[1,128], index: 4, kind: input, shape index: {}]   ;;  %s590_s5 = inlined_call_operand.vmem [shape: f32[1,128], index: 5, kind: input, shape index: {}]   ;;  %s591_s6 = inlined_call_operand.vmem [shape: f32[2,8,8,128], index: 6, kind: output, shape index: {}]  }
   0x1 LB: > { %s427_s22 = sadd.s32 4294967295, %s461_s21   ;;  %p431_p0 = scmp.ge.s32.totalorder %s461_s21, 1  ;;  %s461_s21 = sphi %s498_s21, %s16_s21  }
   0x2   : > { %p222_p1 = scmp.lt.s32.totalorder %s461_s21, 3 }
   0x4   : > { %p223_p2 = pnand %p431_p0, %p222_p1 }
   0x5   : > { %p257_p3 = scmp.lt.s32.totalorder (!%p223_p2), %s427_s22, 1 }
   0x6   : > { %226 = sbr.rel (%p223_p2) target bundleno = 34 (0x22), region = 44 }
   0xb   : > { %s593_s22 = smov (!%p257_p3, %s427_s22), 1  ;;  %v451_v0 = vld [vmem:[%s587_s2] ss:$0 sm:$0xff] }
   0xc   : > { %v453_v1 = vld [vmem:[%s589_s4] ss:$0 sm:$0xff]  ;;  %s512_s27 = sshll.u32 %s593_s22, 6 }
   0xd   : > { %s518_s30 = scalar_lea.vmem %s585_s0, %s512_s27  ;;  %s524_s9 = scalar_lea.vmem %s586_s1, %s512_s27  ;;  %v529_v2 = vld [vmem:[%s588_s3] ss:$0 sm:$0xff] }
   0xe   : > { %v534_v3 = vld [vmem:[%s590_s5] ss:$0 sm:$0xff]  ;;  %v273_v6 = vld [vmem:[%s518_s30 + $0x8] sm:$0xff]  ;;  %v274_v11 = vld [vmem:[%s518_s30 + $0x10] sm:$0xff]  ;;  %s559_s16 = scalar_lea.vmem %s591_s6, %s512_s27 }
   0xf   : > { %v272_v4 = vld [vmem:[%s518_s30] sm:$0xff]  ;;  %v285_v9 = vmul.f32 %v451_v0, %v273_v6  ;;  %v305_v10 = vld [vmem:[%s524_s9 + $0x8] sm:$0xff]  ;;  %v306_v12 = vld [vmem:[%s524_s9 + $0x10] sm:$0xff]  ;;  %v286_v14 = vmul.f32 %v451_v0, %v274_v11 }
  0x10   : > { %v304_v5 = vld [vmem:[%s524_s9] sm:$0xff]  ;;  %v284_v7 = vmul.f32 %v451_v0, %v272_v4  ;;  %v317_v13 = vmul.f32 %v453_v1, %v305_v10  ;;  %v318_v15 = vmul.f32 %v453_v1, %v306_v12  ;;  %v275_v16 = vld [vmem:[%s518_s30 + $0x18] sm:$0xff]  ;;  %v277_v24 = vld [vmem:[%s518_s30 + $0x28] sm:$0xff] }
  0x11   : > { %v316_v8 = vmul.f32 %v453_v1, %v304_v5  ;;  %v307_v17 = vld [vmem:[%s524_s9 + $0x18] sm:$0xff]  ;;  %v276_v18 = vld [vmem:[%s518_s30 + $0x20] sm:$0xff]  ;;  %v297_v21 = vadd.f32 %v529_v2, %v285_v9  ;;  %v287_v22 = vmul.f32 %v451_v0, %v275_v16  ;;  %v298_v26 = vadd.f32 %v529_v2, %v286_v14  ;;  %v309_v29 = vld [vmem:[%s524_s9 + $0x28] sm:$0xff] }
  0x12   : > { %v296_v19 = vadd.f32 %v529_v2, %v284_v7  ;;  %v308_v23 = vld [vmem:[%s524_s9 + $0x20] sm:$0xff]  ;;  %v329_v25 = vadd.f32 %v534_v3, %v317_v13  ;;  %v330_v27 = vadd.f32 %v534_v3, %v318_v15  ;;  %v319_v28 = vmul.f32 %v453_v1, %v307_v17  ;;  %v278_v38 = vld [vmem:[%s518_s30 + $0x30] sm:$0xff]  ;;  %v279_v44 = vld [vmem:[%s518_s30 + $0x38] sm:$0xff] }
  0x13   : > { %v328_v20 = vadd.f32 %v534_v3, %v316_v8  ;;  %v299_v31 = vadd.f32 %v529_v2, %v287_v22  ;;  %v288_v32 = vmul.f32 %v451_v0, %v276_v18  ;;  %v320_v33 = vmul.f32 %v453_v1, %v308_v23  ;;  %v310_v39 = vld [vmem:[%s524_s9 + $0x30] sm:$0xff]  ;;  %v311_v45 = vld [vmem:[%s524_s9 + $0x38] sm:$0xff] }
  0x14   : > { %v337_v34 = vadd.f32 %v329_v25, %v297_v21  ;;  %v338_v35 = vadd.f32 %v330_v27, %v298_v26  ;;  %v331_v36 = vadd.f32 %v534_v3, %v319_v28  ;;  %v289_v37 = vmul.f32 %v451_v0, %v277_v24 }
  0x15   : > { %v336_v30 = vadd.f32 %v328_v20, %v296_v19  ;;  %v300_v41 = vadd.f32 %v529_v2, %v288_v32  ;;  %v332_v42 = vadd.f32 %v534_v3, %v320_v33  ;;  %v321_v43 = vmul.f32 %v453_v1, %v309_v29 }
  0x16   : > { %v345_v46 = vmax.f32 %v337_v34, 0.0  ;;  %v346_v47 = vmax.f32 %v338_v35, 0.0  ;;  %v339_v48 = vadd.f32 %v331_v36, %v299_v31  ;;  %v301_v49 = vadd.f32 %v529_v2, %v289_v37 }
  0x17   : > { %v344_v40 = vmax.f32 %v336_v30, 0.0  ;;  %v340_v50 = vadd.f32 %v332_v42, %v300_v41  ;;  %v333_v51 = vadd.f32 %v534_v3, %v321_v43  ;;  %v290_v52 = vmul.f32 %v451_v0, %v278_v38 }
  0x18   : > { %v322_v53 = vmul.f32 %v453_v1, %v310_v39  ;;  %353 = vst [vmem:[%s559_s16 + $0x8] sm:$0xff] %v345_v46  ;;  %v347_v54 = vmax.f32 %v339_v48, 0.0  ;;  %v291_v55 = vmul.f32 %v451_v0, %v279_v44  ;;  %v323_v56 = vmul.f32 %v453_v1, %v311_v45 }
  0x19   : > { %352 = vst [vmem:[%s559_s16] sm:$0xff] %v344_v40  ;;  %v348_v57 = vmax.f32 %v340_v50, 0.0  ;;  %v341_v58 = vadd.f32 %v333_v51, %v301_v49  ;;  %v302_v59 = vadd.f32 %v529_v2, %v290_v52 }
  0x1a   : > { %354 = vst [vmem:[%s559_s16 + $0x10] sm:$0xff] %v346_v47  ;;  %v334_v60 = vadd.f32 %v534_v3, %v322_v53  ;;  %v303_v61 = vadd.f32 %v529_v2, %v291_v55  ;;  %v335_v62 = vadd.f32 %v534_v3, %v323_v56 }
  0x1b   : > { %355 = vst [vmem:[%s559_s16 + $0x18] sm:$0xff] %v347_v54  ;;  %v349_v63 = vmax.f32 %v341_v58, 0.0 }
  0x1c   : > { %356 = vst [vmem:[%s559_s16 + $0x20] sm:$0xff] %v348_v57  ;;  %v342_v4 = vadd.f32 %v334_v60, %v302_v59  ;;  %v343_v5 = vadd.f32 %v335_v62, %v303_v61 }
  0x1d   : > { %357 = vst [vmem:[%s559_s16 + $0x28] sm:$0xff] %v349_v63 }
  0x1e   : > { %v350_v0 = vmax.f32 %v342_v4, 0.0  ;;  %v351_v1 = vmax.f32 %v343_v5, 0.0 }
  0x20   : > { %358 = vst [vmem:[%s559_s16 + $0x30] sm:$0xff] %v350_v0 }
  0x21   : > { %359 = vst [vmem:[%s559_s16 + $0x38] sm:$0xff] %v351_v1 }
  0x22 PF: > { %s16_s21 = sadd.s32 1, %s461_s21  }
  0x23   : > { %p13_p4 = scmp.ge.s32.totalorder %s16_s21, 4  }
  0x25   :  { %15 = sbr.rel (!%p13_p4) target bundleno = 1 (0x1), region = 77 }

// kernel: residual_part_forward.8
= control target key start
LH: loop header
LB: loop body
LE: loop exit
PB: predicated region body
PF: predicated region fallthrough
CT: control target
= control target key end

     0   :  { %s1984_s18 = smov 0   ;;  %s2425_s0 = inlined_call_operand.vmem [shape: f32[2,8,8,128], index: 0, kind: input, shape index: {}]   ;;  %s2426_s1 = inlined_call_operand.vmem [shape: f32[1,128], index: 1, kind: input, shape index: {}]   ;;  %s2427_s2 = inlined_call_operand.vmem [shape: f32[1,128], index: 2, kind: input, shape index: {}]   ;;  %s2428_s3 = inlined_call_operand.vmem [shape: bf16[9,128,128], index: 3, kind: input, shape index: {}]   ;;  %s2429_s4 = inlined_call_operand.vmem [shape: f32[2,8,8,128], index: 4, kind: output, shape index: {0}]   ;;  %s2430_s5 = inlined_call_operand.vmem [shape: f32[2,128], index: 5, kind: output, shape index: {1}]  }
   0x1 LB: > { %s1416_s19 = sadd.s32 4294967295, %s1951_s18   ;;  %p1420_p0 = scmp.ge.s32.totalorder %s1951_s18, 1  ;;  %s1951_s18 = sphi %s1984_s18, %s16_s18  }
   0x2   : > { %p185_p1 = scmp.lt.s32.totalorder %s1951_s18, 3 }
   0x4   : > { %p186_p2 = pnand %p1420_p0, %p185_p1 }
   0x5   : > { %p213_p3 = scmp.lt.s32.totalorder (!%p186_p2), %s1416_s19, 1  ;;  %p1425_p4 = scmp.ne.s32.totalorder (!%p186_p2), %s1416_s19, 0 }
   0x6   : > { %189 = sbr.rel (%p186_p2) target bundleno = 376 (0x178), region = 36 }
   0xb   : > { %s214_s20 = scalar_select %p213_p3, %s1416_s19, 1 }
   0xc   : > { %226 = sbr.rel (%p1425_p4) target bundleno = 39 (0x27), region = 40 }
   0xd   : > { %s1844_s21 = sshll.u32 %s214_s20, 6 }
   0xe   : > { %s1995_s24 = scalar_lea.vmem %s2425_s0, %s1844_s21  ;;  %s2000_s27 = scalar_lea.vmem %s2429_s4, %s1844_s21 }
  0x11   : > { %v1953_v0 = vmov 0.0  }
  0x12   : > { %227 = vst [vmem:[%s2430_s5] sm:$0x3] %v1953_v0 }
  0x13   : > { %228 = vst [vmem:[#allocation2] sm:$0xff] %v1953_v0 }
  0x14   : > { %229 = vst [vmem:[#allocation2 + $0x8] sm:$0x3] %v1953_v0 }
  0x15   : > { %230 = vst [vmem:[#allocation2 + $0x10] sm:$0xff] %v1953_v0 }
  0x16   : > { %231 = vst [vmem:[#allocation2 + $0x18] sm:$0x3] %v1953_v0 }
  0x17   : > { %232 = vst [vmem:[#allocation2 + $0x20] sm:$0xff] %v1953_v0 }
  0x18   : > { %233 = vst [vmem:[#allocation2 + $0x28] sm:$0x3] %v1953_v0 }
  0x19   : > { %234 = vst [vmem:[#allocation2 + $0x30] sm:$0xff] %v1953_v0 }
  0x1a   : > { %235 = vst [vmem:[#allocation2 + $0x38] sm:$0x3] %v1953_v0 }
  0x1b   : > { %236 = vst [vmem:[#allocation2 + $0x40] sm:$0xff] %v1953_v0 }
  0x1c   : > { %237 = vst [vmem:[#allocation2 + $0x48] sm:$0x3] %v1953_v0 }
  0x1d   : > { %238 = vst [vmem:[#allocation2 + $0x50] sm:$0xff] %v1953_v0 }
  0x1e   : > { %239 = vst [vmem:[#allocation2 + $0x58] sm:$0x3] %v1953_v0 }
  0x1f   : > { %240 = vst [vmem:[#allocation2 + $0x60] sm:$0xff] %v1953_v0 }
  0x20   : > { %241 = vst [vmem:[#allocation2 + $0x68] sm:$0x3] %v1953_v0 }
  0x21   : > { %242 = vst [vmem:[#allocation2 + $0x70] sm:$0xff] %v1953_v0 }
  0x22   : > { %243 = vst [vmem:[#allocation2 + $0x78] sm:$0x3] %v1953_v0 }
  0x23   : > { %244 = vst [vmem:[#allocation2 + $0x80] sm:$0xff] %v1953_v0 }
  0x24   : > { %245 = vst [vmem:[#allocation2 + $0x88] sm:$0x3] %v1953_v0 }
  0x25   : > { %246 = vst [vmem:[#allocation2 + $0x90] sm:$0xff] %v1953_v0 }
  0x26   : > { %247 = vst [vmem:[#allocation2 + $0x98] sm:$0x3] %v1953_v0 }
  0x27 PF: > { %v1861_v1 = vld [vmem:[%s2428_s3 + $0x78] sm:$0xff]  ;;  %v1860_v3 = vld [vmem:[%s2428_s3 + $0x70] sm:$0xff]  ;;  %v1859_v6 = vld [vmem:[%s2428_s3 + $0x68] sm:$0xff] }
  0x28   : > { %v1869_v2 = vld [vmem:[%s2428_s3 + $0xb8] sm:$0xff]  ;;  %1918 = vmatpush.bf16.msra.mxu1 %v1861_v1  ;;  %402 = vmatpush.bf16.msra.mxu0 %v1861_v1  ;;  %v1868_v4 = vld [vmem:[%s2428_s3 + $0xb0] sm:$0xff]  ;;  %v252_v9 = vld [vmem:[%s1995_s24 + $0x20] sm:$0xff] }
  0x29   : > { %585 = vmatpush.bf16.msra.mxu2 %v1869_v2  ;;  %v1877_v5 = vld [vmem:[%s2428_s3 + $0xf8] sm:$0xff]  ;;  %v1876_v7 = vld [vmem:[%s2428_s3 + $0xf0] sm:$0xff]  ;;  %v2031_v10 = vld [vmem:[%s2426_s1] ss:$0 sm:$0xff] }
  0x2a   : > { %699 = vmatpush.bf16.msra.mxu3 %v1877_v5  ;;  %v251_v8 = vld [vmem:[%s1995_s24 + $0x18] sm:$0xff]  ;;  %v1867_v11 = vld [vmem:[%s2428_s3 + $0xa8] sm:$0xff]  ;;  %v2039_v12 = vld [vmem:[%s2427_s2] ss:$0 sm:$0xff]  ;;  %v264_v14 = vmul.f32 %v2031_v10, %v252_v9 }
  0x2b   : > { %v263_v13 = vmul.f32 %v2031_v10, %v251_v8  ;;  %v1875_v15 = vld [vmem:[%s2428_s3 + $0xe8] sm:$0xff]  ;;  %v248_v16 = vld [vmem:[%s1995_s24] sm:$0xff]  ;;  %v254_v27 = vld [vmem:[%s1995_s24 + $0x30] sm:$0xff] }
  0x2c   : > { %1919 = vmatpush.bf16.msra.mxu1 %v1860_v3  ;;  %403 = vmatpush.bf16.msra.mxu0 %v1860_v3  ;;  %v1858_v17 = vld [vmem:[%s2428_s3 + $0x60] sm:$0xff]  ;;  %v276_v19 = vadd.f32 %v2039_v12, %v264_v14  ;;  %v260_v20 = vmul.f32 %v2031_v10, %v248_v16  ;;  %v253_v26 = vld [vmem:[%s1995_s24 + $0x28] sm:$0xff]  ;;  %v1857_v29 = vld [vmem:[%s2428_s3 + $0x58] sm:$0xff]  ;;  %v266_v34 = vmul.f32 %v2031_v10, %v254_v27 }
  0x2d   : > { %586 = vmatpush.bf16.msra.mxu2 %v1868_v4  ;;  %v275_v18 = vadd.f32 %v2039_v12, %v263_v13  ;;  %v1866_v21 = vld [vmem:[%s2428_s3 + $0xa0] sm:$0xff]  ;;  %v249_v28 = vld [vmem:[%s1995_s24 + $0x8] sm:$0xff]  ;;  %v265_v31 = vmul.f32 %v2031_v10, %v253_v26  ;;  %v250_v32 = vld [vmem:[%s1995_s24 + $0x10] sm:$0xff] }
  0x2e   : > { %700 = vmatpush.bf16.msra.mxu3 %v1876_v7  ;;  %v1874_v23 = vld [vmem:[%s2428_s3 + $0xe0] sm:$0xff]  ;;  %v272_v24 = vadd.f32 %v2039_v12, %v260_v20  ;;  %v2062_v25 = vmax.f32 %v276_v19, 0.0  ;;  %v1865_v33 = vld [vmem:[%s2428_s3 + $0x98] sm:$0xff]  ;;  %v261_v35 = vmul.f32 %v2031_v10, %v249_v28  ;;  %v262_v36 = vmul.f32 %v2031_v10, %v250_v32  ;;  %v1856_v42 = vld [vmem:[%s2428_s3 + $0x50] sm:$0xff] }
  0x2f   : > { %v2056_v22 = vmax.f32 %v275_v18, 0.0  ;;  %v277_v37 = vadd.f32 %v2039_v12, %v265_v31  ;;  %v1873_v38 = vld [vmem:[%s2428_s3 + $0xd8] sm:$0xff]  ;;  %v278_v39 = vadd.f32 %v2039_v12, %v266_v34  ;;  %v1864_v44 = vld [vmem:[%s2428_s3 + $0x90] sm:$0xff]  ;;  %v1855_v49 = vld [vmem:[%s2428_s3 + $0x48] sm:$0xff] }
  0x30   : > { %1920 = vmatpush.bf16.msra.mxu1 %v1859_v6  ;;  %404 = vmatpush.bf16.msra.mxu0 %v1859_v6  ;;  %v2071_v30 = vmax.f32 %v272_v24, 0.0  ;;  %293 = vst [vmem:[#allocation2 + $0x51] sm:$0xff] %v2062_v25  ;;  %v273_v40 = vadd.f32 %v2039_v12, %v261_v35  ;;  %v274_v41 = vadd.f32 %v2039_v12, %v262_v36  ;;  %v1872_v48 = vld [vmem:[%s2428_s3 + $0xd0] sm:$0xff]  ;;  %v1863_v50 = vld [vmem:[%s2428_s3 + $0x88] sm:$0xff]  ;;  %v1854_v52 = vld [vmem:[%s2428_s3 + $0x40] sm:$0xff] }
  0x31   : > { %587 = vmatpush.bf16.msra.mxu2 %v1867_v11  ;;  %292 = vst [vmem:[#allocation2 + $0x41] sm:$0xff] %v2056_v22  ;;  %v2093_v43 = vmax.f32 %v277_v37, 0.0  ;;  %v2098_v45 = vmax.f32 %v278_v39, 0.0  ;;  %v1871_v51 = vld [vmem:[%s2428_s3 + $0xc8] sm:$0xff]  ;;  %v1853_v53 = vld [vmem:[%s2428_s3 + $0x38] sm:$0xff]  ;;  %v1862_v55 = vld [vmem:[%s2428_s3 + $0x80] sm:$0xff]  ;;  %v2139_v60 = vpack.c.bf16 %v2062_v25, %v2056_v22 }
  0x32   : > { %701 = vmatpush.bf16.msra.mxu3 %v1875_v15  ;;  %289 = vst [vmem:[#allocation2 + $0x11] sm:$0xff] %v2071_v30  ;;  %v2100_v46 = vmax.f32 %v273_v40, 0.0  ;;  %v2102_v47 = vmax.f32 %v274_v41, 0.0  ;;  %v325_v54 = vld [vmem:[#allocation2 + $0x1] sm:$0xff]  ;;  %v1885_v58 = vld [vmem:[%s2428_s3 + $0x138] sm:$0xff]  ;;  %v1852_v2 = vld [vmem:[%s2428_s3 + $0x30] sm:$0xff] }
  0x33   : > { %294 = vst [vmem:[#allocation2 + $0x61] sm:$0xff] %v2093_v43  ;;  %v508_v56 = vld [vmem:[#allocation2 + $0x2] sm:$0xff]  ;;  %v1901_v59 = vld [vmem:[%s2428_s3 + $0x1b8] sm:$0xff]  ;;  %v333_v61 = vpack.c.bf16 %v2071_v30, %v325_v54  ;;  %v1884_v4 = vld [vmem:[%s2428_s3 + $0x130] sm:$0xff] }
  0x34   : > { %1921 = vmatpush.bf16.msra.mxu1 %v1858_v17  ;;  %405 = vmatpush.bf16.msra.mxu0 %v1858_v17  ;;  %295 = vst [vmem:[#allocation2 + $0x71] sm:$0xff] %v2098_v45  ;;  %v1870_v63 = vld [vmem:[%s2428_s3 + $0xc0] sm:$0xff]  ;;  %v1909_v3 = vld [vmem:[%s2428_s3 + $0x1f8] sm:$0xff]  ;;  %v1900_v5 = vld [vmem:[%s2428_s3 + $0x1b0] sm:$0xff]  ;;  %v744_v54 = vpack.c.bf16 %v2100_v46, %v2071_v30 }
  0x35   : > { %588 = vmatpush.bf16.msra.mxu2 %v1866_v21  ;;  %290 = vst [vmem:[#allocation2 + $0x21] sm:$0xff] %v2100_v46  ;;  %v1851_v7 = vld [vmem:[%s2428_s3 + $0x28] sm:$0xff]  ;;  %v1908_v8 = vld [vmem:[%s2428_s3 + $0x1f0] sm:$0xff]  ;;  %v1850_v13 = vld [vmem:[%s2428_s3 + $0x20] sm:$0xff]  ;;  %v2201_v21 = vpack.c.bf16 %v2098_v45, %v2093_v43 }
  0x36   : > { %702 = vmatpush.bf16.msra.mxu3 %v1874_v23  ;;  %291 = vst [vmem:[#allocation2 + $0x31] sm:$0xff] %v2102_v47  ;;  %v1883_v9 = vld [vmem:[%s2428_s3 + $0x128] sm:$0xff]  ;;  %v1882_v15 = vld [vmem:[%s2428_s3 + $0x120] sm:$0xff]  ;;  %v1849_v17 = vld [vmem:[%s2428_s3 + $0x18] sm:$0xff]  ;;  %v2205_v23 = vpack.c.bf16 %v2102_v47, %v2100_v46 }
  0x37   : > { %v1899_v11 = vld [vmem:[%s2428_s3 + $0x1a8] sm:$0xff]  ;;  %v1898_v16 = vld [vmem:[%s2428_s3 + $0x1a0] sm:$0xff]  ;;  %v1881_v20 = vld [vmem:[%s2428_s3 + $0x118] sm:$0xff] }
  0x38   : > { %1922 = vmatpush.bf16.msra.mxu1 %v1857_v29  ;;  %406 = vmatpush.bf16.msra.mxu0 %v1857_v29  ;;  %v1907_v14 = vld [vmem:[%s2428_s3 + $0x1e8] sm:$0xff]  ;;  %v2213_v27 = vld [vmem:[#allocation2 + $0x40] sm:$0xff]  ;;  %v1848_v28 = vld [vmem:[%s2428_s3 + $0x10] sm:$0xff] }
  0x39   : > { %589 = vmatpush.bf16.msra.mxu2 %v1865_v33  ;;  %v2129_v57 = vld [vmem:[#allocation2 + $0x12] sm:$0xff]  ;;  %v1906_v33 = vld [vmem:[%s2428_s3 + $0x1e0] sm:$0xff]  ;;  %v1847_v34 = vld [vmem:[%s2428_s3 + $0x8] sm:$0xff] }
  0x3a   : > { %703 = vmatpush.bf16.msra.mxu3 %v1873_v38  ;;  %v516_v62 = vpack.c.bf16 %v2129_v57, %v508_v56  ;;  %v2146_v0 = vld [vmem:[#allocation2 + $0x10] sm:$0xff]  ;;  %v1897_v32 = vld [vmem:[%s2428_s3 + $0x198] sm:$0xff]  ;;  %v1879_v35 = vld [vmem:[%s2428_s3 + $0x108] sm:$0xff] }
  0x3b   : > { %v1880_v29 = vld [vmem:[%s2428_s3 + $0x110] sm:$0xff]  ;;  %v1905_v37 = vld [vmem:[%s2428_s3 + $0x1d8] sm:$0xff]  ;;  %v1846_v39 = vld [vmem:[%s2428_s3] sm:$0xff] }
  0x3c   : > { %1923 = vmatpush.bf16.msra.mxu1 %v1856_v42  ;;  %407 = vmatpush.bf16.msra.mxu0 %v1856_v42  ;;  %v2148_v1 = vld [vmem:[#allocation2 + $0x20] sm:$0xff]  ;;  %v1896_v36 = vld [vmem:[%s2428_s3 + $0x190] sm:$0xff]  ;;  %v255_v38 = vld [vmem:[%s1995_s24 + $0x38] sm:$0xff] }
  0x3d   : > { %590 = vmatpush.bf16.msra.mxu2 %v1864_v44  ;;  %v630_v6 = vpack.c.bf16 %v2148_v1, %v2146_v0  ;;  %v2192_v18 = vld [vmem:[#allocation2 + $0x22] sm:$0xff]  ;;  %v2194_v19 = vld [vmem:[#allocation2 + $0x32] sm:$0xff]  ;;  %v267_v40 = vmul.f32 %v2031_v10, %v255_v38 }
  0x3e   : > { %704 = vmatpush.bf16.msra.mxu3 %v1872_v48  ;;  %v2209_v24 = vpack.c.bf16 %v2194_v19, %v2192_v18  ;;  %v2211_v26 = vld [vmem:[#allocation2 + $0x30] sm:$0xff]  ;;  %v1893_v41 = vld [vmem:[%s2428_s3 + $0x178] sm:$0xff]  ;;  %v1878_v42 = vld [vmem:[%s2428_s3 + $0x100] sm:$0xff] }
  0x3f   : > { %v631_v31 = vpack.c.bf16 %v2213_v27, %v2211_v26  ;;  %v1917_v44 = vld [vmem:[%s2428_s3 + $0x238] sm:$0xff]  ;;  %v279_v48 = vadd.f32 %v2039_v12, %v267_v40  ;;  %v2276_v56 = vld [vmem:[#allocation2 + $0x60] sm:$0xff]  ;;  %v1895_v30 = vld [vmem:[%s2428_s3 + $0x188] sm:$0xff] }
  0x40   : > { %1924 = vmatpush.bf16.msra.mxu1 %v1855_v49  ;;  %408 = vmatpush.bf16.msra.mxu0 %v1855_v49  ;;  %v297_v49 = vld [vmem:[#allocation2] sm:$0xff]  ;;  %v2261_v10 = vld [vmem:[#allocation2 + $0x52] sm:$0xff] }
  0x41   : > { %591 = vmatpush.bf16.msra.mxu2 %v1863_v50  ;;  %v2259_v50 = vld [vmem:[#allocation2 + $0x42] sm:$0xff] }
  0x42   : > { %705 = vmatpush.bf16.msra.mxu3 %v1871_v51  ;;  %v2263_v51 = vmax.f32 %v279_v48, 0.0  ;;  %v2274_v12 = vpack.c.bf16 %v2261_v10, %v2259_v50 }
  0x44   : > { %1925 = vmatpush.bf16.msra.mxu1 %v1854_v52  ;;  %409 = vmatpush.bf16.msra.mxu0 %v1854_v52  ;;  %v1892_v52 = vld [vmem:[%s2428_s3 + $0x170] sm:$0xff]  ;;  %296 = vst [vmem:[#allocation2 + $0x81] sm:$0xff] %v2263_v51 }
  0x45   : > { %592 = vmatpush.bf16.msra.mxu2 %v1862_v55  ;;  %v626_v55 = vld [vmem:[#allocation2 + $0x50] sm:$0xff] }
  0x46   : > { %706 = vmatpush.bf16.msra.mxu3 %v1870_v63  ;;  %v632_v46 = vpack.c.bf16 %v2276_v56, %v626_v55  ;;  %v1904_v63 = vld [vmem:[%s2428_s3 + $0x1d0] sm:$0xff] }
  0x47   : > { %420 = vmatmul.bf16.vlgmr.msra.gmra.mxu1 %v2139_v60  ;;  %410 = vmatmul.bf16.vlgmr.msra.gmra.mxu0 %v333_v61  ;;  %v746_v61 = vpack.c.bf16 %v2093_v43, %v2062_v25  ;;  %v1890_v25 = vld [vmem:[%s2428_s3 + $0x160] sm:$0xff]  ;;  %v1903_v43 = vld [vmem:[%s2428_s3 + $0x1c8] sm:$0xff] }
  0x48   : > { %479 = vmatpush.bf16.msrb.mxu1 %v1853_v53  ;;  %813 = vmatpush.bf16.msrb.mxu0 %v1885_v58  ;;  %v305_v53 = vpack.c.bf16 %v2146_v0, %v297_v49  ;;  %v1916_v58 = vld [vmem:[%s2428_s3 + $0x230] sm:$0xff]  ;;  %v1894_v0 = vld [vmem:[%s2428_s3 + $0x180] sm:$0xff] }
  0x49   : > { %1042 = vmatpush.bf16.msrb.mxu2 %v1901_v59  ;;  %707 = vmatmul.bf16.vlgmr.msra.gmra.mxu3 %v630_v6  ;;  %v1891_v59 = vld [vmem:[%s2428_s3 + $0x168] sm:$0xff]  ;;  %v1888_v6 = vld [vmem:[%s2428_s3 + $0x150] sm:$0xff] }
  0x4a   : > { %593 = vmatmul.bf16.vlgmr.msra.gmra.mxu2 %v516_v62  ;;  %1156 = vmatpush.bf16.msrb.mxu3 %v1909_v3  ;;  %v1915_v62 = vld [vmem:[%s2428_s3 + $0x228] sm:$0xff]  ;;  %v1889_v3 = vld [vmem:[%s2428_s3 + $0x158] sm:$0xff] }
  0x4c   : > { %480 = vmatpush.bf16.msrb.mxu1 %v1852_v2  ;;  %814 = vmatpush.bf16.msrb.mxu0 %v1884_v4  ;;  %v1914_v2 = vld [vmem:[%s2428_s3 + $0x220] sm:$0xff] }
  0x4d   : > { %1043 = vmatpush.bf16.msrb.mxu2 %v1900_v5  ;;  %v2312_v4 = vld [vmem:[#allocation2 + $0x62] sm:$0xff]  ;;  %v2314_v5 = vld [vmem:[#allocation2 + $0x72] sm:$0xff] }
  0x4e   : > { %1157 = vmatpush.bf16.msrb.mxu3 %v1908_v8  ;;  %v745_v8 = vpack.c.bf16 %v2056_v22, %v2102_v47  ;;  %v1902_v22 = vld [vmem:[%s2428_s3 + $0x1c0] sm:$0xff]  ;;  %v858_v47 = vpack.c.bf16 %v2192_v18, %v2129_v57  ;;  %v307_v57 = vpack.c.bf16 %v626_v55, %v2213_v27  ;;  %v972_v27 = vld [vmem:[#allocation2 + $0x90] sm:$0xff] }
  0x4f   : > { %v1910_v18 = vld [vmem:[%s2428_s3 + $0x200] sm:$0xff] }
  0x50   : > { %481 = vmatpush.bf16.msrb.mxu1 %v1851_v7  ;;  %815 = vmatpush.bf16.msrb.mxu0 %v1883_v9  ;;  %v306_v7 = vpack.c.bf16 %v2211_v26, %v2148_v1  ;;  %v519_v9 = vpack.c.bf16 %v2314_v5, %v2312_v4  ;;  %v1913_v1 = vld [vmem:[%s2428_s3 + $0x218] sm:$0xff] }
  0x51   : > { %1044 = vmatpush.bf16.msrb.mxu2 %v1899_v11  ;;  %v628_v11 = vld [vmem:[#allocation2 + $0x70] sm:$0xff] }
  0x52   : > { %1158 = vmatpush.bf16.msrb.mxu3 %v1907_v14  ;;  %v308_v26 = vpack.c.bf16 %v628_v11, %v2276_v56 }
  0x54   : > { %482 = vmatpush.bf16.msrb.mxu1 %v1850_v13  ;;  %816 = vmatpush.bf16.msrb.mxu0 %v1882_v15  ;;  %v629_v13 = vld [vmem:[#allocation2 + $0x80] sm:$0xff]  ;;  %v1887_v15 = vld [vmem:[%s2428_s3 + $0x148] sm:$0xff] }
  0x55   : > { %1045 = vmatpush.bf16.msrb.mxu2 %v1898_v16  ;;  %v633_v14 = vpack.c.bf16 %v629_v13, %v628_v11  ;;  %v1912_v16 = vld [vmem:[%s2428_s3 + $0x210] sm:$0xff] }
  0x56   : > { %1159 = vmatpush.bf16.msrb.mxu3 %v1906_v33 }
  0x57   : > { %425 = vmatmul.bf16.gmra.mxu1 %v2201_v21  ;;  %415 = vmatmul.bf16.gmra.mxu0 %v2205_v23 }
  0x58   : > { %483 = vmatpush.bf16.msrb.mxu1 %v1849_v17  ;;  %817 = vmatpush.bf16.msrb.mxu0 %v1881_v20  ;;  %v1886_v17 = vld [vmem:[%s2428_s3 + $0x140] sm:$0xff]  ;;  %v1911_v20 = vld [vmem:[%s2428_s3 + $0x208] sm:$0xff] }
  0x59   : > { %1046 = vmatpush.bf16.msrb.mxu2 %v1897_v32  ;;  %712 = vmatmul.bf16.gmra.mxu3 %v631_v31  ;;  %v1086_v31 = vld [vmem:[#allocation2 + $0x91] sm:$0xff] }
  0x5a   : > { %598 = vmatmul.bf16.gmra.mxu2 %v2209_v24  ;;  %1160 = vmatpush.bf16.msrb.mxu3 %v1905_v37  ;;  %v1200_v32 = vld [vmem:[#allocation2 + $0x92] sm:$0xff] }
  0x5c   : > { %484 = vmatpush.bf16.msrb.mxu1 %v1848_v28  ;;  %818 = vmatpush.bf16.msrb.mxu0 %v1880_v29  ;;  %v747_v28 = vpack.c.bf16 %v2263_v51, %v2098_v45  ;;  %v976_v29 = vpack.c.bf16 %v972_v27, %v629_v13  ;;  %v1090_v45 = vpack.c.bf16 %v1086_v31, %v2263_v51 }
  0x5d   : > { %1047 = vmatpush.bf16.msrb.mxu2 %v1896_v36 }
  0x5e   : > { %1161 = vmatpush.bf16.msrb.mxu3 %v1904_v63 }
  0x60   : > { %485 = vmatpush.bf16.msrb.mxu1 %v1847_v34  ;;  %819 = vmatpush.bf16.msrb.mxu0 %v1879_v35 }
  0x61   : > { %1048 = vmatpush.bf16.msrb.mxu2 %v1895_v30 }
  0x62   : > { %1162 = vmatpush.bf16.msrb.mxu3 %v1903_v43 }
  0x64   : > { %486 = vmatpush.bf16.msrb.mxu1 %v1846_v39  ;;  %820 = vmatpush.bf16.msrb.mxu0 %v1878_v42 }
  0x65   : > { %1049 = vmatpush.bf16.msrb.mxu2 %v1894_v0 }
  0x66   : > { %1163 = vmatpush.bf16.msrb.mxu3 %v1902_v22 }
  0x67   : > { %487 = vmatmul.bf16.vlgmr.msrb.gmra.mxu1 %v305_v53  ;;  %821 = vmatmul.bf16.vlgmr.msrb.gmra.mxu0 %v744_v54 }
  0x68   : > { %927 = vmatpush.bf16.msra.mxu1 %v1893_v41  ;;  %1270 = vmatpush.bf16.msra.mxu0 %v1917_v44 }
  0x69   : > { %717 = vmatmul.bf16.gmra.mxu3 %v632_v46  ;;  %1926 = vmatpush.bf16.msra.mxu2 %v1917_v44 }
  0x6a   : > { %603 = vmatmul.bf16.gmra.mxu2 %v2274_v12 }
  0x6c   : > { %928 = vmatpush.bf16.msra.mxu1 %v1892_v52  ;;  %1271 = vmatpush.bf16.msra.mxu0 %v1916_v58 }
  0x6d   : > { %1927 = vmatpush.bf16.msra.mxu2 %v1916_v58 }
  0x70   : > { %929 = vmatpush.bf16.msra.mxu1 %v1891_v59  ;;  %1272 = vmatpush.bf16.msra.mxu0 %v1915_v62 }
  0x71   : > { %1928 = vmatpush.bf16.msra.mxu2 %v1915_v62 }
  0x74   : > { %930 = vmatpush.bf16.msra.mxu1 %v1890_v25  ;;  %1273 = vmatpush.bf16.msra.mxu0 %v1914_v2 }
  0x75   : > { %1929 = vmatpush.bf16.msra.mxu2 %v1914_v2 }
  0x77   : > { %492 = vmatmul.bf16.gmra.mxu1 %v306_v7  ;;  %826 = vmatmul.bf16.gmra.mxu0 %v745_v8 }
  0x78   : > { %931 = vmatpush.bf16.msra.mxu1 %v1889_v3  ;;  %1274 = vmatpush.bf16.msra.mxu0 %v1913_v1 }
  0x79   : > { %722 = vmatmul.bf16.gmra.mxu3 %v633_v14  ;;  %1930 = vmatpush.bf16.msra.mxu2 %v1913_v1 }
  0x7a   : > { %608 = vmatmul.bf16.gmra.mxu2 %v519_v9 }
  0x7c   : > { %932 = vmatpush.bf16.msra.mxu1 %v1888_v6  ;;  %1275 = vmatpush.bf16.msra.mxu0 %v1912_v16 }
  0x7d   : > { %1931 = vmatpush.bf16.msra.mxu2 %v1912_v16 }
  0x80   : > { %933 = vmatpush.bf16.msra.mxu1 %v1887_v15  ;;  %1276 = vmatpush.bf16.msra.mxu0 %v1911_v20 }
  0x81   : > { %1932 = vmatpush.bf16.msra.mxu2 %v1911_v20 }
  0x84   : > { %934 = vmatpush.bf16.msra.mxu1 %v1886_v17  ;;  %1277 = vmatpush.bf16.msra.mxu0 %v1910_v18 }
  0x85   : > { %1933 = vmatpush.bf16.msra.mxu2 %v1910_v18 }
  0x87   : > { %497 = vmatmul.bf16.gmra.mxu1 %v307_v57  ;;  %831 = vmatmul.bf16.gmra.mxu0 %v746_v61 }
  0x89   : > { %1164 = vmatmul.bf16.vlgmr.msrb.gmra.mxu3 %v2205_v23  ;;  %v859_v23 = vpack.c.bf16 %v2259_v50, %v2194_v19 }
  0x8a   : > { %1050 = vmatmul.bf16.vlgmr.msrb.gmra.mxu2 %v306_v7 }
  0x97   : > { %502 = vmatmul.bf16.gmra.mxu1 %v308_v26  ;;  %836 = vmatmul.bf16.gmra.mxu0 %v747_v28 }
  0x99   : > { %1169 = vmatmul.bf16.gmra.mxu3 %v2139_v60  ;;  %v1199_v60 = vld [vmem:[#allocation2 + $0x82] sm:$0xff] }
  0x9a   : > { %1055 = vmatmul.bf16.gmra.mxu2 %v307_v57  ;;  %v1204_v34 = vpack.c.bf16 %v1200_v32, %v1199_v60  ;;  %v861_v38 = vpack.c.bf16 %v1199_v60, %v2314_v5 }
  0xa7   : > { %935 = vmatmul.bf16.vlgmr.msra.gmra.mxu1 %v858_v47  ;;  %1278 = vmatmul.bf16.vlgmr.msra.gmra.mxu0 %v2209_v24  ;;  %v860_v24 = vpack.c.bf16 %v2312_v4, %v2261_v10 }
  0xa9   : > { %1174 = vmatmul.bf16.gmra.mxu3 %v2201_v21 }
  0xaa   : > { %1060 = vmatmul.bf16.gmra.mxu2 %v308_v26 }
  0xb7   : > { %940 = vmatmul.bf16.gmra.mxu1 %v859_v23  ;;  %1283 = vmatmul.bf16.gmra.mxu0 %v2274_v12 }
  0xb9   : > { %1179 = vmatmul.bf16.gmra.mxu3 %v1090_v45 }
  0xba   : > { %1065 = vmatmul.bf16.gmra.mxu2 %v976_v29 }
  0xc4   : > { %v421_v33 = vpop.f32.mrf.mxu1  ;;  %v411_v21 = vpop.f32.mrf.mxu0 }
  0xc7   : > { %945 = vmatmul.bf16.gmra.mxu1 %v860_v24  ;;  %1288 = vmatmul.bf16.gmra.mxu0 %v519_v9 }
  0xca   : > { %1293 = vmatmul.bf16.vlgmr.msra.gmra.mxu2 %v1204_v34 }
  0xcc   : > { %v423_v35 = vpop.f32.mrf.mxu1  ;;  %v413_v36 = vpop.f32.mrf.mxu0 }
  0xcd   : > { %v594_v19 = vpop.f32.mrf.mxu2  ;;  %v708_v37 = vpop.f32.mrf.mxu3 }
  0xd4   : > { %v426_v40 = vpop.f32.mrf.mxu1  ;;  %v416_v41 = vpop.f32.mrf.mxu0 }
  0xd5   : > { %v596_v39 = vpop.f32.mrf.mxu2  ;;  %v710_v42 = vpop.f32.mrf.mxu3 }
  0xd7   : > { %950 = vmatmul.bf16.gmra.mxu1 %v861_v38 }
  0xdc   : > { %v428_v48 = vpop.f32.mrf.mxu1  ;;  %v418_v49 = vpop.f32.mrf.mxu0 }
  0xdd   : > { %v599_v44 = vpop.f32.mrf.mxu2  ;;  %v2363_v50 = vpop.f32.mrf.mxu3 }
  0xe4   : > { %v488_v51 = vpop.f32.mrf.mxu1  ;;  %v822_v52 = vpop.f32.mrf.mxu0 }
  0xe5   : > { %v601_v10 = vpop.f32.mrf.mxu2  ;;  %v489_v53 = vadd.f32 %v488_v51, %v411_v21  ;;  %v2365_v12 = vpop.f32.mrf.mxu3 }
  0xe7   : > { %v614_v54 = vadd.f32 %v594_v19, %v489_v53 }
  0xe9   : > { %v728_v60 = vadd.f32 %v708_v37, %v614_v54 }
  0xeb   : > { %v842_v24 = vadd.f32 %v822_v52, %v728_v60 }
  0xec   : > { %v490_v56 = vpop.f32.mrf.mxu1  ;;  %v824_v58 = vpop.f32.mrf.mxu0 }
  0xed   : > { %v604_v55 = vpop.f32.mrf.mxu2  ;;  %v491_v59 = vadd.f32 %v490_v56, %v413_v36  ;;  %v2367_v46 = vpop.f32.mrf.mxu3 }
  0xef   : > { %v615_v30 = vadd.f32 %v596_v39, %v491_v59 }
  0xf1   : > { %v729_v36 = vadd.f32 %v710_v42, %v615_v30 }
  0xf4   : > { %v493_v62 = vpop.f32.mrf.mxu1  ;;  %v827_v63 = vpop.f32.mrf.mxu0 }
  0xf5   : > { %v606_v61 = vpop.f32.mrf.mxu2  ;;  %v494_v0 = vadd.f32 %v493_v62, %v416_v41  ;;  %v2369_v2 = vpop.f32.mrf.mxu3 }
  0xf7   : > { %v616_v25 = vadd.f32 %v599_v44, %v494_v0 }
  0xf9   : > { %v730_v37 = vadd.f32 %v2363_v50, %v616_v25 }
  0xfb   : > { %v844_v54 = vadd.f32 %v827_v63, %v730_v37 }
  0xfc   : > { %v495_v3 = vpop.f32.mrf.mxu1  ;;  %v829_v4 = vpop.f32.mrf.mxu0 }
  0xfd   : > { %v609_v43 = vpop.f32.mrf.mxu2  ;;  %v496_v5 = vadd.f32 %v495_v3, %v418_v49  ;;  %v2373_v13 = vpop.f32.mrf.mxu3 }
  0xff   : > { %v617_v6 = vadd.f32 %v601_v10, %v496_v5 }
 0x101   : > { %v731_v62 = vadd.f32 %v2365_v12, %v617_v6 }
 0x103   : > { %v845_v25 = vadd.f32 %v829_v4, %v731_v62 }
 0x104   : > { %v498_v8 = vpop.f32.mrf.mxu1  ;;  %v2371_v9 = vpop.f32.mrf.mxu0 }
 0x105   : > { %v611_v7 = vpop.f32.mrf.mxu2  ;;  %v499_v11 = vadd.f32 %v498_v8, %v421_v33  ;;  %v2379_v17 = vpop.f32.mrf.mxu3 }
 0x107   : > { %v618_v14 = vadd.f32 %v604_v55, %v499_v11 }
 0x10c   : > { %v500_v1 = vpop.f32.mrf.mxu1  ;;  %v2375_v22 = vpop.f32.mrf.mxu0 }
 0x10d   : > { %v1051_v15 = vpop.f32.mrf.mxu2  ;;  %v501_v47 = vadd.f32 %v500_v1, %v423_v35  ;;  %v1165_v27 = vpop.f32.mrf.mxu3 }
 0x10f   : > { %v2377_v16 = vadd.f32 %v606_v61, %v501_v47  ;;  %v732_v47 = vadd.f32 %v2367_v46, %v618_v14 }
 0x111   : > { %v846_v6 = vadd.f32 %v2371_v9, %v732_v47 }
 0x114   : > { %v503_v57 = vpop.f32.mrf.mxu1  ;;  %v2381_v18 = vpop.f32.mrf.mxu0 }
 0x115   : > { %v1053_v20 = vpop.f32.mrf.mxu2  ;;  %v504_v26 = vadd.f32 %v503_v57, %v426_v40  ;;  %v1167_v33 = vpop.f32.mrf.mxu3  ;;  %v843_v40 = vadd.f32 %v824_v58, %v729_v36 }
 0x117   : > { %v2383_v28 = vadd.f32 %v609_v43, %v504_v26 }
 0x11c   : > { %v505_v29 = vpop.f32.mrf.mxu1  ;;  %v2385_v31 = vpop.f32.mrf.mxu0 }
 0x11d   : > { %v1056_v23 = vpop.f32.mrf.mxu2  ;;  %v506_v45 = vadd.f32 %v505_v29, %v428_v48  ;;  %v1170_v10 = vpop.f32.mrf.mxu3 }
 0x11f   : > { %v2387_v32 = vadd.f32 %v611_v7, %v506_v45 }
 0x124   : > { %v936_v21 = vpop.f32.mrf.mxu1  ;;  %v1279_v34 = vpop.f32.mrf.mxu0 }
 0x125   : > { %v956_v19 = vadd.f32 %v936_v21, %v842_v24  ;;  %v1058_v35 = vpop.f32.mrf.mxu2  ;;  %v1172_v3 = vpop.f32.mrf.mxu3 }
 0x127   : > { %v1071_v38 = vadd.f32 %v1051_v15, %v956_v19 }
 0x129   : > { %v1185_v39 = vadd.f32 %v1165_v27, %v1071_v38 }
 0x12b   : > { %v1299_v41 = vadd.f32 %v1279_v34, %v1185_v39 }
 0x12c   : > { %v938_v44 = vpop.f32.mrf.mxu1  ;;  %v1281_v49 = vpop.f32.mrf.mxu0 }
 0x12d   : > { %1307 = vst [vmem:[%s2000_s27] sm:$0xff] %v1299_v41  ;;  %v957_v48 = vadd.f32 %v938_v44, %v843_v40  ;;  %v1061_v52 = vpop.f32.mrf.mxu2  ;;  %v1332_v42 = vmul.f32 %v1299_v41, %v1299_v41  ;;  %v1175_v12 = vpop.f32.mrf.mxu3 }
 0x12f   : > { %v1072_v51 = vadd.f32 %v1053_v20, %v957_v48 }
 0x131   : > { %v1186_v53 = vadd.f32 %v1167_v33, %v1072_v51  ;;  %v733_v33 = vadd.f32 %v2369_v2, %v2377_v16 }
 0x133   : > { %v1300_v55 = vadd.f32 %v1281_v49, %v1186_v53  ;;  %v847_v34 = vadd.f32 %v2375_v22, %v733_v33 }
 0x134   : > { %v941_v56 = vpop.f32.mrf.mxu1  ;;  %v1284_v59 = vpop.f32.mrf.mxu0 }
 0x135   : > { %1308 = vst [vmem:[%s2000_s27 + $0x8] sm:$0xff] %v1300_v55  ;;  %v1316_v58 = vadd.f32 %v1300_v55, %v1299_v41  ;;  %v1333_v30 = vmul.f32 %v1300_v55, %v1300_v55  ;;  %v958_v61 = vadd.f32 %v941_v56, %v844_v54  ;;  %v1063_v50 = vpop.f32.mrf.mxu2  ;;  %v1177_v9 = vpop.f32.mrf.mxu3  ;;  %v734_v41 = vadd.f32 %v2373_v13, %v2383_v28 }
 0x136   : > { %v735_v54 = vadd.f32 %v2379_v17, %v2387_v32 }
 0x137   : > { %v1340_v0 = vadd.f32 %v1333_v30, %v1332_v42  ;;  %v1073_v43 = vadd.f32 %v1056_v23, %v958_v61  ;;  %v848_v48 = vadd.f32 %v2381_v18, %v734_v41 }
 0x139   : > { %v1187_v5 = vadd.f32 %v1170_v10, %v1073_v43 }
 0x13b   : > { %v1301_v7 = vadd.f32 %v1284_v59, %v1187_v5  ;;  %v849_v59 = vadd.f32 %v2385_v31, %v735_v54 }
 0x13c   : > { %v943_v63 = vpop.f32.mrf.mxu1  ;;  %v1286_v8 = vpop.f32.mrf.mxu0 }
 0x13d   : > { %1309 = vst [vmem:[%s2000_s27 + $0x10] sm:$0xff] %v1301_v7  ;;  %v1317_v11 = vadd.f32 %v1316_v58, %v1301_v7  ;;  %v1334_v15 = vmul.f32 %v1301_v7, %v1301_v7  ;;  %v959_v1 = vadd.f32 %v943_v63, %v845_v25  ;;  %v1066_v23 = vpop.f32.mrf.mxu2  ;;  %v1180_v53 = vpop.f32.mrf.mxu3 }
 0x13f   : > { %v1341_v20 = vadd.f32 %v1340_v0, %v1334_v15  ;;  %v1074_v57 = vadd.f32 %v1058_v35, %v959_v1 }
 0x141   : > { %v1188_v26 = vadd.f32 %v1172_v3, %v1074_v57  ;;  %v1315_v57 = vld [vmem:[%s2430_s5] sm:$0x1] }
 0x143   : > { %v1302_v27 = vadd.f32 %v1286_v8, %v1188_v26 }
 0x144   : > { %v946_v4 = vpop.f32.mrf.mxu1  ;;  %v1289_v24 = vpop.f32.mrf.mxu0 }
 0x145   : > { %1310 = vst [vmem:[%s2000_s27 + $0x18] sm:$0xff] %v1302_v27  ;;  %v1318_v29 = vadd.f32 %v1317_v11, %v1302_v27  ;;  %v1335_v45 = vmul.f32 %v1302_v27, %v1302_v27  ;;  %v960_v60 = vadd.f32 %v946_v4, %v846_v6  ;;  %v1068_v40 = vpop.f32.mrf.mxu2  ;;  %v1182_v43 = vpop.f32.mrf.mxu3  ;;  %v1331_v6 = vld [vmem:[%s2430_s5 + $0x1] sm:$0x1] }
 0x147   : > { %v1342_v21 = vadd.f32 %v1341_v20, %v1335_v45  ;;  %v1075_v46 = vadd.f32 %v1061_v52, %v960_v60 }
 0x149   : > { %v1189_v14 = vadd.f32 %v1175_v12, %v1075_v46 }
 0x14b   : > { %v1303_v19 = vadd.f32 %v1289_v24, %v1189_v14 }
 0x14c   : > { %v948_v35 = vpop.f32.mrf.mxu1  ;;  %v1291_v2 = vpop.f32.mrf.mxu0 }
 0x14d   : > { %1311 = vst [vmem:[%s2000_s27 + $0x20] sm:$0xff] %v1303_v19  ;;  %v1319_v36 = vadd.f32 %v1318_v29, %v1303_v19  ;;  %v1336_v38 = vmul.f32 %v1303_v19, %v1303_v19  ;;  %v961_v39 = vadd.f32 %v948_v35, %v847_v34  ;;  %v1294_v13 = vpop.f32.mrf.mxu2 }
 0x14f   : > { %v1343_v44 = vadd.f32 %v1342_v21, %v1336_v38  ;;  %v1076_v49 = vadd.f32 %v1063_v50, %v961_v39 }
 0x151   : > { %v1190_v16 = vadd.f32 %v1177_v9, %v1076_v49 }
 0x153   : > { %v1304_v22 = vadd.f32 %v1291_v2, %v1190_v16 }
 0x154   : > { %v951_v10 = vpop.f32.mrf.mxu1 }
 0x155   : > { %1312 = vst [vmem:[%s2000_s27 + $0x28] sm:$0xff] %v1304_v22  ;;  %v1320_v37 = vadd.f32 %v1319_v36, %v1304_v22  ;;  %v1337_v51 = vmul.f32 %v1304_v22, %v1304_v22  ;;  %v962_v52 = vadd.f32 %v951_v10, %v848_v48  ;;  %v1296_v5 = vpop.f32.mrf.mxu2 }
 0x157   : > { %v1344_v55 = vadd.f32 %v1343_v44, %v1337_v51  ;;  %v1077_v56 = vadd.f32 %v1066_v23, %v962_v52 }
 0x159   : > { %v1191_v28 = vadd.f32 %v1180_v53, %v1077_v56 }
 0x15b   : > { %v1305_v42 = vadd.f32 %v1294_v13, %v1191_v28 }
 0x15c   : > { %v953_v18 = vpop.f32.mrf.mxu1 }
 0x15d   : > { %1313 = vst [vmem:[%s2000_s27 + $0x30] sm:$0xff] %v1305_v42  ;;  %v1321_v58 = vadd.f32 %v1320_v37, %v1305_v42  ;;  %v1338_v30 = vmul.f32 %v1305_v42, %v1305_v42  ;;  %v963_v61 = vadd.f32 %v953_v18, %v849_v59 }
 0x15f   : > { %v1345_v62 = vadd.f32 %v1344_v55, %v1338_v30  ;;  %v1078_v0 = vadd.f32 %v1068_v40, %v963_v61 }
 0x161   : > { %v1192_v3 = vadd.f32 %v1182_v43, %v1078_v0 }
 0x163   : > { %v1306_v50 = vadd.f32 %v1296_v5, %v1192_v3 }
 0x165   : > { %1314 = vst [vmem:[%s2000_s27 + $0x38] sm:$0xff] %v1306_v50  ;;  %v1322_v17 = vadd.f32 %v1321_v58, %v1306_v50  ;;  %v1339_v32 = vmul.f32 %v1306_v50, %v1306_v50 }
 0x167   : > { %v1323_v25 = vrot.slane %v1322_v17, 4  ;;  %v1346_v7 = vadd.f32 %v1345_v62, %v1339_v32 }
 0x169   : > { %v1324_v63 = vadd.f32 %v1323_v25, %v1322_v17  ;;  %v1347_v8 = vrot.slane %v1346_v7, 4 }
 0x16b   : > { %v1325_v31 = vrot.slane %v1324_v63, 2  ;;  %v1348_v11 = vadd.f32 %v1347_v8, %v1346_v7 }
 0x16d   : > { %v1326_v15 = vadd.f32 %v1325_v31, %v1324_v63  ;;  %v1349_v1 = vrot.slane %v1348_v11, 2 }
 0x16f   : > { %v1327_v47 = vrot.slane %v1326_v15, 1  ;;  %v1350_v20 = vadd.f32 %v1349_v1, %v1348_v11 }
 0x171   : > { %v1328_v26 = vadd.f32 %v1327_v47, %v1326_v15  ;;  %v1351_v12 = vrot.slane %v1350_v20, 1 }
 0x173   : > { %v1329_v27 = vadd.f32 %v1328_v26, %v1315_v57  ;;  %v1352_v23 = vadd.f32 %v1351_v12, %v1350_v20 }
 0x175   : > { %1330 = vst [vmem:[%s2430_s5] sm:$0x1] %v1329_v27  ;;  %v1353_v4 = vadd.f32 %v1352_v23, %v1331_v6 }
 0x177   : > { %1354 = vst [vmem:[%s2430_s5 + $0x1] sm:$0x1] %v1353_v4 }
 0x178 PF: > { %s16_s18 = sadd.s32 1, %s1951_s18  }
 0x179   : > { %p13_p5 = scmp.ge.s32.totalorder %s16_s18, 4  }
 0x17b   :  { %15 = sbr.rel (!%p13_p5) target bundleno = 1 (0x1), region = 88 }

// kernel: residual_part_forward.7
= control target key start
LH: loop header
LB: loop body
LE: loop exit
PB: predicated region body
PF: predicated region fallthrough
CT: control target
= control target key end

     0   :  { %s2409_s30 = smov 0   ;;  %s2884_s0 = inlined_call_operand.vmem [shape: f32[2,9,9,128], index: 0, kind: input, shape index: {}]   ;;  %s2885_s1 = inlined_call_operand.vmem [shape: f32[2,9,9,128], index: 1, kind: input, shape index: {}]   ;;  %s2886_s2 = inlined_call_operand.vmem [shape: f32[2,9,9,128], index: 2, kind: input, shape index: {}]   ;;  %s2887_s3 = inlined_call_operand.vmem [shape: f32[2,9,9,128], index: 3, kind: input, shape index: {}]   ;;  %s2888_s4 = inlined_call_operand.vmem [shape: bf16[9,128,128], index: 4, kind: input, shape index: {}]   ;;  %s2889_s5 = inlined_call_operand.vmem [shape: bf16[128,128], index: 5, kind: input, shape index: {}]   ;;  %s2890_s6 = inlined_call_operand.vmem [shape: f32[2,8,8,128], index: 6, kind: output, shape index: {0}]   ;;  %s2891_s7 = inlined_call_operand.vmem [shape: f32[2,8,8,128], index: 7, kind: output, shape index: {1}]   ;;  %s2892_s8 = inlined_call_operand.vmem [shape: f32[2,128], index: 8, kind: output, shape index: {2}]   ;;  %s2893_s9 = inlined_call_operand.vmem [shape: f32[2,128], index: 9, kind: output, shape index: {3}]  }
   0x1 LB: > { %s1754_s10 = sadd.s32 4294967295, %s2356_s30   ;;  %p1758_p0 = scmp.ge.s32.totalorder %s2356_s30, 1  ;;  %s2356_s30 = sphi %s2409_s30, %s20_s30  }
   0x2   : > { %p314_p1 = scmp.lt.s32.totalorder %s2356_s30, 3 }
   0x4   : > { %p315_p2 = pnand %p1758_p0, %p314_p1 }
   0x5   : > { %p370_p3 = scmp.lt.s32.totalorder (!%p315_p2), %s1754_s10, 1  ;;  %p1767_p4 = scmp.ne.s32.totalorder (!%p315_p2), %s1754_s10, 0 }
   0x6   : > { %318 = sbr.rel (%p315_p2) target bundleno = 362 (0x16a), region = 44 }
   0xb   : > { %s371_s11 = scalar_select %p370_p3, %s1754_s10, 1 }
   0xc   : > { %403 = sbr.rel (%p1767_p4) target bundleno = 20 (0x14), region = 48 }
   0xd   : > { %s2340_s12 = smul.u32 144, %s371_s11  ;;  %s2242_s13 = sshll.u32 %s371_s11, 6 }
   0xe   : > { %s2420_s16 = scalar_lea.vmem %s2890_s6, %s2242_s13  ;;  %s2425_s19 = scalar_lea.vmem %s2891_s7, %s2242_s13 }
   0xf   : > { %s2430_s22 = scalar_lea.vmem %s2884_s0, %s2340_s12  ;;  %s2435_s25 = scalar_lea.vmem %s2885_s1, %s2340_s12 }
  0x10   : > { %s2440_s28 = scalar_lea.vmem %s2886_s2, %s2340_s12  ;;  %s2445_s13 = scalar_lea.vmem %s2887_s3, %s2340_s12 }
  0x11   : > { %v2358_v0 = vmov 0.0  }
  0x12   : > { %404 = vst [vmem:[%s2892_s8] sm:$0x3] %v2358_v0 }
  0x13   : > { %405 = vst [vmem:[%s2893_s9] sm:$0x3] %v2358_v0 }
  0x14 PF: > { %v2259_v1 = vld [vmem:[%s2888_s4 + $0x78] sm:$0xff]  ;;  %v2258_v3 = vld [vmem:[%s2888_s4 + $0x70] sm:$0xff]  ;;  %v2257_v5 = vld [vmem:[%s2888_s4 + $0x68] sm:$0xff] }
  0x15   : > { %v2251_v2 = vld [vmem:[%s2888_s4 + $0x38] sm:$0xff]  ;;  %2324 = vmatpush.bf16.msra.mxu2 %v2259_v1  ;;  %v2250_v4 = vld [vmem:[%s2888_s4 + $0x30] sm:$0xff]  ;;  %511 = vmatpush.bf16.msra.mxu0 %v2259_v1  ;;  %v2249_v6 = vld [vmem:[%s2888_s4 + $0x28] sm:$0xff] }
  0x16   : > { %588 = vmatpush.bf16.msra.mxu1 %v2251_v2  ;;  %2332 = vmatpush.bf16.msra.mxu3 %v2251_v2  ;;  %v2256_v7 = vld [vmem:[%s2888_s4 + $0x60] sm:$0xff]  ;;  %v2255_v9 = vld [vmem:[%s2888_s4 + $0x58] sm:$0xff]  ;;  %v2254_v11 = vld [vmem:[%s2888_s4 + $0x50] sm:$0xff] }
  0x17   : > { %v2248_v8 = vld [vmem:[%s2888_s4 + $0x20] sm:$0xff]  ;;  %v2247_v10 = vld [vmem:[%s2888_s4 + $0x18] sm:$0xff]  ;;  %v2246_v12 = vld [vmem:[%s2888_s4 + $0x10] sm:$0xff] }
  0x18   : > { %v2253_v13 = vld [vmem:[%s2888_s4 + $0x48] sm:$0xff]  ;;  %v2252_v15 = vld [vmem:[%s2888_s4 + $0x40] sm:$0xff]  ;;  %v2505_v18 = vld [vmem:[%s2435_s25 + $0x50] sm:$0xff] }
  0x19   : > { %2325 = vmatpush.bf16.msra.mxu2 %v2258_v3  ;;  %512 = vmatpush.bf16.msra.mxu0 %v2258_v3  ;;  %v2245_v14 = vld [vmem:[%s2888_s4 + $0x8] sm:$0xff]  ;;  %v2244_v16 = vld [vmem:[%s2888_s4] sm:$0xff]  ;;  %v2509_v20 = vld [vmem:[%s2430_s22 + $0x10] sm:$0xff] }
  0x1a   : > { %589 = vmatpush.bf16.msra.mxu1 %v2250_v4  ;;  %2333 = vmatpush.bf16.msra.mxu3 %v2250_v4  ;;  %v2502_v17 = vld [vmem:[%s2435_s25 + $0x40] sm:$0xff]  ;;  %v2515_v22 = vld [vmem:[%s2430_s22 + $0x50] sm:$0xff]  ;;  %v2267_v23 = vld [vmem:[%s2888_s4 + $0xb8] sm:$0xff] }
  0x1b   : > { %v406_v19 = vld [vmem:[%s2430_s22] sm:$0xff]  ;;  %v2275_v24 = vld [vmem:[%s2888_s4 + $0xf8] sm:$0xff]  ;;  %v2525_v26 = vld [vmem:[%s2435_s25 + $0x10] sm:$0xff]  ;;  %v444_v27 = vpack.c.bf16 %v2505_v18, %v2502_v17 }
  0x1c   : > { %v2512_v21 = vld [vmem:[%s2430_s22 + $0x40] sm:$0xff]  ;;  %v414_v28 = vpack.c.bf16 %v2509_v20, %v406_v19  ;;  %v2291_v30 = vld [vmem:[%s2888_s4 + $0x178] sm:$0xff]  ;;  %v2266_v33 = vld [vmem:[%s2888_s4 + $0xb0] sm:$0xff] }
  0x1d   : > { %2326 = vmatpush.bf16.msra.mxu2 %v2257_v5  ;;  %513 = vmatpush.bf16.msra.mxu0 %v2257_v5  ;;  %v434_v25 = vld [vmem:[%s2435_s25] sm:$0xff]  ;;  %v416_v29 = vpack.c.bf16 %v2515_v22, %v2512_v21  ;;  %v2283_v32 = vld [vmem:[%s2888_s4 + $0x138] sm:$0xff]  ;;  %v2274_v34 = vld [vmem:[%s2888_s4 + $0xf0] sm:$0xff] }
  0x1e   : > { %590 = vmatpush.bf16.msra.mxu1 %v2249_v6  ;;  %2334 = vmatpush.bf16.msra.mxu3 %v2249_v6  ;;  %v442_v31 = vpack.c.bf16 %v2525_v26, %v434_v25  ;;  %v2290_v35 = vld [vmem:[%s2888_s4 + $0x170] sm:$0xff]  ;;  %v2265_v37 = vld [vmem:[%s2888_s4 + $0xa8] sm:$0xff]  ;;  %v2264_v41 = vld [vmem:[%s2888_s4 + $0xa0] sm:$0xff] }
  0x1f   : > { %v2282_v36 = vld [vmem:[%s2888_s4 + $0x130] sm:$0xff]  ;;  %v2273_v38 = vld [vmem:[%s2888_s4 + $0xe8] sm:$0xff]  ;;  %v2272_v42 = vld [vmem:[%s2888_s4 + $0xe0] sm:$0xff] }
  0x20   : > { %v2289_v39 = vld [vmem:[%s2888_s4 + $0x168] sm:$0xff]  ;;  %v2288_v43 = vld [vmem:[%s2888_s4 + $0x160] sm:$0xff]  ;;  %v2576_v45 = vld [vmem:[%s2435_s25 + $0x70] sm:$0xff] }
  0x21   : > { %2327 = vmatpush.bf16.msra.mxu2 %v2256_v7  ;;  %514 = vmatpush.bf16.msra.mxu0 %v2256_v7  ;;  %v2281_v40 = vld [vmem:[%s2888_s4 + $0x128] sm:$0xff]  ;;  %v2573_v44 = vld [vmem:[%s2435_s25 + $0x60] sm:$0xff]  ;;  %v2582_v47 = vld [vmem:[%s2430_s22 + $0x30] sm:$0xff] }
  0x22   : > { %591 = vmatpush.bf16.msra.mxu1 %v2248_v8  ;;  %2335 = vmatpush.bf16.msra.mxu3 %v2248_v8  ;;  %v2579_v46 = vld [vmem:[%s2430_s22 + $0x20] sm:$0xff]  ;;  %v2591_v50 = vld [vmem:[%s2430_s22 + $0x70] sm:$0xff]  ;;  %v2263_v51 = vld [vmem:[%s2888_s4 + $0x98] sm:$0xff]  ;;  %v445_v54 = vpack.c.bf16 %v2576_v45, %v2573_v44 }
  0x23   : > { %v2280_v48 = vld [vmem:[%s2888_s4 + $0x120] sm:$0xff]  ;;  %v2600_v53 = vld [vmem:[%s2435_s25 + $0x30] sm:$0xff]  ;;  %v415_v55 = vpack.c.bf16 %v2582_v47, %v2579_v46  ;;  %v2287_v57 = vld [vmem:[%s2888_s4 + $0x158] sm:$0xff] }
  0x24   : > { %v2588_v49 = vld [vmem:[%s2430_s22 + $0x60] sm:$0xff]  ;;  %v2271_v58 = vld [vmem:[%s2888_s4 + $0xd8] sm:$0xff]  ;;  %v2262_v61 = vld [vmem:[%s2888_s4 + $0x90] sm:$0xff] }
  0x25   : > { %2328 = vmatpush.bf16.msra.mxu2 %v2255_v9  ;;  %515 = vmatpush.bf16.msra.mxu0 %v2255_v9  ;;  %v2597_v52 = vld [vmem:[%s2435_s25 + $0x20] sm:$0xff]  ;;  %v417_v56 = vpack.c.bf16 %v2591_v50, %v2588_v49  ;;  %v2279_v60 = vld [vmem:[%s2888_s4 + $0x118] sm:$0xff]  ;;  %v2286_v62 = vld [vmem:[%s2888_s4 + $0x150] sm:$0xff] }
  0x26   : > { %592 = vmatpush.bf16.msra.mxu1 %v2247_v10  ;;  %2336 = vmatpush.bf16.msra.mxu3 %v2247_v10  ;;  %v443_v59 = vpack.c.bf16 %v2600_v53, %v2597_v52  ;;  %v2270_v63 = vld [vmem:[%s2888_s4 + $0xd0] sm:$0xff]  ;;  %v2261_v1 = vld [vmem:[%s2888_s4 + $0x88] sm:$0xff]  ;;  %v2260_v5 = vld [vmem:[%s2888_s4 + $0x80] sm:$0xff] }
  0x27   : > { %v2278_v0 = vld [vmem:[%s2888_s4 + $0x110] sm:$0xff]  ;;  %v2285_v2 = vld [vmem:[%s2888_s4 + $0x148] sm:$0xff]  ;;  %v2268_v6 = vld [vmem:[%s2888_s4 + $0xc0] sm:$0xff] }
  0x28   : > { %v2269_v3 = vld [vmem:[%s2888_s4 + $0xc8] sm:$0xff]  ;;  %v2284_v7 = vld [vmem:[%s2888_s4 + $0x140] sm:$0xff]  ;;  %v2299_v9 = vld [vmem:[%s2888_s4 + $0x1b8] sm:$0xff] }
  0x29   : > { %2329 = vmatpush.bf16.msra.mxu2 %v2254_v11  ;;  %516 = vmatpush.bf16.msra.mxu0 %v2254_v11  ;;  %v2277_v4 = vld [vmem:[%s2888_s4 + $0x108] sm:$0xff]  ;;  %v2276_v10 = vld [vmem:[%s2888_s4 + $0x100] sm:$0xff]  ;;  %v2660_v11 = vld [vmem:[%s2430_s22 + $0x11] sm:$0xff] }
  0x2a   : > { %593 = vmatpush.bf16.msra.mxu1 %v2246_v12  ;;  %2337 = vmatpush.bf16.msra.mxu3 %v2246_v12  ;;  %v617_v8 = vld [vmem:[%s2430_s22 + $0x1] sm:$0xff] }
  0x2b   : > { %v959_v12 = vld [vmem:[%s2440_s28 + $0x1] sm:$0xff]  ;;  %v625_v25 = vpack.c.bf16 %v2660_v11, %v617_v8  ;;  %v2310_v8 = vld [vmem:[%s2888_s4 + $0x210] sm:$0xff] }
  0x2c   : > { %v845_v19 = vld [vmem:[%s2445_s13] sm:$0xff] }
  0x2d   : > { %2330 = vmatpush.bf16.msra.mxu2 %v2253_v13  ;;  %517 = vmatpush.bf16.msra.mxu0 %v2253_v13  ;;  %v960_v13 = vld [vmem:[%s2440_s28 + $0x11] sm:$0xff] }
  0x2e   : > { %594 = vmatpush.bf16.msra.mxu1 %v2245_v14  ;;  %2338 = vmatpush.bf16.msra.mxu3 %v2245_v14  ;;  %v731_v14 = vld [vmem:[%s2440_s28] sm:$0xff] }
  0x31   : > { %2331 = vmatpush.bf16.msra.mxu2 %v2252_v15  ;;  %518 = vmatpush.bf16.msra.mxu0 %v2252_v15  ;;  %v732_v15 = vld [vmem:[%s2440_s28 + $0x10] sm:$0xff] }
  0x32   : > { %595 = vmatpush.bf16.msra.mxu1 %v2244_v16  ;;  %2339 = vmatpush.bf16.msra.mxu3 %v2244_v16  ;;  %v2323_v16 = vld [vmem:[%s2889_s5 + $0x38] sm:$0xff] }
  0x34   : > { %529 = vmatmul.bf16.vlgmr.msra.gmra.mxu2 %v444_v27  ;;  %519 = vmatmul.bf16.vlgmr.msra.gmra.mxu0 %v442_v31  ;;  %v967_v27 = vpack.c.bf16 %v960_v13, %v959_v12  ;;  %v2322_v31 = vld [vmem:[%s2889_s5 + $0x30] sm:$0xff]  ;;  %v2300_v12 = vld [vmem:[%s2888_s4 + $0x1c0] sm:$0xff]  ;;  %v2309_v13 = vld [vmem:[%s2888_s4 + $0x208] sm:$0xff] }
  0x35   : > { %694 = vmatpush.bf16.msrb.mxu2 %v2267_v23  ;;  %596 = vmatmul.bf16.vlgmr.msra.gmra.mxu1 %v414_v28  ;;  %v846_v23 = vld [vmem:[%s2445_s13 + $0x10] sm:$0xff]  ;;  %v739_v28 = vpack.c.bf16 %v732_v15, %v731_v14  ;;  %v621_v14 = vld [vmem:[%s2430_s22 + $0x41] sm:$0xff] }
  0x36   : > { %808 = vmatpush.bf16.msrb.mxu3 %v2275_v24  ;;  %1036 = vmatpush.bf16.msrb.mxu1 %v2291_v30  ;;  %v2307_v24 = vld [vmem:[%s2888_s4 + $0x1f8] sm:$0xff]  ;;  %v2678_v30 = vpack.c.bf16 %v846_v23, %v845_v19  ;;  %v2316_v15 = vld [vmem:[%s2889_s5] sm:$0xff] }
  0x37   : > { %606 = vmatmul.bf16.vlgmr.msra.gmra.mxu3 %v416_v29  ;;  %922 = vmatpush.bf16.msrb.mxu0 %v2283_v32  ;;  %v2298_v29 = vld [vmem:[%s2888_s4 + $0x1b0] sm:$0xff]  ;;  %v963_v19 = vld [vmem:[%s2440_s28 + $0x41] sm:$0xff] }
  0x38   : > { %v2306_v32 = vld [vmem:[%s2888_s4 + $0x1f0] sm:$0xff] }
  0x39   : > { %695 = vmatpush.bf16.msrb.mxu2 %v2266_v33  ;;  %v2315_v33 = vld [vmem:[%s2888_s4 + $0x238] sm:$0xff] }
  0x3a   : > { %809 = vmatpush.bf16.msrb.mxu3 %v2274_v34  ;;  %1037 = vmatpush.bf16.msrb.mxu1 %v2290_v35  ;;  %v2297_v34 = vld [vmem:[%s2888_s4 + $0x1a8] sm:$0xff]  ;;  %v964_v23 = vld [vmem:[%s2440_s28 + $0x51] sm:$0xff] }
  0x3b   : > { %923 = vmatpush.bf16.msrb.mxu0 %v2282_v36  ;;  %v2321_v35 = vld [vmem:[%s2889_s5 + $0x28] sm:$0xff] }
  0x3c   : > { %v2305_v36 = vld [vmem:[%s2888_s4 + $0x1e8] sm:$0xff] }
  0x3d   : > { %696 = vmatpush.bf16.msrb.mxu2 %v2265_v37  ;;  %v2314_v37 = vld [vmem:[%s2888_s4 + $0x230] sm:$0xff] }
  0x3e   : > { %810 = vmatpush.bf16.msrb.mxu3 %v2273_v38  ;;  %1038 = vmatpush.bf16.msrb.mxu1 %v2289_v39  ;;  %v2296_v38 = vld [vmem:[%s2888_s4 + $0x1a0] sm:$0xff] }
  0x3f   : > { %924 = vmatpush.bf16.msrb.mxu0 %v2281_v40  ;;  %v2320_v39 = vld [vmem:[%s2889_s5 + $0x20] sm:$0xff] }
  0x40   : > { %v2304_v40 = vld [vmem:[%s2888_s4 + $0x1e0] sm:$0xff] }
  0x41   : > { %697 = vmatpush.bf16.msrb.mxu2 %v2264_v41  ;;  %v2313_v41 = vld [vmem:[%s2888_s4 + $0x228] sm:$0xff] }
  0x42   : > { %811 = vmatpush.bf16.msrb.mxu3 %v2272_v42  ;;  %1039 = vmatpush.bf16.msrb.mxu1 %v2288_v43  ;;  %v2715_v42 = vld [vmem:[%s2430_s22 + $0x21] sm:$0xff]  ;;  %v2718_v43 = vld [vmem:[%s2430_s22 + $0x31] sm:$0xff] }
  0x43   : > { %925 = vmatpush.bf16.msrb.mxu0 %v2280_v48  ;;  %v733_v48 = vld [vmem:[%s2440_s28 + $0x20] sm:$0xff] }
  0x44   : > { %534 = vmatmul.bf16.gmra.mxu2 %v445_v54  ;;  %524 = vmatmul.bf16.gmra.mxu0 %v443_v59  ;;  %v962_v54 = vld [vmem:[%s2440_s28 + $0x31] sm:$0xff] }
  0x45   : > { %698 = vmatpush.bf16.msrb.mxu2 %v2263_v51  ;;  %601 = vmatmul.bf16.gmra.mxu1 %v415_v55  ;;  %v961_v51 = vld [vmem:[%s2440_s28 + $0x21] sm:$0xff]  ;;  %v2295_v55 = vld [vmem:[%s2888_s4 + $0x198] sm:$0xff]  ;;  %v848_v59 = vld [vmem:[%s2445_s13 + $0x30] sm:$0xff] }
  0x46   : > { %1040 = vmatpush.bf16.msrb.mxu1 %v2287_v57  ;;  %812 = vmatpush.bf16.msrb.mxu3 %v2271_v58  ;;  %v847_v57 = vld [vmem:[%s2445_s13 + $0x20] sm:$0xff]  ;;  %v2319_v58 = vld [vmem:[%s2889_s5 + $0x18] sm:$0xff] }
  0x47   : > { %611 = vmatmul.bf16.gmra.mxu3 %v417_v56  ;;  %926 = vmatpush.bf16.msrb.mxu0 %v2279_v60  ;;  %v734_v56 = vld [vmem:[%s2440_s28 + $0x30] sm:$0xff]  ;;  %v2303_v60 = vld [vmem:[%s2888_s4 + $0x1d8] sm:$0xff] }
  0x49   : > { %699 = vmatpush.bf16.msrb.mxu2 %v2262_v61  ;;  %v2312_v61 = vld [vmem:[%s2888_s4 + $0x220] sm:$0xff] }
  0x4a   : > { %1041 = vmatpush.bf16.msrb.mxu1 %v2286_v62  ;;  %813 = vmatpush.bf16.msrb.mxu3 %v2270_v63  ;;  %v626_v62 = vpack.c.bf16 %v2718_v43, %v2715_v42  ;;  %v968_v63 = vpack.c.bf16 %v962_v54, %v961_v51 }
  0x4b   : > { %927 = vmatpush.bf16.msrb.mxu0 %v2278_v0  ;;  %v740_v0 = vpack.c.bf16 %v734_v56, %v733_v48  ;;  %v852_v48 = vld [vmem:[%s2445_s13 + $0x70] sm:$0xff] }
  0x4d   : > { %700 = vmatpush.bf16.msrb.mxu2 %v2261_v1  ;;  %v2294_v1 = vld [vmem:[%s2888_s4 + $0x190] sm:$0xff] }
  0x4e   : > { %1042 = vmatpush.bf16.msrb.mxu1 %v2285_v2  ;;  %814 = vmatpush.bf16.msrb.mxu3 %v2269_v3  ;;  %v2743_v2 = vpack.c.bf16 %v848_v59, %v847_v57  ;;  %v2302_v3 = vld [vmem:[%s2888_s4 + $0x1d0] sm:$0xff]  ;;  %v1082_v57 = vpack.c.bf16 %v2579_v46, %v2509_v20  ;;  %v1311_v59 = vpack.c.bf16 %v2715_v42, %v2660_v11  ;;  %v2047_v42 = vld [vmem:[%s2430_s22 + $0x80] sm:$0xff] }
  0x4f   : > { %928 = vmatpush.bf16.msrb.mxu0 %v2277_v4  ;;  %v2311_v4 = vld [vmem:[%s2888_s4 + $0x218] sm:$0xff]  ;;  %v1084_v20 = vpack.c.bf16 %v2588_v49, %v2515_v22  ;;  %v1199_v46 = vpack.c.bf16 %v2573_v44, %v2505_v18  ;;  %v1085_v44 = vpack.c.bf16 %v2047_v42, %v2591_v50 }
  0x51   : > { %701 = vmatpush.bf16.msrb.mxu2 %v2260_v5  ;;  %v2293_v5 = vld [vmem:[%s2888_s4 + $0x188] sm:$0xff] }
  0x52   : > { %1043 = vmatpush.bf16.msrb.mxu1 %v2284_v7  ;;  %815 = vmatpush.bf16.msrb.mxu3 %v2268_v6  ;;  %v2318_v6 = vld [vmem:[%s2889_s5 + $0x10] sm:$0xff]  ;;  %v2301_v7 = vld [vmem:[%s2888_s4 + $0x1c8] sm:$0xff] }
  0x53   : > { %929 = vmatpush.bf16.msrb.mxu0 %v2276_v10  ;;  %v2292_v10 = vld [vmem:[%s2888_s4 + $0x180] sm:$0xff] }
  0x54   : > { %702 = vmatmul.bf16.vlgmr.msrb.gmra.mxu2 %v625_v25  ;;  %v736_v25 = vld [vmem:[%s2440_s28 + $0x50] sm:$0xff] }
  0x55   : > { %1151 = vmatpush.bf16.msra.mxu2 %v2299_v9  ;;  %1044 = vmatmul.bf16.vlgmr.msrb.gmra.mxu1 %v967_v27  ;;  %v2317_v9 = vld [vmem:[%s2889_s5 + $0x8] sm:$0xff]  ;;  %v849_v27 = vld [vmem:[%s2445_s13 + $0x40] sm:$0xff] }
  0x56   : > { %1541 = vmatpush.bf16.msra.mxu1 %v2323_v16  ;;  %1266 = vmatpush.bf16.msra.mxu3 %v2307_v24  ;;  %v622_v16 = vld [vmem:[%s2430_s22 + $0x51] sm:$0xff]  ;;  %v735_v24 = vld [vmem:[%s2440_s28 + $0x40] sm:$0xff] }
  0x57   : > { %816 = vmatmul.bf16.vlgmr.msrb.gmra.mxu3 %v739_v28  ;;  %930 = vmatmul.bf16.vlgmr.msrb.gmra.mxu0 %v2678_v30  ;;  %v850_v28 = vld [vmem:[%s2445_s13 + $0x50] sm:$0xff] }
  0x58   : > { %1380 = vmatpush.bf16.msra.mxu0 %v2315_v33  ;;  %v741_v33 = vpack.c.bf16 %v736_v25, %v735_v24 }
  0x59   : > { %1152 = vmatpush.bf16.msra.mxu2 %v2298_v29  ;;  %v2308_v29 = vld [vmem:[%s2888_s4 + $0x200] sm:$0xff] }
  0x5a   : > { %1542 = vmatpush.bf16.msra.mxu1 %v2322_v31  ;;  %1267 = vmatpush.bf16.msra.mxu3 %v2306_v32  ;;  %v627_v31 = vpack.c.bf16 %v622_v16, %v621_v14  ;;  %v969_v32 = vpack.c.bf16 %v964_v23, %v963_v19 }
  0x5c   : > { %1381 = vmatpush.bf16.msra.mxu0 %v2314_v37  ;;  %v965_v37 = vld [vmem:[%s2440_s28 + $0x61] sm:$0xff] }
  0x5d   : > { %1153 = vmatpush.bf16.msra.mxu2 %v2297_v34  ;;  %v855_v34 = vpack.c.bf16 %v850_v28, %v849_v27 }
  0x5e   : > { %1543 = vmatpush.bf16.msra.mxu1 %v2321_v35  ;;  %1268 = vmatpush.bf16.msra.mxu3 %v2305_v36  ;;  %v623_v35 = vld [vmem:[%s2430_s22 + $0x61] sm:$0xff]  ;;  %v624_v36 = vld [vmem:[%s2430_s22 + $0x71] sm:$0xff] }
  0x5f   : > { %v628_v51 = vpack.c.bf16 %v624_v36, %v623_v35 }
  0x60   : > { %1382 = vmatpush.bf16.msra.mxu0 %v2313_v41  ;;  %v851_v41 = vld [vmem:[%s2445_s13 + $0x60] sm:$0xff] }
  0x61   : > { %1154 = vmatpush.bf16.msra.mxu2 %v2296_v38  ;;  %v966_v38 = vld [vmem:[%s2440_s28 + $0x71] sm:$0xff]  ;;  %v856_v56 = vpack.c.bf16 %v852_v48, %v851_v41 }
  0x62   : > { %1544 = vmatpush.bf16.msra.mxu1 %v2320_v39  ;;  %1269 = vmatpush.bf16.msra.mxu3 %v2304_v40  ;;  %v737_v39 = vld [vmem:[%s2440_s28 + $0x60] sm:$0xff]  ;;  %v738_v40 = vld [vmem:[%s2440_s28 + $0x70] sm:$0xff]  ;;  %v970_v54 = vpack.c.bf16 %v966_v38, %v965_v37 }
  0x64   : > { %1383 = vmatpush.bf16.msra.mxu0 %v2312_v61  ;;  %707 = vmatmul.bf16.gmra.mxu2 %v626_v62  ;;  %v1198_v61 = vpack.c.bf16 %v2502_v17, %v2600_v53  ;;  %v1312_v62 = vpack.c.bf16 %v621_v14, %v2718_v43  ;;  %v2103_v43 = vld [vmem:[%s2435_s25 + $0x80] sm:$0xff] }
  0x65   : > { %1155 = vmatpush.bf16.msra.mxu2 %v2295_v55  ;;  %1049 = vmatmul.bf16.gmra.mxu1 %v968_v63  ;;  %v742_v55 = vpack.c.bf16 %v738_v40, %v737_v39 }
  0x66   : > { %1545 = vmatpush.bf16.msra.mxu1 %v2319_v58  ;;  %1270 = vmatpush.bf16.msra.mxu3 %v2303_v60  ;;  %v1197_v58 = vpack.c.bf16 %v2597_v52, %v2525_v26  ;;  %v1083_v60 = vpack.c.bf16 %v2512_v21, %v2582_v47  ;;  %v1313_v21 = vpack.c.bf16 %v623_v35, %v622_v16 }
  0x67   : > { %821 = vmatmul.bf16.gmra.mxu3 %v740_v0  ;;  %935 = vmatmul.bf16.gmra.mxu0 %v2743_v2  ;;  %v2159_v0 = vld [vmem:[%s2430_s22 + $0x81] sm:$0xff] }
  0x68   : > { %1384 = vmatpush.bf16.msra.mxu0 %v2311_v4  ;;  %v1314_v4 = vpack.c.bf16 %v2159_v0, %v624_v36 }
  0x69   : > { %1156 = vmatpush.bf16.msra.mxu2 %v2294_v1 }
  0x6a   : > { %1271 = vmatpush.bf16.msra.mxu3 %v2302_v3  ;;  %1546 = vmatpush.bf16.msra.mxu1 %v2318_v6  ;;  %v1200_v3 = vpack.c.bf16 %v2103_v43, %v2576_v45 }
  0x6c   : > { %1385 = vmatpush.bf16.msra.mxu0 %v2310_v8 }
  0x6d   : > { %1157 = vmatpush.bf16.msra.mxu2 %v2293_v5 }
  0x6e   : > { %1272 = vmatpush.bf16.msra.mxu3 %v2301_v7  ;;  %1547 = vmatpush.bf16.msra.mxu1 %v2317_v9 }
  0x70   : > { %1386 = vmatpush.bf16.msra.mxu0 %v2309_v13 }
  0x71   : > { %1158 = vmatpush.bf16.msra.mxu2 %v2292_v10 }
  0x72   : > { %1273 = vmatpush.bf16.msra.mxu3 %v2300_v12  ;;  %1548 = vmatpush.bf16.msra.mxu1 %v2316_v15 }
  0x74   : > { %1387 = vmatpush.bf16.msra.mxu0 %v2308_v29  ;;  %712 = vmatmul.bf16.gmra.mxu2 %v627_v31 }
  0x75   : > { %1054 = vmatmul.bf16.gmra.mxu1 %v969_v32 }
  0x77   : > { %826 = vmatmul.bf16.gmra.mxu3 %v741_v33  ;;  %940 = vmatmul.bf16.gmra.mxu0 %v855_v34 }
  0x84   : > { %717 = vmatmul.bf16.gmra.mxu2 %v628_v51 }
  0x85   : > { %1059 = vmatmul.bf16.gmra.mxu1 %v970_v54 }
  0x87   : > { %831 = vmatmul.bf16.gmra.mxu3 %v742_v55  ;;  %945 = vmatmul.bf16.gmra.mxu0 %v856_v56 }
  0x94   : > { %1159 = vmatmul.bf16.vlgmr.msra.gmra.mxu2 %v1082_v57 }
  0x95   : > { %1549 = vmatmul.bf16.vlgmr.msra.gmra.mxu1 %v2678_v30 }
  0x97   : > { %1274 = vmatmul.bf16.vlgmr.msra.gmra.mxu3 %v1197_v58  ;;  %1388 = vmatmul.bf16.vlgmr.msra.gmra.mxu0 %v1311_v59 }
  0xa4   : > { %1164 = vmatmul.bf16.gmra.mxu2 %v1083_v60 }
  0xa5   : > { %1554 = vmatmul.bf16.gmra.mxu1 %v2743_v2 }
  0xa7   : > { %1279 = vmatmul.bf16.gmra.mxu3 %v1198_v61  ;;  %1393 = vmatmul.bf16.gmra.mxu0 %v1312_v62 }
  0xb1   : > { %v520_v47 = vpop.f32.mrf.mxu0 }
  0xb2   : > { %v597_v26 = vpop.f32.mrf.mxu1 }
  0xb3   : > { %v598_v17 = vadd.f32 %v597_v26, %v520_v47 }
  0xb4   : > { %1169 = vmatmul.bf16.gmra.mxu2 %v1084_v20 }
  0xb5   : > { %1559 = vmatmul.bf16.gmra.mxu1 %v855_v34 }
  0xb7   : > { %1284 = vmatmul.bf16.gmra.mxu3 %v1199_v46  ;;  %1398 = vmatmul.bf16.gmra.mxu0 %v1313_v21  ;;  %v530_v52 = vpop.f32.mrf.mxu2 }
  0xb9   : > { %v522_v22 = vpop.f32.mrf.mxu0 }
  0xba   : > { %v607_v53 = vpop.f32.mrf.mxu3  ;;  %v599_v30 = vpop.f32.mrf.mxu1 }
  0xbb   : > { %v2815_v11 = vadd.f32 %v607_v53, %v530_v52  ;;  %v600_v49 = vadd.f32 %v599_v30, %v522_v22 }
  0xbf   : > { %v532_v63 = vpop.f32.mrf.mxu2 }
  0xc1   : > { %v525_v5 = vpop.f32.mrf.mxu0 }
  0xc2   : > { %v609_v18 = vpop.f32.mrf.mxu3  ;;  %v602_v2 = vpop.f32.mrf.mxu1 }
  0xc3   : > { %v610_v1 = vadd.f32 %v609_v18, %v532_v63  ;;  %v603_v6 = vadd.f32 %v602_v2, %v525_v5 }
  0xc4   : > { %1174 = vmatmul.bf16.gmra.mxu2 %v1085_v44 }
  0xc5   : > { %1564 = vmatmul.bf16.gmra.mxu1 %v856_v56 }
  0xc7   : > { %1289 = vmatmul.bf16.gmra.mxu3 %v1200_v3  ;;  %1403 = vmatmul.bf16.gmra.mxu0 %v1314_v4  ;;  %v535_v7 = vpop.f32.mrf.mxu2 }
  0xc9   : > { %v527_v12 = vpop.f32.mrf.mxu0 }
  0xca   : > { %v612_v8 = vpop.f32.mrf.mxu3  ;;  %v604_v10 = vpop.f32.mrf.mxu1 }
  0xcb   : > { %v613_v9 = vadd.f32 %v612_v8, %v535_v7  ;;  %v605_v13 = vadd.f32 %v604_v10, %v527_v12 }
  0xcf   : > { %v537_v14 = vpop.f32.mrf.mxu2 }
  0xd2   : > { %v614_v15 = vpop.f32.mrf.mxu3  ;;  %v1045_v16 = vpop.f32.mrf.mxu1 }
  0xd3   : > { %v615_v50 = vadd.f32 %v614_v15, %v537_v14 }
  0xd4   : > { %v931_v19 = vpop.f32.mrf.mxu0 }
  0xd7   : > { %v703_v23 = vpop.f32.mrf.mxu2 }
  0xd8   : > { %v723_v45 = vadd.f32 %v703_v23, %v598_v17 }
  0xda   : > { %v817_v24 = vpop.f32.mrf.mxu3  ;;  %v1047_v25 = vpop.f32.mrf.mxu1 }
  0xdb   : > { %v837_v27 = vadd.f32 %v817_v24, %v723_v45 }
  0xdc   : > { %v933_v28 = vpop.f32.mrf.mxu0 }
  0xdd   : > { %v951_v29 = vadd.f32 %v931_v19, %v837_v27 }
  0xdf   : > { %v1065_v31 = vadd.f32 %v1045_v16, %v951_v29  ;;  %v705_v32 = vpop.f32.mrf.mxu2 }
  0xe0   : > { %v724_v33 = vadd.f32 %v705_v32, %v600_v49 }
  0xe2   : > { %v819_v34 = vpop.f32.mrf.mxu3  ;;  %v1050_v35 = vpop.f32.mrf.mxu1 }
  0xe3   : > { %v838_v36 = vadd.f32 %v819_v34, %v724_v33 }
  0xe4   : > { %v936_v37 = vpop.f32.mrf.mxu0 }
  0xe5   : > { %v952_v38 = vadd.f32 %v933_v28, %v838_v36 }
  0xe7   : > { %v1066_v39 = vadd.f32 %v1047_v25, %v952_v38  ;;  %v708_v40 = vpop.f32.mrf.mxu2 }
  0xe8   : > { %v725_v41 = vadd.f32 %v708_v40, %v603_v6 }
  0xea   : > { %v822_v48 = vpop.f32.mrf.mxu3  ;;  %v1052_v51 = vpop.f32.mrf.mxu1 }
  0xeb   : > { %v839_v54 = vadd.f32 %v822_v48, %v725_v41 }
  0xec   : > { %v938_v55 = vpop.f32.mrf.mxu0 }
  0xed   : > { %v953_v56 = vadd.f32 %v936_v37, %v839_v54 }
  0xef   : > { %v2822_v57 = vadd.f32 %v1050_v35, %v953_v56  ;;  %v710_v58 = vpop.f32.mrf.mxu2 }
  0xf0   : > { %v726_v59 = vadd.f32 %v710_v58, %v605_v13 }
  0xf2   : > { %v824_v60 = vpop.f32.mrf.mxu3  ;;  %v1055_v61 = vpop.f32.mrf.mxu1 }
  0xf3   : > { %v840_v62 = vadd.f32 %v824_v60, %v726_v59 }
  0xf4   : > { %v941_v20 = vpop.f32.mrf.mxu0 }
  0xf5   : > { %v954_v26 = vadd.f32 %v938_v55, %v840_v62 }
  0xf7   : > { %v2824_v46 = vadd.f32 %v1052_v51, %v954_v26  ;;  %v713_v21 = vpop.f32.mrf.mxu2 }
  0xf8   : > { %v727_v47 = vadd.f32 %v713_v21, %v2815_v11 }
  0xfa   : > { %v827_v17 = vpop.f32.mrf.mxu3  ;;  %v1057_v52 = vpop.f32.mrf.mxu1 }
  0xfb   : > { %v841_v53 = vadd.f32 %v827_v17, %v727_v47 }
  0xfc   : > { %v943_v30 = vpop.f32.mrf.mxu0 }
  0xfd   : > { %v955_v22 = vadd.f32 %v941_v20, %v841_v53 }
  0xff   : > { %v2827_v49 = vadd.f32 %v1055_v61, %v955_v22  ;;  %v715_v42 = vpop.f32.mrf.mxu2 }
 0x100   : > { %v728_v43 = vadd.f32 %v715_v42, %v610_v1 }
 0x102   : > { %v829_v63 = vpop.f32.mrf.mxu3  ;;  %v1060_v0 = vpop.f32.mrf.mxu1 }
 0x103   : > { %v842_v18 = vadd.f32 %v829_v63, %v728_v43 }
 0x104   : > { %v946_v44 = vpop.f32.mrf.mxu0 }
 0x105   : > { %v956_v2 = vadd.f32 %v943_v30, %v842_v18 }
 0x107   : > { %v2829_v3 = vadd.f32 %v1057_v52, %v956_v2  ;;  %v718_v4 = vpop.f32.mrf.mxu2 }
 0x108   : > { %v729_v5 = vadd.f32 %v718_v4, %v613_v9 }
 0x10a   : > { %v832_v11 = vpop.f32.mrf.mxu3  ;;  %v1062_v6 = vpop.f32.mrf.mxu1 }
 0x10b   : > { %v843_v7 = vadd.f32 %v832_v11, %v729_v5 }
 0x10c   : > { %v948_v8 = vpop.f32.mrf.mxu0 }
 0x10d   : > { %v957_v10 = vadd.f32 %v946_v44, %v843_v7 }
 0x10f   : > { %v2831_v12 = vadd.f32 %v1060_v0, %v957_v10  ;;  %v720_v13 = vpop.f32.mrf.mxu2 }
 0x110   : > { %v730_v1 = vadd.f32 %v720_v13, %v615_v50 }
 0x112   : > { %v834_v14 = vpop.f32.mrf.mxu3  ;;  %v1550_v15 = vpop.f32.mrf.mxu1 }
 0x113   : > { %v844_v16 = vadd.f32 %v834_v14, %v730_v1  ;;  %1570 = vst [vmem:[%s2425_s19] sm:$0xff] %v1550_v15 }
 0x114   : > { %v1389_v19 = vpop.f32.mrf.mxu0 }
 0x115   : > { %v958_v23 = vadd.f32 %v948_v8, %v844_v16 }
 0x117   : > { %v2834_v45 = vadd.f32 %v1062_v6, %v958_v23  ;;  %v1160_v9 = vpop.f32.mrf.mxu2 }
 0x118   : > { %v1180_v24 = vadd.f32 %v1160_v9, %v1065_v31 }
 0x11a   : > { %v1275_v25 = vpop.f32.mrf.mxu3  ;;  %v1552_v27 = vpop.f32.mrf.mxu1 }
 0x11b   : > { %v1295_v28 = vadd.f32 %v1275_v25, %v1180_v24  ;;  %1571 = vst [vmem:[%s2425_s19 + $0x8] sm:$0xff] %v1552_v27  ;;  %v1596_v44 = vmul.f32 %v1552_v27, %v1552_v27  ;;  %v1579_v5 = vadd.f32 %v1552_v27, %v1550_v15 }
 0x11c   : > { %v1391_v29 = vpop.f32.mrf.mxu0 }
 0x11d   : > { %v1409_v32 = vadd.f32 %v1389_v19, %v1295_v28 }
 0x11f   : > { %1417 = vst [vmem:[%s2420_s16] sm:$0xff] %v1409_v32  ;;  %v1162_v50 = vpop.f32.mrf.mxu2  ;;  %v1442_v40 = vmul.f32 %v1409_v32, %v1409_v32 }
 0x120   : > { %v1181_v33 = vadd.f32 %v1162_v50, %v1066_v39 }
 0x122   : > { %v1277_v34 = vpop.f32.mrf.mxu3  ;;  %v1555_v35 = vpop.f32.mrf.mxu1 }
 0x123   : > { %v1296_v36 = vadd.f32 %v1277_v34, %v1181_v33  ;;  %1572 = vst [vmem:[%s2425_s19 + $0x10] sm:$0xff] %v1555_v35  ;;  %v1597_v4 = vmul.f32 %v1555_v35, %v1555_v35  ;;  %v1580_v1 = vadd.f32 %v1579_v5, %v1555_v35 }
 0x124   : > { %v1394_v37 = vpop.f32.mrf.mxu0 }
 0x125   : > { %v1410_v38 = vadd.f32 %v1391_v29, %v1296_v36 }
 0x127   : > { %1418 = vst [vmem:[%s2420_s16 + $0x8] sm:$0xff] %v1410_v38  ;;  %v1426_v31 = vadd.f32 %v1410_v38, %v1409_v32  ;;  %v1443_v41 = vmul.f32 %v1410_v38, %v1410_v38  ;;  %v1165_v48 = vpop.f32.mrf.mxu2 }
 0x128   : > { %v1182_v54 = vadd.f32 %v1165_v48, %v2822_v57 }
 0x129   : > { %v1450_v51 = vadd.f32 %v1443_v41, %v1442_v40 }
 0x12a   : > { %v1280_v55 = vpop.f32.mrf.mxu3  ;;  %v1557_v56 = vpop.f32.mrf.mxu1 }
 0x12b   : > { %v1297_v39 = vadd.f32 %v1280_v55, %v1182_v54  ;;  %1573 = vst [vmem:[%s2425_s19 + $0x18] sm:$0xff] %v1557_v56  ;;  %v1598_v8 = vmul.f32 %v1557_v56, %v1557_v56  ;;  %v1581_v24 = vadd.f32 %v1580_v1, %v1557_v56 }
 0x12c   : > { %v1396_v58 = vpop.f32.mrf.mxu0 }
 0x12d   : > { %v1411_v59 = vadd.f32 %v1394_v37, %v1297_v39 }
 0x12f   : > { %1419 = vst [vmem:[%s2420_s16 + $0x10] sm:$0xff] %v1411_v59  ;;  %v1427_v60 = vadd.f32 %v1426_v31, %v1411_v59  ;;  %v1444_v61 = vmul.f32 %v1411_v59, %v1411_v59  ;;  %v1167_v62 = vpop.f32.mrf.mxu2 }
 0x130   : > { %v1183_v26 = vadd.f32 %v1167_v62, %v2824_v46  ;;  %v1595_v46 = vmul.f32 %v1550_v15, %v1550_v15 }
 0x131   : > { %v1451_v20 = vadd.f32 %v1450_v51, %v1444_v61 }
 0x132   : > { %v1282_v21 = vpop.f32.mrf.mxu3  ;;  %v1560_v47 = vpop.f32.mrf.mxu1  ;;  %v1603_v7 = vadd.f32 %v1596_v44, %v1595_v46 }
 0x133   : > { %v1298_v17 = vadd.f32 %v1282_v21, %v1183_v26  ;;  %1574 = vst [vmem:[%s2425_s19 + $0x20] sm:$0xff] %v1560_v47  ;;  %v1599_v23 = vmul.f32 %v1560_v47, %v1560_v47  ;;  %v1582_v27 = vadd.f32 %v1581_v24, %v1560_v47 }
 0x134   : > { %v1399_v52 = vpop.f32.mrf.mxu0  ;;  %v1604_v19 = vadd.f32 %v1603_v7, %v1597_v4 }
 0x135   : > { %v1412_v57 = vadd.f32 %v1396_v58, %v1298_v17 }
 0x136   : > { %v1605_v15 = vadd.f32 %v1604_v19, %v1598_v8 }
 0x137   : > { %1420 = vst [vmem:[%s2420_s16 + $0x18] sm:$0xff] %v1412_v57  ;;  %v1428_v53 = vadd.f32 %v1427_v60, %v1412_v57  ;;  %v1445_v30 = vmul.f32 %v1412_v57, %v1412_v57  ;;  %v1170_v22 = vpop.f32.mrf.mxu2 }
 0x138   : > { %v1184_v43 = vadd.f32 %v1170_v22, %v2827_v49  ;;  %v1606_v32 = vadd.f32 %v1605_v15, %v1599_v23  ;;  %v1425_v23 = vld [vmem:[%s2892_s8] sm:$0x1] }
 0x139   : > { %v1452_v42 = vadd.f32 %v1451_v20, %v1445_v30 }
 0x13a   : > { %v1285_v63 = vpop.f32.mrf.mxu3  ;;  %v1562_v0 = vpop.f32.mrf.mxu1 }
 0x13b   : > { %v1299_v18 = vadd.f32 %v1285_v63, %v1184_v43  ;;  %1575 = vst [vmem:[%s2425_s19 + $0x28] sm:$0xff] %v1562_v0  ;;  %v1600_v28 = vmul.f32 %v1562_v0, %v1562_v0  ;;  %v1583_v50 = vadd.f32 %v1582_v27, %v1562_v0  ;;  %v1578_v0 = vld [vmem:[%s2893_s9] sm:$0x1] }
 0x13c   : > { %v1401_v10 = vpop.f32.mrf.mxu0 }
 0x13d   : > { %v1413_v2 = vadd.f32 %v1399_v52, %v1299_v18 }
 0x13f   : > { %1421 = vst [vmem:[%s2420_s16 + $0x20] sm:$0xff] %v1413_v2  ;;  %v1429_v11 = vadd.f32 %v1428_v53, %v1413_v2  ;;  %v1446_v6 = vmul.f32 %v1413_v2, %v1413_v2  ;;  %v1172_v13 = vpop.f32.mrf.mxu2 }
 0x140   : > { %v1185_v14 = vadd.f32 %v1172_v13, %v2829_v3  ;;  %v1607_v3 = vadd.f32 %v1606_v32, %v1600_v28 }
 0x141   : > { %v1453_v49 = vadd.f32 %v1452_v42, %v1446_v6 }
 0x142   : > { %v1287_v16 = vpop.f32.mrf.mxu3  ;;  %v1565_v9 = vpop.f32.mrf.mxu1 }
 0x143   : > { %v1300_v25 = vadd.f32 %v1287_v16, %v1185_v14  ;;  %1576 = vst [vmem:[%s2425_s19 + $0x30] sm:$0xff] %v1565_v9  ;;  %v1601_v35 = vmul.f32 %v1565_v9, %v1565_v9  ;;  %v1584_v38 = vadd.f32 %v1583_v50, %v1565_v9 }
 0x144   : > { %v1404_v41 = vpop.f32.mrf.mxu0 }
 0x145   : > { %v1414_v29 = vadd.f32 %v1401_v10, %v1300_v25  ;;  %v1608_v51 = vadd.f32 %v1607_v3, %v1601_v35  ;;  %v1441_v25 = vld [vmem:[%s2892_s8 + $0x1] sm:$0x1] }
 0x147   : > { %1422 = vst [vmem:[%s2420_s16 + $0x28] sm:$0xff] %v1414_v29  ;;  %v1430_v33 = vadd.f32 %v1429_v11, %v1414_v29  ;;  %v1447_v34 = vmul.f32 %v1414_v29, %v1414_v29  ;;  %v1175_v36 = vpop.f32.mrf.mxu2 }
 0x148   : > { %v1186_v40 = vadd.f32 %v1175_v36, %v2831_v12 }
 0x149   : > { %v1454_v37 = vadd.f32 %v1453_v49, %v1447_v34 }
 0x14a   : > { %v1290_v31 = vpop.f32.mrf.mxu3  ;;  %v1567_v48 = vpop.f32.mrf.mxu1 }
 0x14b   : > { %v1301_v54 = vadd.f32 %v1290_v31, %v1186_v40  ;;  %1577 = vst [vmem:[%s2425_s19 + $0x38] sm:$0xff] %v1567_v48  ;;  %v1585_v55 = vadd.f32 %v1584_v38, %v1567_v48  ;;  %v1602_v56 = vmul.f32 %v1567_v48, %v1567_v48 }
 0x14c   : > { %v1406_v22 = vpop.f32.mrf.mxu0 }
 0x14d   : > { %v1415_v39 = vadd.f32 %v1404_v41, %v1301_v54  ;;  %v1586_v58 = vrot.slane %v1585_v55, 4  ;;  %v1609_v59 = vadd.f32 %v1608_v51, %v1602_v56 }
 0x14f   : > { %1423 = vst [vmem:[%s2420_s16 + $0x30] sm:$0xff] %v1415_v39  ;;  %v1431_v60 = vadd.f32 %v1430_v33, %v1415_v39  ;;  %v1448_v61 = vmul.f32 %v1415_v39, %v1415_v39  ;;  %v1587_v62 = vadd.f32 %v1586_v58, %v1585_v55  ;;  %v1610_v20 = vrot.slane %v1609_v59, 4  ;;  %v1177_v26 = vpop.f32.mrf.mxu2 }
 0x150   : > { %v1187_v17 = vadd.f32 %v1177_v26, %v2834_v45  ;;  %v1594_v45 = vld [vmem:[%s2893_s9 + $0x1] sm:$0x1] }
 0x151   : > { %v1455_v21 = vadd.f32 %v1454_v37, %v1448_v61  ;;  %v1588_v12 = vrot.slane %v1587_v62, 2  ;;  %v1611_v47 = vadd.f32 %v1610_v20, %v1609_v59 }
 0x152   : > { %v1292_v57 = vpop.f32.mrf.mxu3 }
 0x153   : > { %v1589_v52 = vadd.f32 %v1588_v12, %v1587_v62  ;;  %v1612_v53 = vrot.slane %v1611_v47, 2  ;;  %v1302_v30 = vadd.f32 %v1292_v57, %v1187_v17 }
 0x155   : > { %v1590_v42 = vrot.slane %v1589_v52, 1  ;;  %v1613_v43 = vadd.f32 %v1612_v53, %v1611_v47  ;;  %v1416_v63 = vadd.f32 %v1406_v22, %v1302_v30 }
 0x157   : > { %v1591_v18 = vadd.f32 %v1590_v42, %v1589_v52  ;;  %v1614_v46 = vrot.slane %v1613_v43, 1  ;;  %1424 = vst [vmem:[%s2420_s16 + $0x38] sm:$0xff] %v1416_v63  ;;  %v1432_v44 = vadd.f32 %v1431_v60, %v1416_v63  ;;  %v1449_v2 = vmul.f32 %v1416_v63, %v1416_v63 }
 0x159   : > { %v1592_v4 = vadd.f32 %v1591_v18, %v1578_v0  ;;  %v1615_v5 = vadd.f32 %v1614_v46, %v1613_v43  ;;  %v1433_v11 = vrot.slane %v1432_v44, 4  ;;  %v1456_v6 = vadd.f32 %v1455_v21, %v1449_v2 }
 0x15b   : > { %1593 = vst [vmem:[%s2893_s9] sm:$0x1] %v1592_v4  ;;  %v1616_v7 = vadd.f32 %v1615_v5, %v1594_v45  ;;  %v1434_v8 = vadd.f32 %v1433_v11, %v1432_v44  ;;  %v1457_v10 = vrot.slane %v1456_v6, 4 }
 0x15d   : > { %1617 = vst [vmem:[%s2893_s9 + $0x1] sm:$0x1] %v1616_v7  ;;  %v1435_v13 = vrot.slane %v1434_v8, 2  ;;  %v1458_v1 = vadd.f32 %v1457_v10, %v1456_v6 }
 0x15f   : > { %v1436_v49 = vadd.f32 %v1435_v13, %v1434_v8  ;;  %v1459_v14 = vrot.slane %v1458_v1, 2 }
 0x161   : > { %v1437_v16 = vrot.slane %v1436_v49, 1  ;;  %v1460_v19 = vadd.f32 %v1459_v14, %v1458_v1 }
 0x163   : > { %v1438_v9 = vadd.f32 %v1437_v16, %v1436_v49  ;;  %v1461_v24 = vrot.slane %v1460_v19, 1 }
 0x165   : > { %v1439_v15 = vadd.f32 %v1438_v9, %v1425_v23  ;;  %v1462_v27 = vadd.f32 %v1461_v24, %v1460_v19 }
 0x167   : > { %1440 = vst [vmem:[%s2892_s8] sm:$0x1] %v1439_v15  ;;  %v1463_v28 = vadd.f32 %v1462_v27, %v1441_v25 }
 0x169   : > { %1464 = vst [vmem:[%s2892_s8 + $0x1] sm:$0x1] %v1463_v28 }
 0x16a PF: > { %s20_s30 = sadd.s32 1, %s2356_s30  }
 0x16b   : > { %p17_p5 = scmp.ge.s32.totalorder %s20_s30, 4  }
 0x16d   :  { %19 = sbr.rel (!%p17_p5) target bundleno = 1 (0x1), region = 125 }

// kernel: residual_part_forward.9
= control target key start
LH: loop header
LB: loop body
LE: loop exit
PB: predicated region body
PF: predicated region fallthrough
CT: control target
= control target key end

     0   :  { %s2245_s30 = smov 0   ;;  %s2742_s0 = inlined_call_operand.vmem [shape: f32[2,8,8,128], index: 0, kind: input, shape index: {}]   ;;  %s2743_s1 = inlined_call_operand.vmem [shape: f32[2,8,8,128], index: 1, kind: input, shape index: {}]   ;;  %s2744_s2 = inlined_call_operand.vmem [shape: f32[1,128], index: 2, kind: input, shape index: {}]   ;;  %s2745_s3 = inlined_call_operand.vmem [shape: f32[1,128], index: 3, kind: input, shape index: {}]   ;;  %s2746_s4 = inlined_call_operand.vmem [shape: f32[1,128], index: 4, kind: input, shape index: {}]   ;;  %s2747_s5 = inlined_call_operand.vmem [shape: f32[1,128], index: 5, kind: input, shape index: {}]   ;;  %s2748_s6 = inlined_call_operand.vmem [shape: bf16[9,128,128], index: 6, kind: input, shape index: {}]   ;;  %s2749_s7 = inlined_call_operand.vmem [shape: f32[2,8,8,128], index: 7, kind: output, shape index: {0}]   ;;  %s2750_s8 = inlined_call_operand.vmem [shape: f32[2,8,8,128], index: 8, kind: output, shape index: {1}]   ;;  %s2751_s9 = inlined_call_operand.vmem [shape: f32[2,128], index: 9, kind: output, shape index: {2}]  }
   0x1 LB: > { %s1649_s10 = sadd.s32 4294967295, %s2192_s30   ;;  %p1653_p0 = scmp.ge.s32.totalorder %s2192_s30, 1  ;;  %s2192_s30 = sphi %s2245_s30, %s20_s30  }
   0x2   : > { %p297_p1 = scmp.lt.s32.totalorder %s2192_s30, 3 }
   0x4   : > { %p298_p2 = pnand %p1653_p0, %p297_p1 }
   0x5   : > { %p343_p3 = scmp.lt.s32.totalorder (!%p298_p2), %s1649_s10, 1  ;;  %p1662_p4 = scmp.ne.s32.totalorder (!%p298_p2), %s1649_s10, 0 }
   0x6   : > { %301 = sbr.rel (%p298_p2) target bundleno = 376 (0x178), region = 48 }
   0xb   : > { %s344_s11 = scalar_select %p343_p3, %s1649_s10, 1 }
   0xc   : > { %366 = sbr.rel (%p1662_p4) target bundleno = 39 (0x27), region = 52 }
   0xd   : > { %s2081_s12 = sshll.u32 %s344_s11, 6 }
   0xe   : > { %s2256_s15 = scalar_lea.vmem %s2742_s0, %s2081_s12  ;;  %s2261_s18 = scalar_lea.vmem %s2743_s1, %s2081_s12 }
   0xf   : > { %s2266_s21 = scalar_lea.vmem %s2749_s7, %s2081_s12  ;;  %s2271_s24 = scalar_lea.vmem %s2750_s8, %s2081_s12 }
  0x11   : > { %v2194_v0 = vmov 0.0  }
  0x12   : > { %367 = vst [vmem:[%s2751_s9] sm:$0x3] %v2194_v0 }
  0x13   : > { %368 = vst [vmem:[#allocation2] sm:$0xff] %v2194_v0 }
  0x14   : > { %369 = vst [vmem:[#allocation2 + $0x8] sm:$0x3] %v2194_v0 }
  0x15   : > { %370 = vst [vmem:[#allocation2 + $0x10] sm:$0xff] %v2194_v0 }
  0x16   : > { %371 = vst [vmem:[#allocation2 + $0x18] sm:$0x3] %v2194_v0 }
  0x17   : > { %372 = vst [vmem:[#allocation2 + $0x20] sm:$0xff] %v2194_v0 }
  0x18   : > { %373 = vst [vmem:[#allocation2 + $0x28] sm:$0x3] %v2194_v0 }
  0x19   : > { %374 = vst [vmem:[#allocation2 + $0x30] sm:$0xff] %v2194_v0 }
  0x1a   : > { %375 = vst [vmem:[#allocation2 + $0x38] sm:$0x3] %v2194_v0 }
  0x1b   : > { %376 = vst [vmem:[#allocation2 + $0x40] sm:$0xff] %v2194_v0 }
  0x1c   : > { %377 = vst [vmem:[#allocation2 + $0x48] sm:$0x3] %v2194_v0 }
  0x1d   : > { %378 = vst [vmem:[#allocation2 + $0x50] sm:$0xff] %v2194_v0 }
  0x1e   : > { %379 = vst [vmem:[#allocation2 + $0x58] sm:$0x3] %v2194_v0 }
  0x1f   : > { %380 = vst [vmem:[#allocation2 + $0x60] sm:$0xff] %v2194_v0 }
  0x20   : > { %381 = vst [vmem:[#allocation2 + $0x68] sm:$0x3] %v2194_v0 }
  0x21   : > { %382 = vst [vmem:[#allocation2 + $0x70] sm:$0xff] %v2194_v0 }
  0x22   : > { %383 = vst [vmem:[#allocation2 + $0x78] sm:$0x3] %v2194_v0 }
  0x23   : > { %384 = vst [vmem:[#allocation2 + $0x80] sm:$0xff] %v2194_v0 }
  0x24   : > { %385 = vst [vmem:[#allocation2 + $0x88] sm:$0x3] %v2194_v0 }
  0x25   : > { %386 = vst [vmem:[#allocation2 + $0x90] sm:$0xff] %v2194_v0 }
  0x26   : > { %387 = vst [vmem:[#allocation2 + $0x98] sm:$0x3] %v2194_v0 }
  0x27 PF: > { %v2100_v1 = vld [vmem:[%s2748_s6 + $0x78] sm:$0xff]  ;;  %v2099_v3 = vld [vmem:[%s2748_s6 + $0x70] sm:$0xff]  ;;  %v2098_v6 = vld [vmem:[%s2748_s6 + $0x68] sm:$0xff] }
  0x28   : > { %v2108_v2 = vld [vmem:[%s2748_s6 + $0xb8] sm:$0xff]  ;;  %2157 = vmatpush.bf16.msra.mxu1 %v2100_v1  ;;  %590 = vmatpush.bf16.msra.mxu0 %v2100_v1  ;;  %v2107_v4 = vld [vmem:[%s2748_s6 + $0xb0] sm:$0xff]  ;;  %v2106_v7 = vld [vmem:[%s2748_s6 + $0xa8] sm:$0xff] }
  0x29   : > { %773 = vmatpush.bf16.msra.mxu2 %v2108_v2  ;;  %v2116_v5 = vld [vmem:[%s2748_s6 + $0xf8] sm:$0xff]  ;;  %v2115_v8 = vld [vmem:[%s2748_s6 + $0xf0] sm:$0xff]  ;;  %v392_v10 = vld [vmem:[%s2256_s15 + $0x20] sm:$0xff] }
  0x2a   : > { %887 = vmatpush.bf16.msra.mxu3 %v2116_v5  ;;  %v391_v9 = vld [vmem:[%s2256_s15 + $0x18] sm:$0xff]  ;;  %v2305_v11 = vld [vmem:[%s2744_s2] ss:$0 sm:$0xff]  ;;  %v2114_v18 = vld [vmem:[%s2748_s6 + $0xe8] sm:$0xff] }
  0x2b   : > { %v2310_v12 = vld [vmem:[%s2745_s3] ss:$0 sm:$0xff]  ;;  %v423_v13 = vld [vmem:[%s2261_s18 + $0x18] sm:$0xff]  ;;  %v403_v14 = vmul.f32 %v2305_v11, %v391_v9  ;;  %v404_v15 = vmul.f32 %v2305_v11, %v392_v10  ;;  %v393_v38 = vld [vmem:[%s2256_s15 + $0x28] sm:$0xff] }
  0x2c   : > { %2158 = vmatpush.bf16.msra.mxu1 %v2099_v3  ;;  %591 = vmatpush.bf16.msra.mxu0 %v2099_v3  ;;  %v424_v16 = vld [vmem:[%s2261_s18 + $0x20] sm:$0xff]  ;;  %v2096_v33 = vld [vmem:[%s2748_s6 + $0x58] sm:$0xff]  ;;  %v394_v39 = vld [vmem:[%s2256_s15 + $0x30] sm:$0xff]  ;;  %v405_v42 = vmul.f32 %v2305_v11, %v393_v38 }
  0x2d   : > { %774 = vmatpush.bf16.msra.mxu2 %v2107_v4  ;;  %v2319_v17 = vld [vmem:[%s2746_s4] ss:$0 sm:$0xff]  ;;  %v415_v20 = vadd.f32 %v2310_v12, %v403_v14  ;;  %v416_v21 = vadd.f32 %v2310_v12, %v404_v15  ;;  %v2104_v36 = vld [vmem:[%s2748_s6 + $0x98] sm:$0xff]  ;;  %v406_v43 = vmul.f32 %v2305_v11, %v394_v39  ;;  %v425_v44 = vld [vmem:[%s2261_s18 + $0x28] sm:$0xff] }
  0x2e   : > { %888 = vmatpush.bf16.msra.mxu3 %v2115_v8  ;;  %v2097_v19 = vld [vmem:[%s2748_s6 + $0x60] sm:$0xff]  ;;  %v435_v22 = vmul.f32 %v2319_v17, %v423_v13  ;;  %v436_v25 = vmul.f32 %v2319_v17, %v424_v16  ;;  %v426_v45 = vld [vmem:[%s2261_s18 + $0x30] sm:$0xff]  ;;  %v2112_v47 = vld [vmem:[%s2748_s6 + $0xd8] sm:$0xff]  ;;  %v437_v48 = vmul.f32 %v2319_v17, %v425_v44  ;;  %v417_v52 = vadd.f32 %v2310_v12, %v405_v42 }
  0x2f   : > { %v2333_v23 = vld [vmem:[%s2747_s5] ss:$0 sm:$0xff]  ;;  %v438_v49 = vmul.f32 %v2319_v17, %v426_v45  ;;  %v2095_v50 = vld [vmem:[%s2748_s6 + $0x50] sm:$0xff]  ;;  %v418_v53 = vadd.f32 %v2310_v12, %v406_v43  ;;  %v389_v54 = vld [vmem:[%s2256_s15 + $0x8] sm:$0xff] }
  0x30   : > { %2159 = vmatpush.bf16.msra.mxu1 %v2098_v6  ;;  %592 = vmatpush.bf16.msra.mxu0 %v2098_v6  ;;  %v2105_v24 = vld [vmem:[%s2748_s6 + $0xa0] sm:$0xff]  ;;  %v443_v28 = vadd.f32 %v435_v22, %v415_v20  ;;  %v444_v31 = vadd.f32 %v436_v25, %v416_v21  ;;  %v390_v55 = vld [vmem:[%s2256_s15 + $0x10] sm:$0xff]  ;;  %v401_v57 = vmul.f32 %v2305_v11, %v389_v54  ;;  %v421_v59 = vld [vmem:[%s2261_s18 + $0x8] sm:$0xff] }
  0x31   : > { %775 = vmatpush.bf16.msra.mxu2 %v2106_v7  ;;  %v388_v26 = vld [vmem:[%s2256_s15] sm:$0xff]  ;;  %v2103_v56 = vld [vmem:[%s2748_s6 + $0x90] sm:$0xff]  ;;  %v402_v58 = vmul.f32 %v2305_v11, %v390_v55  ;;  %v445_v62 = vadd.f32 %v437_v48, %v417_v52  ;;  %v446_v63 = vadd.f32 %v438_v49, %v418_v53  ;;  %v433_v0 = vmul.f32 %v2319_v17, %v421_v59  ;;  %v2094_v5 = vld [vmem:[%s2748_s6 + $0x48] sm:$0xff] }
  0x32   : > { %v420_v27 = vld [vmem:[%s2261_s18] sm:$0xff]  ;;  %v400_v29 = vmul.f32 %v2305_v11, %v388_v26  ;;  %889 = vmatpush.bf16.msra.mxu3 %v2114_v18  ;;  %v455_v34 = vadd.f32 %v2333_v23, %v443_v28  ;;  %v456_v37 = vadd.f32 %v2333_v23, %v444_v31  ;;  %v422_v60 = vld [vmem:[%s2261_s18 + $0x10] sm:$0xff]  ;;  %v413_v2 = vadd.f32 %v2310_v12, %v401_v57  ;;  %v2102_v8 = vld [vmem:[%s2748_s6 + $0x88] sm:$0xff] }
  0x33   : > { %v432_v30 = vmul.f32 %v2319_v17, %v420_v27  ;;  %v2113_v32 = vld [vmem:[%s2748_s6 + $0xe0] sm:$0xff]  ;;  %v2111_v1 = vld [vmem:[%s2748_s6 + $0xd0] sm:$0xff]  ;;  %v414_v3 = vadd.f32 %v2310_v12, %v402_v58  ;;  %v434_v4 = vmul.f32 %v2319_v17, %v422_v60  ;;  %v457_v6 = vadd.f32 %v2333_v23, %v445_v62  ;;  %v2110_v14 = vld [vmem:[%s2748_s6 + $0xc8] sm:$0xff] }
  0x34   : > { %2160 = vmatpush.bf16.msra.mxu1 %v2097_v19  ;;  %593 = vmatpush.bf16.msra.mxu0 %v2097_v19  ;;  %v412_v35 = vadd.f32 %v2310_v12, %v400_v29  ;;  %v2357_v40 = vmax.f32 %v455_v34, 0.0  ;;  %v2363_v46 = vmax.f32 %v456_v37, 0.0  ;;  %v458_v7 = vadd.f32 %v2333_v23, %v446_v63  ;;  %v2093_v19 = vld [vmem:[%s2748_s6 + $0x40] sm:$0xff]  ;;  %v2092_v21 = vld [vmem:[%s2748_s6 + $0x38] sm:$0xff]  ;;  %v2139_v37 = vld [vmem:[%s2748_s6 + $0x1b0] sm:$0xff] }
  0x35   : > { %776 = vmatpush.bf16.msra.mxu2 %v2105_v24  ;;  %v441_v9 = vadd.f32 %v433_v0, %v413_v2  ;;  %v442_v10 = vadd.f32 %v434_v4, %v414_v3  ;;  %v2411_v13 = vmax.f32 %v457_v6, 0.0  ;;  %v513_v20 = vld [vmem:[#allocation2 + $0x1] sm:$0xff]  ;;  %v2124_v24 = vld [vmem:[%s2748_s6 + $0x138] sm:$0xff]  ;;  %v2147_v39 = vld [vmem:[%s2748_s6 + $0x1f0] sm:$0xff] }
  0x36   : > { %v440_v41 = vadd.f32 %v432_v30, %v412_v35  ;;  %890 = vmatpush.bf16.msra.mxu3 %v2113_v32  ;;  %471 = vst [vmem:[%s2266_s21 + $0x18] sm:$0xff] %v2357_v40  ;;  %v2416_v15 = vmax.f32 %v458_v7, 0.0  ;;  %v2101_v22 = vld [vmem:[%s2748_s6 + $0x80] sm:$0xff]  ;;  %v2140_v26 = vld [vmem:[%s2748_s6 + $0x1b8] sm:$0xff]  ;;  %v2444_v28 = vpack.c.bf16 %v2363_v46, %v2357_v40  ;;  %v2090_v38 = vld [vmem:[%s2748_s6 + $0x28] sm:$0xff] }
  0x37   : > { %472 = vst [vmem:[%s2266_s21 + $0x20] sm:$0xff] %v2363_v46  ;;  %v453_v16 = vadd.f32 %v2333_v23, %v441_v9  ;;  %v454_v18 = vadd.f32 %v2333_v23, %v442_v10  ;;  %v696_v25 = vld [vmem:[#allocation2 + $0x2] sm:$0xff]  ;;  %v2148_v35 = vld [vmem:[%s2748_s6 + $0x1f8] sm:$0xff]  ;;  %v2087_v58 = vld [vmem:[%s2748_s6 + $0x10] sm:$0xff] }
  0x38   : > { %2161 = vmatpush.bf16.msra.mxu1 %v2096_v33  ;;  %594 = vmatpush.bf16.msra.mxu0 %v2096_v33  ;;  %v452_v51 = vadd.f32 %v2333_v23, %v440_v41  ;;  %480 = vst [vmem:[#allocation2 + $0x41] sm:$0xff] %v2357_v40  ;;  %v2109_v32 = vld [vmem:[%s2748_s6 + $0xc0] sm:$0xff]  ;;  %v2091_v33 = vld [vmem:[%s2748_s6 + $0x30] sm:$0xff]  ;;  %v2122_v41 = vld [vmem:[%s2748_s6 + $0x128] sm:$0xff]  ;;  %v2517_v55 = vpack.c.bf16 %v2416_v15, %v2411_v13 }
  0x39   : > { %777 = vmatpush.bf16.msra.mxu2 %v2104_v36  ;;  %481 = vst [vmem:[#allocation2 + $0x51] sm:$0xff] %v2363_v46  ;;  %v2440_v27 = vmax.f32 %v453_v16, 0.0  ;;  %v2448_v30 = vmax.f32 %v454_v18, 0.0  ;;  %v2123_v36 = vld [vmem:[%s2748_s6 + $0x130] sm:$0xff]  ;;  %v2138_v42 = vld [vmem:[%s2748_s6 + $0x1a8] sm:$0xff]  ;;  %v2089_v44 = vld [vmem:[%s2748_s6 + $0x20] sm:$0xff] }
  0x3a   : > { %v2390_v61 = vmax.f32 %v452_v51, 0.0  ;;  %891 = vmatpush.bf16.msra.mxu3 %v2112_v47  ;;  %473 = vst [vmem:[%s2266_s21 + $0x28] sm:$0xff] %v2411_v13  ;;  %v2146_v47 = vld [vmem:[%s2748_s6 + $0x1e8] sm:$0xff]  ;;  %v2121_v48 = vld [vmem:[%s2748_s6 + $0x120] sm:$0xff]  ;;  %v2088_v51 = vld [vmem:[%s2748_s6 + $0x18] sm:$0xff] }
  0x3b   : > { %474 = vst [vmem:[%s2266_s21 + $0x30] sm:$0xff] %v2416_v15  ;;  %v2120_v54 = vld [vmem:[%s2748_s6 + $0x118] sm:$0xff]  ;;  %v2119_v59 = vld [vmem:[%s2748_s6 + $0x110] sm:$0xff]  ;;  %v2145_v62 = vld [vmem:[%s2748_s6 + $0x1e0] sm:$0xff] }
  0x3c   : > { %2162 = vmatpush.bf16.msra.mxu1 %v2095_v50  ;;  %595 = vmatpush.bf16.msra.mxu0 %v2095_v50  ;;  %468 = vst [vmem:[%s2266_s21] sm:$0xff] %v2390_v61  ;;  %v521_v29 = vpack.c.bf16 %v2390_v61, %v513_v20  ;;  %v2137_v50 = vld [vmem:[%s2748_s6 + $0x1a0] sm:$0xff]  ;;  %v2136_v60 = vld [vmem:[%s2748_s6 + $0x198] sm:$0xff]  ;;  %v2086_v63 = vld [vmem:[%s2748_s6 + $0x8] sm:$0xff] }
  0x3d   : > { %778 = vmatpush.bf16.msra.mxu2 %v2103_v56  ;;  %477 = vst [vmem:[#allocation2 + $0x11] sm:$0xff] %v2390_v61  ;;  %v2521_v56 = vpack.c.bf16 %v2448_v30, %v2440_v27  ;;  %v2118_v2 = vld [vmem:[%s2748_s6 + $0x108] sm:$0xff]  ;;  %v2135_v3 = vld [vmem:[%s2748_s6 + $0x190] sm:$0xff]  ;;  %v2144_v4 = vld [vmem:[%s2748_s6 + $0x1d8] sm:$0xff] }
  0x3e   : > { %892 = vmatpush.bf16.msra.mxu3 %v2111_v1  ;;  %482 = vst [vmem:[#allocation2 + $0x61] sm:$0xff] %v2411_v13  ;;  %v427_v6 = vld [vmem:[%s2261_s18 + $0x38] sm:$0xff]  ;;  %v2085_v10 = vld [vmem:[%s2748_s6] sm:$0xff] }
  0x3f   : > { %483 = vst [vmem:[#allocation2 + $0x71] sm:$0xff] %v2416_v15  ;;  %v2547_v1 = vld [vmem:[#allocation2 + $0x40] sm:$0xff]  ;;  %v439_v9 = vmul.f32 %v2319_v17, %v427_v6  ;;  %v2156_v17 = vld [vmem:[%s2748_s6 + $0x238] sm:$0xff] }
  0x40   : > { %2163 = vmatpush.bf16.msra.mxu1 %v2094_v5  ;;  %596 = vmatpush.bf16.msra.mxu0 %v2094_v5  ;;  %469 = vst [vmem:[%s2266_s21 + $0x8] sm:$0xff] %v2440_v27  ;;  %v395_v5 = vld [vmem:[%s2256_s15 + $0x38] sm:$0xff]  ;;  %v2117_v16 = vld [vmem:[%s2748_s6 + $0x100] sm:$0xff] }
  0x41   : > { %779 = vmatpush.bf16.msra.mxu2 %v2102_v8  ;;  %470 = vst [vmem:[%s2266_s21 + $0x10] sm:$0xff] %v2448_v30  ;;  %v407_v8 = vmul.f32 %v2305_v11, %v395_v5  ;;  %v485_v18 = vld [vmem:[#allocation2] sm:$0xff] }
  0x42   : > { %893 = vmatpush.bf16.msra.mxu3 %v2110_v14  ;;  %478 = vst [vmem:[#allocation2 + $0x21] sm:$0xff] %v2440_v27  ;;  %v2132_v14 = vld [vmem:[%s2748_s6 + $0x178] sm:$0xff]  ;;  %v2577_v20 = vld [vmem:[#allocation2 + $0x42] sm:$0xff] }
  0x43   : > { %479 = vst [vmem:[#allocation2 + $0x31] sm:$0xff] %v2448_v30  ;;  %v419_v11 = vadd.f32 %v2310_v12, %v407_v8 }
  0x44   : > { %2164 = vmatpush.bf16.msra.mxu1 %v2093_v19  ;;  %597 = vmatpush.bf16.msra.mxu0 %v2093_v19  ;;  %v2450_v31 = vld [vmem:[#allocation2 + $0x12] sm:$0xff] }
  0x45   : > { %780 = vmatpush.bf16.msra.mxu2 %v2101_v22  ;;  %v704_v34 = vpack.c.bf16 %v2450_v31, %v696_v25  ;;  %v2487_v43 = vld [vmem:[#allocation2 + $0x10] sm:$0xff]  ;;  %v447_v19 = vadd.f32 %v439_v9, %v419_v11  ;;  %v932_v25 = vpack.c.bf16 %v2440_v27, %v2390_v61  ;;  %v2134_v61 = vld [vmem:[%s2748_s6 + $0x188] sm:$0xff]  ;;  %v934_v27 = vpack.c.bf16 %v2411_v13, %v2363_v46  ;;  %v2129_v46 = vld [vmem:[%s2748_s6 + $0x160] sm:$0xff] }
  0x46   : > { %894 = vmatpush.bf16.msra.mxu3 %v2109_v32  ;;  %v2131_v22 = vld [vmem:[%s2748_s6 + $0x170] sm:$0xff]  ;;  %v2142_v13 = vld [vmem:[%s2748_s6 + $0x1c8] sm:$0xff] }
  0x47   : > { %608 = vmatmul.bf16.vlgmr.msra.gmra.mxu1 %v2444_v28  ;;  %598 = vmatmul.bf16.vlgmr.msra.gmra.mxu0 %v521_v29  ;;  %v459_v12 = vadd.f32 %v2333_v23, %v447_v19  ;;  %v2155_v29 = vld [vmem:[%s2748_s6 + $0x230] sm:$0xff]  ;;  %v2130_v23 = vld [vmem:[%s2748_s6 + $0x168] sm:$0xff] }
  0x48   : > { %667 = vmatpush.bf16.msrb.mxu1 %v2092_v21  ;;  %1001 = vmatpush.bf16.msrb.mxu0 %v2124_v24  ;;  %v2579_v21 = vld [vmem:[#allocation2 + $0x52] sm:$0xff]  ;;  %v493_v24 = vpack.c.bf16 %v2487_v43, %v485_v18 }
  0x49   : > { %1230 = vmatpush.bf16.msrb.mxu2 %v2140_v26  ;;  %v2492_v45 = vld [vmem:[#allocation2 + $0x20] sm:$0xff]  ;;  %v2590_v26 = vpack.c.bf16 %v2579_v21, %v2577_v20  ;;  %v2595_v32 = vmax.f32 %v459_v12, 0.0 }
  0x4a   : > { %781 = vmatmul.bf16.vlgmr.msra.gmra.mxu2 %v704_v34  ;;  %1344 = vmatpush.bf16.msrb.mxu3 %v2148_v35  ;;  %v818_v49 = vpack.c.bf16 %v2492_v45, %v2487_v43  ;;  %v2508_v52 = vld [vmem:[#allocation2 + $0x22] sm:$0xff]  ;;  %v2510_v53 = vld [vmem:[#allocation2 + $0x32] sm:$0xff] }
  0x4b   : > { %v2525_v57 = vpack.c.bf16 %v2510_v53, %v2508_v52  ;;  %v2545_v0 = vld [vmem:[#allocation2 + $0x30] sm:$0xff]  ;;  %475 = vst [vmem:[%s2266_s21 + $0x38] sm:$0xff] %v2595_v32 }
  0x4c   : > { %668 = vmatpush.bf16.msrb.mxu1 %v2091_v33  ;;  %1002 = vmatpush.bf16.msrb.mxu0 %v2123_v36  ;;  %v819_v7 = vpack.c.bf16 %v2547_v1, %v2545_v0  ;;  %484 = vst [vmem:[#allocation2 + $0x81] sm:$0xff] %v2595_v32  ;;  %v2154_v33 = vld [vmem:[%s2748_s6 + $0x228] sm:$0xff]  ;;  %v2143_v34 = vld [vmem:[%s2748_s6 + $0x1d0] sm:$0xff]  ;;  %v815_v36 = vld [vmem:[#allocation2 + $0x60] sm:$0xff] }
  0x4d   : > { %1231 = vmatpush.bf16.msrb.mxu2 %v2139_v37  ;;  %895 = vmatmul.bf16.vlgmr.msra.gmra.mxu3 %v818_v49  ;;  %v814_v35 = vld [vmem:[#allocation2 + $0x50] sm:$0xff]  ;;  %v2133_v37 = vld [vmem:[%s2748_s6 + $0x180] sm:$0xff] }
  0x4e   : > { %1345 = vmatpush.bf16.msrb.mxu3 %v2147_v39  ;;  %v2153_v39 = vld [vmem:[%s2748_s6 + $0x220] sm:$0xff]  ;;  %v2632_v43 = vld [vmem:[#allocation2 + $0x72] sm:$0xff] }
  0x50   : > { %669 = vmatpush.bf16.msrb.mxu1 %v2090_v38  ;;  %1003 = vmatpush.bf16.msrb.mxu0 %v2122_v41  ;;  %v820_v38 = vpack.c.bf16 %v815_v36, %v814_v35  ;;  %v2128_v41 = vld [vmem:[%s2748_s6 + $0x158] sm:$0xff] }
  0x51   : > { %1232 = vmatpush.bf16.msrb.mxu2 %v2138_v42  ;;  %v2630_v42 = vld [vmem:[#allocation2 + $0x62] sm:$0xff] }
  0x52   : > { %1346 = vmatpush.bf16.msrb.mxu3 %v2146_v47  ;;  %v494_v47 = vpack.c.bf16 %v2545_v0, %v2492_v45  ;;  %v707_v49 = vpack.c.bf16 %v2632_v43, %v2630_v42  ;;  %v2141_v45 = vld [vmem:[%s2748_s6 + $0x1c0] sm:$0xff] }
  0x54   : > { %670 = vmatpush.bf16.msrb.mxu1 %v2089_v44  ;;  %1004 = vmatpush.bf16.msrb.mxu0 %v2121_v48  ;;  %v2127_v44 = vld [vmem:[%s2748_s6 + $0x150] sm:$0xff]  ;;  %v933_v48 = vpack.c.bf16 %v2357_v40, %v2448_v30  ;;  %v1046_v40 = vpack.c.bf16 %v2508_v52, %v2450_v31  ;;  %v2150_v31 = vld [vmem:[%s2748_s6 + $0x208] sm:$0xff]  ;;  %v495_v52 = vpack.c.bf16 %v814_v35, %v2547_v1 }
  0x55   : > { %1233 = vmatpush.bf16.msrb.mxu2 %v2137_v50  ;;  %v2126_v50 = vld [vmem:[%s2748_s6 + $0x148] sm:$0xff]  ;;  %v816_v30 = vld [vmem:[#allocation2 + $0x70] sm:$0xff]  ;;  %v935_v1 = vpack.c.bf16 %v2595_v32, %v2416_v15 }
  0x56   : > { %1347 = vmatpush.bf16.msrb.mxu3 %v2145_v62  ;;  %v2149_v62 = vld [vmem:[%s2748_s6 + $0x200] sm:$0xff]  ;;  %v496_v0 = vpack.c.bf16 %v816_v30, %v815_v36 }
  0x57   : > { %613 = vmatmul.bf16.gmra.mxu1 %v2517_v55  ;;  %603 = vmatmul.bf16.gmra.mxu0 %v2521_v56 }
  0x58   : > { %671 = vmatpush.bf16.msrb.mxu1 %v2088_v51  ;;  %1005 = vmatpush.bf16.msrb.mxu0 %v2120_v54  ;;  %v2152_v51 = vld [vmem:[%s2748_s6 + $0x218] sm:$0xff]  ;;  %v817_v54 = vld [vmem:[#allocation2 + $0x80] sm:$0xff] }
  0x59   : > { %1234 = vmatpush.bf16.msrb.mxu2 %v2136_v60  ;;  %v821_v60 = vpack.c.bf16 %v817_v54, %v816_v30 }
  0x5a   : > { %786 = vmatmul.bf16.gmra.mxu2 %v2525_v57  ;;  %1348 = vmatpush.bf16.msrb.mxu3 %v2144_v4  ;;  %v1388_v4 = vld [vmem:[#allocation2 + $0x92] sm:$0xff] }
  0x5c   : > { %672 = vmatpush.bf16.msrb.mxu1 %v2087_v58  ;;  %1006 = vmatpush.bf16.msrb.mxu0 %v2119_v59  ;;  %v2151_v58 = vld [vmem:[%s2748_s6 + $0x210] sm:$0xff]  ;;  %v2125_v59 = vld [vmem:[%s2748_s6 + $0x140] sm:$0xff] }
  0x5d   : > { %1235 = vmatpush.bf16.msrb.mxu2 %v2135_v3  ;;  %900 = vmatmul.bf16.gmra.mxu3 %v819_v7  ;;  %v1387_v3 = vld [vmem:[#allocation2 + $0x82] sm:$0xff] }
  0x5e   : > { %1349 = vmatpush.bf16.msrb.mxu3 %v2143_v34  ;;  %v1392_v6 = vpack.c.bf16 %v1388_v4, %v1387_v3  ;;  %v1049_v9 = vpack.c.bf16 %v1387_v3, %v2632_v43 }
  0x60   : > { %673 = vmatpush.bf16.msrb.mxu1 %v2086_v63  ;;  %1007 = vmatpush.bf16.msrb.mxu0 %v2118_v2  ;;  %v1047_v63 = vpack.c.bf16 %v2577_v20, %v2510_v53  ;;  %v1160_v53 = vld [vmem:[#allocation2 + $0x90] sm:$0xff] }
  0x61   : > { %1236 = vmatpush.bf16.msrb.mxu2 %v2134_v61  ;;  %v1164_v2 = vpack.c.bf16 %v1160_v53, %v817_v54 }
  0x62   : > { %1350 = vmatpush.bf16.msrb.mxu3 %v2142_v13 }
  0x64   : > { %674 = vmatpush.bf16.msrb.mxu1 %v2085_v10  ;;  %1008 = vmatpush.bf16.msrb.mxu0 %v2117_v16 }
  0x65   : > { %1237 = vmatpush.bf16.msrb.mxu2 %v2133_v37 }
  0x66   : > { %1351 = vmatpush.bf16.msrb.mxu3 %v2141_v45 }
  0x67   : > { %675 = vmatmul.bf16.vlgmr.msrb.gmra.mxu1 %v493_v24  ;;  %1009 = vmatmul.bf16.vlgmr.msrb.gmra.mxu0 %v932_v25 }
  0x68   : > { %1115 = vmatpush.bf16.msra.mxu1 %v2132_v14  ;;  %1458 = vmatpush.bf16.msra.mxu0 %v2156_v17 }
  0x69   : > { %2165 = vmatpush.bf16.msra.mxu2 %v2156_v17 }
  0x6a   : > { %791 = vmatmul.bf16.gmra.mxu2 %v2590_v26 }
  0x6c   : > { %1116 = vmatpush.bf16.msra.mxu1 %v2131_v22  ;;  %1459 = vmatpush.bf16.msra.mxu0 %v2155_v29 }
  0x6d   : > { %905 = vmatmul.bf16.gmra.mxu3 %v820_v38  ;;  %2166 = vmatpush.bf16.msra.mxu2 %v2155_v29 }
  0x70   : > { %1117 = vmatpush.bf16.msra.mxu1 %v2130_v23  ;;  %1460 = vmatpush.bf16.msra.mxu0 %v2154_v33 }
  0x71   : > { %2167 = vmatpush.bf16.msra.mxu2 %v2154_v33 }
  0x74   : > { %1118 = vmatpush.bf16.msra.mxu1 %v2129_v46  ;;  %1461 = vmatpush.bf16.msra.mxu0 %v2153_v39 }
  0x75   : > { %2168 = vmatpush.bf16.msra.mxu2 %v2153_v39 }
  0x77   : > { %680 = vmatmul.bf16.gmra.mxu1 %v494_v47  ;;  %1014 = vmatmul.bf16.gmra.mxu0 %v933_v48 }
  0x78   : > { %1119 = vmatpush.bf16.msra.mxu1 %v2128_v41  ;;  %1462 = vmatpush.bf16.msra.mxu0 %v2152_v51 }
  0x79   : > { %2169 = vmatpush.bf16.msra.mxu2 %v2152_v51 }
  0x7a   : > { %796 = vmatmul.bf16.gmra.mxu2 %v707_v49 }
  0x7c   : > { %1120 = vmatpush.bf16.msra.mxu1 %v2127_v44  ;;  %1463 = vmatpush.bf16.msra.mxu0 %v2151_v58 }
  0x7d   : > { %910 = vmatmul.bf16.gmra.mxu3 %v821_v60  ;;  %2170 = vmatpush.bf16.msra.mxu2 %v2151_v58 }
  0x80   : > { %1121 = vmatpush.bf16.msra.mxu1 %v2126_v50  ;;  %1464 = vmatpush.bf16.msra.mxu0 %v2150_v31 }
  0x81   : > { %2171 = vmatpush.bf16.msra.mxu2 %v2150_v31 }
  0x84   : > { %1122 = vmatpush.bf16.msra.mxu1 %v2125_v59  ;;  %1465 = vmatpush.bf16.msra.mxu0 %v2149_v62 }
  0x85   : > { %2172 = vmatpush.bf16.msra.mxu2 %v2149_v62 }
  0x87   : > { %685 = vmatmul.bf16.gmra.mxu1 %v495_v52  ;;  %1019 = vmatmul.bf16.gmra.mxu0 %v934_v27 }
  0x8a   : > { %1238 = vmatmul.bf16.vlgmr.msrb.gmra.mxu2 %v494_v47 }
  0x8d   : > { %1352 = vmatmul.bf16.vlgmr.msrb.gmra.mxu3 %v2521_v56  ;;  %v1274_v56 = vld [vmem:[#allocation2 + $0x91] sm:$0xff] }
  0x8e   : > { %v1278_v15 = vpack.c.bf16 %v1274_v56, %v2595_v32 }
  0x97   : > { %690 = vmatmul.bf16.gmra.mxu1 %v496_v0  ;;  %1024 = vmatmul.bf16.gmra.mxu0 %v935_v1 }
  0x9a   : > { %1243 = vmatmul.bf16.gmra.mxu2 %v495_v52 }
  0x9d   : > { %1357 = vmatmul.bf16.gmra.mxu3 %v2444_v28  ;;  %v1048_v28 = vpack.c.bf16 %v2630_v42, %v2579_v21 }
  0xa7   : > { %1123 = vmatmul.bf16.vlgmr.msra.gmra.mxu1 %v1046_v40  ;;  %1466 = vmatmul.bf16.vlgmr.msra.gmra.mxu0 %v2525_v57 }
  0xaa   : > { %1248 = vmatmul.bf16.gmra.mxu2 %v496_v0 }
  0xad   : > { %1362 = vmatmul.bf16.gmra.mxu3 %v2517_v55 }
  0xb7   : > { %1128 = vmatmul.bf16.gmra.mxu1 %v1047_v63  ;;  %1471 = vmatmul.bf16.gmra.mxu0 %v2590_v26 }
  0xba   : > { %1253 = vmatmul.bf16.gmra.mxu2 %v1164_v2 }
  0xbd   : > { %1367 = vmatmul.bf16.gmra.mxu3 %v1278_v15 }
  0xc4   : > { %v609_v5 = vpop.f32.mrf.mxu1  ;;  %v599_v57 = vpop.f32.mrf.mxu0 }
  0xc7   : > { %1133 = vmatmul.bf16.gmra.mxu1 %v1048_v28  ;;  %1476 = vmatmul.bf16.gmra.mxu0 %v707_v49 }
  0xca   : > { %1481 = vmatmul.bf16.vlgmr.msra.gmra.mxu2 %v1392_v6 }
  0xcc   : > { %v611_v7 = vpop.f32.mrf.mxu1  ;;  %v601_v8 = vpop.f32.mrf.mxu0 }
  0xcd   : > { %v782_v55 = vpop.f32.mrf.mxu2 }
  0xd0   : > { %v896_v14 = vpop.f32.mrf.mxu3 }
  0xd4   : > { %v614_v16 = vpop.f32.mrf.mxu1  ;;  %v604_v11 = vpop.f32.mrf.mxu0 }
  0xd5   : > { %v784_v10 = vpop.f32.mrf.mxu2 }
  0xd7   : > { %1138 = vmatmul.bf16.gmra.mxu1 %v1049_v9 }
  0xd8   : > { %v898_v18 = vpop.f32.mrf.mxu3 }
  0xdc   : > { %v616_v19 = vpop.f32.mrf.mxu1  ;;  %v606_v20 = vpop.f32.mrf.mxu0 }
  0xdd   : > { %v787_v17 = vpop.f32.mrf.mxu2 }
  0xe0   : > { %v2680_v22 = vpop.f32.mrf.mxu3 }
  0xe4   : > { %v676_v12 = vpop.f32.mrf.mxu1  ;;  %v1010_v24 = vpop.f32.mrf.mxu0 }
  0xe5   : > { %v789_v21 = vpop.f32.mrf.mxu2  ;;  %v677_v25 = vadd.f32 %v676_v12, %v599_v57 }
  0xe7   : > { %v802_v26 = vadd.f32 %v782_v55, %v677_v25 }
  0xe8   : > { %v2682_v32 = vpop.f32.mrf.mxu3 }
  0xe9   : > { %v916_v3 = vadd.f32 %v896_v14, %v802_v26 }
  0xeb   : > { %v1030_v28 = vadd.f32 %v1010_v24, %v916_v3 }
  0xec   : > { %v678_v23 = vpop.f32.mrf.mxu1  ;;  %v1012_v61 = vpop.f32.mrf.mxu0 }
  0xed   : > { %v792_v29 = vpop.f32.mrf.mxu2  ;;  %v679_v27 = vadd.f32 %v678_v23, %v601_v8 }
  0xef   : > { %v803_v33 = vadd.f32 %v784_v10, %v679_v27 }
  0xf0   : > { %v2684_v35 = vpop.f32.mrf.mxu3 }
  0xf1   : > { %v917_v8 = vadd.f32 %v898_v18, %v803_v33 }
  0xf4   : > { %v681_v36 = vpop.f32.mrf.mxu1  ;;  %v1015_v37 = vpop.f32.mrf.mxu0 }
  0xf5   : > { %v794_v34 = vpop.f32.mrf.mxu2  ;;  %v682_v46 = vadd.f32 %v681_v36, %v604_v11 }
  0xf7   : > { %v804_v13 = vadd.f32 %v787_v17, %v682_v46 }
  0xf8   : > { %v2686_v39 = vpop.f32.mrf.mxu3 }
  0xf9   : > { %v918_v14 = vadd.f32 %v2680_v22, %v804_v13 }
  0xfb   : > { %v1032_v26 = vadd.f32 %v1015_v37, %v918_v14 }
  0xfc   : > { %v683_v41 = vpop.f32.mrf.mxu1  ;;  %v1017_v42 = vpop.f32.mrf.mxu0 }
  0xfd   : > { %v797_v38 = vpop.f32.mrf.mxu2  ;;  %v684_v43 = vadd.f32 %v683_v41, %v606_v20 }
  0xff   : > { %v805_v44 = vadd.f32 %v789_v21, %v684_v43 }
 0x100   : > { %v2690_v51 = vpop.f32.mrf.mxu3 }
 0x101   : > { %v919_v36 = vadd.f32 %v2682_v32, %v805_v44 }
 0x103   : > { %v1033_v13 = vadd.f32 %v1017_v42, %v919_v36 }
 0x104   : > { %v686_v48 = vpop.f32.mrf.mxu1  ;;  %v2688_v49 = vpop.f32.mrf.mxu0 }
 0x105   : > { %v799_v47 = vpop.f32.mrf.mxu2  ;;  %v687_v50 = vadd.f32 %v686_v48, %v609_v5 }
 0x107   : > { %v806_v45 = vadd.f32 %v792_v29, %v687_v50 }
 0x108   : > { %v2696_v60 = vpop.f32.mrf.mxu3 }
 0x10c   : > { %v688_v30 = vpop.f32.mrf.mxu1  ;;  %v2692_v54 = vpop.f32.mrf.mxu0 }
 0x10d   : > { %v1239_v40 = vpop.f32.mrf.mxu2  ;;  %v689_v58 = vadd.f32 %v688_v30, %v611_v7 }
 0x10f   : > { %v2694_v59 = vadd.f32 %v794_v34, %v689_v58  ;;  %v920_v58 = vadd.f32 %v2684_v35, %v806_v45 }
 0x110   : > { %v1353_v1 = vpop.f32.mrf.mxu3 }
 0x111   : > { %v1034_v44 = vadd.f32 %v2688_v49, %v920_v58 }
 0x114   : > { %v691_v52 = vpop.f32.mrf.mxu1  ;;  %v2698_v62 = vpop.f32.mrf.mxu0 }
 0x115   : > { %v1241_v31 = vpop.f32.mrf.mxu2  ;;  %v692_v63 = vadd.f32 %v691_v52, %v614_v16  ;;  %v1031_v16 = vadd.f32 %v1012_v61, %v917_v8 }
 0x117   : > { %v2700_v0 = vadd.f32 %v797_v38, %v692_v63 }
 0x118   : > { %v1355_v5 = vpop.f32.mrf.mxu3 }
 0x11c   : > { %v693_v2 = vpop.f32.mrf.mxu1  ;;  %v2702_v56 = vpop.f32.mrf.mxu0 }
 0x11d   : > { %v1244_v53 = vpop.f32.mrf.mxu2  ;;  %v694_v15 = vadd.f32 %v693_v2, %v616_v19 }
 0x11f   : > { %v2704_v4 = vadd.f32 %v799_v47, %v694_v15 }
 0x120   : > { %v1358_v21 = vpop.f32.mrf.mxu3 }
 0x124   : > { %v1124_v57 = vpop.f32.mrf.mxu1  ;;  %v1467_v6 = vpop.f32.mrf.mxu0 }
 0x125   : > { %v1144_v55 = vadd.f32 %v1124_v57, %v1030_v28  ;;  %v1246_v7 = vpop.f32.mrf.mxu2 }
 0x127   : > { %v1259_v9 = vadd.f32 %v1239_v40, %v1144_v55 }
 0x128   : > { %v1360_v41 = vpop.f32.mrf.mxu3 }
 0x129   : > { %v1373_v10 = vadd.f32 %v1353_v1, %v1259_v9 }
 0x12b   : > { %v1487_v11 = vadd.f32 %v1467_v6, %v1373_v10 }
 0x12c   : > { %v1126_v17 = vpop.f32.mrf.mxu1  ;;  %v1469_v20 = vpop.f32.mrf.mxu0 }
 0x12d   : > { %1495 = vst [vmem:[%s2271_s24] sm:$0xff] %v1487_v11  ;;  %v1145_v19 = vadd.f32 %v1126_v17, %v1031_v16  ;;  %v1249_v24 = vpop.f32.mrf.mxu2  ;;  %v1520_v18 = vmul.f32 %v1487_v11, %v1487_v11 }
 0x12f   : > { %v1260_v12 = vadd.f32 %v1241_v31, %v1145_v19 }
 0x130   : > { %v1363_v32 = vpop.f32.mrf.mxu3 }
 0x131   : > { %v1374_v25 = vadd.f32 %v1355_v5, %v1260_v12  ;;  %v921_v5 = vadd.f32 %v2686_v39, %v2694_v59 }
 0x133   : > { %v1488_v29 = vadd.f32 %v1469_v20, %v1374_v25  ;;  %v1035_v6 = vadd.f32 %v2692_v54, %v921_v5 }
 0x134   : > { %v1129_v23 = vpop.f32.mrf.mxu1  ;;  %v1472_v27 = vpop.f32.mrf.mxu0 }
 0x135   : > { %1496 = vst [vmem:[%s2271_s24 + $0x8] sm:$0xff] %v1488_v29  ;;  %v1504_v61 = vadd.f32 %v1488_v29, %v1487_v11  ;;  %v1521_v33 = vmul.f32 %v1488_v29, %v1488_v29  ;;  %v1146_v34 = vadd.f32 %v1129_v23, %v1032_v26  ;;  %v1251_v22 = vpop.f32.mrf.mxu2  ;;  %v922_v11 = vadd.f32 %v2690_v51, %v2700_v0 }
 0x136   : > { %v923_v26 = vadd.f32 %v2696_v60, %v2704_v4 }
 0x137   : > { %v1528_v46 = vadd.f32 %v1521_v33, %v1520_v18  ;;  %v1261_v38 = vadd.f32 %v1244_v53, %v1146_v34  ;;  %v1036_v19 = vadd.f32 %v2698_v62, %v922_v11 }
 0x138   : > { %v1365_v49 = vpop.f32.mrf.mxu3 }
 0x139   : > { %v1375_v43 = vadd.f32 %v1358_v21, %v1261_v38 }
 0x13b   : > { %v1489_v47 = vadd.f32 %v1472_v27, %v1375_v43  ;;  %v1037_v27 = vadd.f32 %v2702_v56, %v923_v26 }
 0x13c   : > { %v1131_v37 = vpop.f32.mrf.mxu1  ;;  %v1474_v48 = vpop.f32.mrf.mxu0 }
 0x13d   : > { %1497 = vst [vmem:[%s2271_s24 + $0x10] sm:$0xff] %v1489_v47  ;;  %v1505_v50 = vadd.f32 %v1504_v61, %v1489_v47  ;;  %v1522_v40 = vmul.f32 %v1489_v47, %v1489_v47  ;;  %v1147_v30 = vadd.f32 %v1131_v37, %v1033_v13  ;;  %v1254_v53 = vpop.f32.mrf.mxu2 }
 0x13f   : > { %v1529_v31 = vadd.f32 %v1528_v46, %v1522_v40  ;;  %v1262_v52 = vadd.f32 %v1246_v7, %v1147_v30 }
 0x140   : > { %v1368_v25 = vpop.f32.mrf.mxu3 }
 0x141   : > { %v1376_v63 = vadd.f32 %v1360_v41, %v1262_v52  ;;  %v1503_v52 = vld [vmem:[%s2751_s9] sm:$0x1] }
 0x143   : > { %v1490_v1 = vadd.f32 %v1474_v48, %v1376_v63 }
 0x144   : > { %v1134_v42 = vpop.f32.mrf.mxu1  ;;  %v1477_v28 = vpop.f32.mrf.mxu0 }
 0x145   : > { %1498 = vst [vmem:[%s2271_s24 + $0x18] sm:$0xff] %v1490_v1  ;;  %v1506_v2 = vadd.f32 %v1505_v50, %v1490_v1  ;;  %v1523_v15 = vmul.f32 %v1490_v1, %v1490_v1  ;;  %v1148_v3 = vadd.f32 %v1134_v42, %v1034_v44  ;;  %v1256_v16 = vpop.f32.mrf.mxu2  ;;  %v1519_v44 = vld [vmem:[%s2751_s9 + $0x1] sm:$0x1] }
 0x147   : > { %v1530_v57 = vadd.f32 %v1529_v31, %v1523_v15  ;;  %v1263_v35 = vadd.f32 %v1249_v24, %v1148_v3 }
 0x148   : > { %v1370_v38 = vpop.f32.mrf.mxu3 }
 0x149   : > { %v1377_v45 = vadd.f32 %v1363_v32, %v1263_v35 }
 0x14b   : > { %v1491_v55 = vadd.f32 %v1477_v28, %v1377_v45 }
 0x14c   : > { %v1136_v7 = vpop.f32.mrf.mxu1  ;;  %v1479_v39 = vpop.f32.mrf.mxu0 }
 0x14d   : > { %1499 = vst [vmem:[%s2271_s24 + $0x20] sm:$0xff] %v1491_v55  ;;  %v1507_v8 = vadd.f32 %v1506_v2, %v1491_v55  ;;  %v1524_v9 = vmul.f32 %v1491_v55, %v1491_v55  ;;  %v1149_v10 = vadd.f32 %v1136_v7, %v1035_v6  ;;  %v1482_v51 = vpop.f32.mrf.mxu2 }
 0x14f   : > { %v1531_v17 = vadd.f32 %v1530_v57, %v1524_v9  ;;  %v1264_v20 = vadd.f32 %v1251_v22, %v1149_v10 }
 0x151   : > { %v1378_v59 = vadd.f32 %v1365_v49, %v1264_v20 }
 0x153   : > { %v1492_v54 = vadd.f32 %v1479_v39, %v1378_v59 }
 0x154   : > { %v1139_v21 = vpop.f32.mrf.mxu1 }
 0x155   : > { %1500 = vst [vmem:[%s2271_s24 + $0x28] sm:$0xff] %v1492_v54  ;;  %v1508_v14 = vadd.f32 %v1507_v8, %v1492_v54  ;;  %v1525_v12 = vmul.f32 %v1492_v54, %v1492_v54  ;;  %v1150_v24 = vadd.f32 %v1139_v21, %v1036_v19  ;;  %v1484_v43 = vpop.f32.mrf.mxu2 }
 0x157   : > { %v1532_v29 = vadd.f32 %v1531_v17, %v1525_v12  ;;  %v1265_v23 = vadd.f32 %v1254_v53, %v1150_v24 }
 0x159   : > { %v1379_v0 = vadd.f32 %v1368_v25, %v1265_v23 }
 0x15b   : > { %v1493_v18 = vadd.f32 %v1482_v51, %v1379_v0 }
 0x15c   : > { %v1141_v62 = vpop.f32.mrf.mxu1 }
 0x15d   : > { %1501 = vst [vmem:[%s2271_s24 + $0x30] sm:$0xff] %v1493_v18  ;;  %v1509_v61 = vadd.f32 %v1508_v14, %v1493_v18  ;;  %v1526_v33 = vmul.f32 %v1493_v18, %v1493_v18  ;;  %v1151_v34 = vadd.f32 %v1141_v62, %v1037_v27 }
 0x15f   : > { %v1533_v36 = vadd.f32 %v1532_v29, %v1526_v33  ;;  %v1266_v46 = vadd.f32 %v1256_v16, %v1151_v34 }
 0x161   : > { %v1380_v41 = vadd.f32 %v1370_v38, %v1266_v46 }
 0x163   : > { %v1494_v22 = vadd.f32 %v1484_v43, %v1380_v41 }
 0x165   : > { %1502 = vst [vmem:[%s2271_s24 + $0x38] sm:$0xff] %v1494_v22  ;;  %v1510_v60 = vadd.f32 %v1509_v61, %v1494_v22  ;;  %v1527_v4 = vmul.f32 %v1494_v22, %v1494_v22 }
 0x167   : > { %v1511_v13 = vrot.slane %v1510_v60, 4  ;;  %v1534_v47 = vadd.f32 %v1533_v36, %v1527_v4 }
 0x169   : > { %v1512_v37 = vadd.f32 %v1511_v13, %v1510_v60  ;;  %v1535_v48 = vrot.slane %v1534_v47, 4 }
 0x16b   : > { %v1513_v56 = vrot.slane %v1512_v37, 2  ;;  %v1536_v50 = vadd.f32 %v1535_v48, %v1534_v47 }
 0x16d   : > { %v1514_v40 = vadd.f32 %v1513_v56, %v1512_v37  ;;  %v1537_v30 = vrot.slane %v1536_v50, 2 }
 0x16f   : > { %v1515_v58 = vrot.slane %v1514_v40, 1  ;;  %v1538_v31 = vadd.f32 %v1537_v30, %v1536_v50 }
 0x171   : > { %v1516_v63 = vadd.f32 %v1515_v58, %v1514_v40  ;;  %v1539_v32 = vrot.slane %v1538_v31, 1 }
 0x173   : > { %v1517_v1 = vadd.f32 %v1516_v63, %v1503_v52  ;;  %v1540_v53 = vadd.f32 %v1539_v32, %v1538_v31 }
 0x175   : > { %1518 = vst [vmem:[%s2751_s9] sm:$0x1] %v1517_v1  ;;  %v1541_v42 = vadd.f32 %v1540_v53, %v1519_v44 }
 0x177   : > { %1542 = vst [vmem:[%s2751_s9 + $0x1] sm:$0x1] %v1541_v42 }
 0x178 PF: > { %s20_s30 = sadd.s32 1, %s2192_s30  }
 0x179   : > { %p17_p5 = scmp.ge.s32.totalorder %s20_s30, 4  }
 0x17b   :  { %19 = sbr.rel (!%p17_p5) target bundleno = 1 (0x1), region = 115 }

</bundles_post_ra>
